<compile_context>
chip_gen: v5e
topology: v5e:2x2
jax: 0.10.0
libtpu: 0.0.40
codegen_flags: <defaults>
</compile_context>

<pallas_src>
import jax
import jax.numpy as jnp
import numpy as np
from jax.experimental import pallas as pl
from jax.experimental.pallas import tpu as pltpu

EPS = 1e-5        # nn.BatchNorm2d default eps
LANES = 128
SUBLANES = 8


def _round_up(x, m):
    return (x + m - 1) // m * m


def _vmem_capacity_bytes():
    try:
        return int(pltpu.get_tpu_info().vmem_capacity_bytes)
    except Exception:
        return 64 * 1024 * 1024            # conservative (v7x-sized) fallback


_VMEM_CAP = _vmem_capacity_bytes()
if _VMEM_CAP >= 100 * 1024 * 1024:         # v5e / v6e: 128 MiB physical VMEM
    _TILE_BUDGET = 20 * 1024 * 1024        # per-tile working-set budget
    _VMEM_LIMIT = 80 * 1024 * 1024
else:                                      # v7x: 64 MiB physical VMEM
    _TILE_BUDGET = 10 * 1024 * 1024
    _VMEM_LIMIT = 40 * 1024 * 1024


def _pick_conv_rows(h, wpa, cin_p, cout_p):
    """Largest divisor of H whose conv working set fits the per-tile VMEM budget."""
    best = 1
    for th in range(1, h + 1):
        if h % th:
            continue
        tile_px = th * wpa
        win = (th + 3) * wpa * cin_p * 2       # bf16 input window
        yout = tile_px * cout_p * 2            # bf16 conv-output tile
        acc = tile_px * cout_p * 4             # local f32 accumulator
        wts = 9 * cin_p * cout_p * 2           # resident bf16 weights
        need = 2 * win + 2 * yout + acc + 2 * wts   # x2 = double-buffered in/out
        if need <= _TILE_BUDGET:
            best = th
    return best


def _pick_bn_rows(h, wpa, cp):
    """Largest divisor of H for the purely elementwise bn+relu kernel."""
    best = 1
    for d in range(1, h + 1):
        if h % d:
            continue
        if d * wpa * cp * 2 * 2 * 2 <= _TILE_BUDGET:   # bf16 in+out, double-buffered
            best = d
    return best


def _make_windows(xpad4, th):
    """xpad4: (N, H+3, Wpa, C) zero-padded bf16 NHWC (1 top / 2 bottom pad rows,
    1 left pad col, width padded to Wpa, channels padded).  Returns
    (N, H//th, (th+3)*Wpa, C): per-tile conv input windows with the 3x3 halo rows
    baked in (the small row overlap is duplicated in HBM so the kernel needs a
    single rectangular DMA per step and zero in-kernel assembly)."""
    n, hp, wpa, c = xpad4.shape
    h = hp - 3
    rt = h // th
    idx = (np.arange(rt)[:, None] * th
           + np.arange(th + 3)[None, :]).astype(np.int32)     # (rt, th+3)
    xw = jnp.take(xpad4, jnp.asarray(idx), axis=1)            # (n, rt, th+3, wpa, c)
    return xw.reshape(n, rt, (th + 3) * wpa, c)


def _make_conv_stats_kernel(th, wpa, w_real):
    tile_px = th * wpa   # output pixels (rows) per grid step, incl. seam columns

    def kernel(xw_ref, wt_ref, y_ref, st_ref):
        # 3x3 conv = 9 shifted (tile_px, Cin) x (Cin, Cout) bf16 MXU matmuls,
        # accumulated in a local f32 value; y is stored exactly once.
        acc = jnp.dot(xw_ref[pl.ds(0, tile_px), :], wt_ref[0],
                      preferred_element_type=jnp.float32)
        for k in range(1, 9):
            kh, kw = divmod(k, 3)
            acc = acc + jnp.dot(xw_ref[pl.ds(kh * wpa + kw, tile_px), :],
                                wt_ref[k], preferred_element_type=jnp.float32)

        # Per-tile BN partial stats (sum, sum-of-squares) over valid pixels only:
        # seam / width-padding columns masked, and the masked value is squared so
        # garbage columns can never poison the statistics.
        col = jax.lax.broadcasted_iota(jnp.int32, (tile_px, 1), 0) % wpa
        ym = jnp.where(col < w_real, acc, 0.0)
        st_ref[...] = jnp.concatenate(
            [jnp.sum(ym, axis=0, keepdims=True),
             jnp.sum(ym * ym, axis=0, keepdims=True)], axis=0)

        y_ref[...] = acc.astype(y_ref.dtype)

    return kernel


def _conv3x3_with_stats(xw, wt, *, th, wpa, w_real):
    """xw: (N, RT, (th+3)*Wpa, Cin_p) bf16 windows; wt: (9, Cin_p, Cout_p) bf16."""
    n, rt, win_px, cin_p = xw.shape
    cout_p = wt.shape[-1]
    h = th * rt
    tile_px = th * wpa

    kernel = _make_conv_stats_kernel(th, wpa, w_real)

    flops = 2 * n * h * wpa * 9 * cin_p * cout_p
    bytes_accessed = int(xw.size * 2 + wt.size * 2
                         + n * h * wpa * cout_p * 2
                         + n * rt * 2 * cout_p * 4)

    y, st = pl.pallas_call(
        kernel,
        out_shape=(
            jax.ShapeDtypeStruct((n, h * wpa, cout_p), jnp.bfloat16),
            jax.ShapeDtypeStruct((n, rt, 2, cout_p), jnp.float32),
        ),
        grid_spec=pltpu.PrefetchScalarGridSpec(
            num_scalar_prefetch=0,
            grid=(n, rt),
            in_specs=[
                # one window (body + halo) per grid step — single activation DMA
                pl.BlockSpec((None, None, win_px, cin_p),
                             lambda ni, i: (ni, i, 0, 0)),
                # weights stay resident across the whole grid
                pl.BlockSpec((9, cin_p, cout_p), lambda ni, i: (0, 0, 0)),
            ],
            out_specs=[
                pl.BlockSpec((None, tile_px, cout_p), lambda ni, i: (ni, i, 0)),
                pl.BlockSpec((None, None, 2, cout_p), lambda ni, i: (ni, i, 0, 0)),
            ],
        ),
        compiler_params=pltpu.CompilerParams(
            dimension_semantics=("parallel", "parallel"),
            vmem_limit_bytes=_VMEM_LIMIT),
        cost_estimate=pl.CostEstimate(flops=flops, transcendentals=0,
                                      bytes_accessed=bytes_accessed),
    )(xw, wt)
    return y, st


def _bn_relu_kernel(y_ref, sc_ref, sh_ref, o_ref):
    y = y_ref[...].astype(jnp.float32)
    o_ref[...] = jnp.maximum(y * sc_ref[...] + sh_ref[...], 0.0).astype(o_ref.dtype)


def _bn_relu(y, scale, shift, *, h, wpa):
    n = y.shape[0]
    cp = y.shape[-1]
    d = _pick_bn_rows(h, wpa, cp)      # independent of the conv tile size
    tile_px = d * wpa
    return pl.pallas_call(
        _bn_relu_kernel,
        out_shape=jax.ShapeDtypeStruct((n, h * wpa, cp), jnp.bfloat16),
        grid_spec=pltpu.PrefetchScalarGridSpec(
            num_scalar_prefetch=0,
            grid=(n, h // d),
            in_specs=[
                pl.BlockSpec((None, tile_px, cp), lambda ni, i: (ni, i, 0)),
                pl.BlockSpec((1, cp), lambda ni, i: (0, 0)),
                pl.BlockSpec((1, cp), lambda ni, i: (0, 0)),
            ],
            out_specs=pl.BlockSpec((None, tile_px, cp), lambda ni, i: (ni, i, 0)),
        ),
        compiler_params=pltpu.CompilerParams(
            dimension_semantics=("parallel", "parallel"),
            vmem_limit_bytes=_VMEM_LIMIT),
    )(y, scale, shift)


def _prep_weight(w4, cin_p, cout_p):
    """(3,3,Cin,Cout) f32 -> (9, Cin_p, Cout_p) bf16 (zero-padded channels)."""
    kh, kw, ci, co = w4.shape
    wp = jnp.pad(w4, ((0, 0), (0, 0), (0, cin_p - ci), (0, cout_p - co)))
    return wp.reshape(kh * kw, cin_p, cout_p).astype(jnp.bfloat16)


@jax.jit
def double_conv(x_nchw, params):
    """DoubleConv forward: (conv3x3 pad1 => BN(train) => ReLU) * 2, NCHW in/out."""
    n, cin, h, w = x_nchw.shape
    cmid = params["g1"].shape[0]
    cout = params["g2"].shape[0]
    cin_p = _round_up(cin, LANES)
    cmid_p = _round_up(cmid, LANES)
    cout_p = _round_up(cout, LANES)
    wpa = _round_up(w + 2, SUBLANES)            # sublane-aligned padded row width

    def stage(xpad4, w4, gamma, beta, cp_out):
        cp_in = xpad4.shape[-1]
        th = _pick_conv_rows(h, wpa, cp_in, cp_out)
        xw = _make_windows(xpad4, th)
        y, st = _conv3x3_with_stats(xw, _prep_weight(w4, cp_in, cp_out),
                                    th=th, wpa=wpa, w_real=w)

        # BatchNorm2d training-mode (biased) statistics over all N*H*W pixels.
        cnt = jnp.float32(n * h * w)
        ssum = jnp.sum(st[:, :, 0, :], axis=(0, 1))
        ssq = jnp.sum(st[:, :, 1, :], axis=(0, 1))
        mu = ssum / cnt
        var = ssq / cnt - mu * mu
        inv = jax.lax.rsqrt(var + EPS)
        g = jnp.pad(gamma, (0, cp_out - gamma.shape[0]))
        b = jnp.pad(beta, (0, cp_out - beta.shape[0]))
        scale = (g * inv).reshape(1, cp_out).astype(jnp.float32)
        shift = (b - mu * g * inv).reshape(1, cp_out).astype(jnp.float32)

        return _bn_relu(y, scale, shift, h=h, wpa=wpa)   # (n, h*wpa, cp_out) bf16

    # Stage-1 input: NCHW -> NHWC, spatial zero-pad (1 top / 2 bottom rows for the
    # window gather, 1 left col, right cols up to wpa), channel pad, cast to bf16
    # — all in one fused XLA pass (no f32 intermediate).
    x = jnp.transpose(x_nchw, (0, 2, 3, 1))
    xp1 = jnp.pad(x, ((0, 0), (1, 2), (1, wpa - w - 1),
                      (0, cin_p - cin))).astype(jnp.bfloat16)
    a1 = stage(xp1, params["w1"], params["g1"], params["be1"], cmid_p)

    # Inter-stage glue (bf16, one fused XLA copy): drop seam columns, re-pad into
    # the padded layout for the second conv's window gather.
    a1_img = a1.reshape(n, h, wpa, cmid_p)[:, :, :w, :]
    xp2 = jnp.pad(a1_img, ((0, 0), (1, 2), (1, wpa - w - 1), (0, 0)))
    a2 = stage(xp2, params["w2"], params["g2"], params["be2"], cout_p)

    # NOTE: Conv2d biases are accepted by the module but are NOT needed here:
    # a per-channel bias cancels exactly under training-mode BatchNorm.
    out = a2.reshape(n, h, wpa, cout_p)[:, :, :w, :cout]
    return jnp.transpose(out, (0, 3, 1, 2)).astype(x_nchw.dtype)   # NHWC -> NCHW


def _reference(x, w1_4d, b1, g1, be1, w2_4d, b2, g2, be2):
    """Plain-JAX reference (lax conv, NCHW), training-mode BatchNorm, WITH bias."""
    def block(x, w4, b, g, be):
        w_oihw = jnp.transpose(w4, (3, 2, 0, 1))  # (kh,kw,ci,co) -> (co,ci,kh,kw)
        y = jax.lax.conv_general_dilated(
            x, w_oihw, window_strides=(1, 1), padding=((1, 1), (1, 1)),
            dimension_numbers=("NCHW", "OIHW", "NCHW"),
            precision=jax.lax.Precision.HIGHEST)
        y = y + b.reshape(1, -1, 1, 1)
        mu = jnp.mean(y, axis=(0, 2, 3), keepdims=True)
        var = jnp.mean(jnp.square(y - mu), axis=(0, 2, 3), keepdims=True)
        y = (y - mu) * jax.lax.rsqrt(var + EPS)
        y = y * g.reshape(1, -1, 1, 1) + be.reshape(1, -1, 1, 1)
        return jnp.maximum(y, 0.0)

    y = block(x, w1_4d, b1, g1, be1)
    return block(y, w2_4d, b2, g2, be2)


if __name__ == "__main__":
    # DoubleConv(in_channels=4, out_channels=8) -> mid_channels = 8
    N, Cin, Cmid, Cout, H, W = 2, 4, 8, 8, 16, 16

    key = jax.random.PRNGKey(0)
    keys = jax.random.split(key, 7)
    x = jax.random.normal(keys[0], (N, Cin, H, W), jnp.float32)

    def conv_init(k, cin, cout):
        # PyTorch-style uniform(-1/sqrt(fan_in), 1/sqrt(fan_in)); weight stored as
        # (kh, kw, cin, cout).
        bound = 1.0 / float(jnp.sqrt(cin * 9.0))
        kw_, kb_ = jax.random.split(k)
        w4 = jax.random.uniform(kw_, (3, 3, cin, cout), jnp.float32, -bound, bound)
        b = jax.random.uniform(kb_, (cout,), jnp.float32, -bound, bound)
        return w4, b

    w1_4d, b1 = conv_init(keys[1], Cin, Cmid)
    w2_4d, b2 = conv_init(keys[2], Cmid, Cout)
    g1 = 1.0 + 0.1 * jax.random.normal(keys[3], (Cmid,), jnp.float32)
    be1 = 0.1 * jax.random.normal(keys[4], (Cmid,), jnp.float32)
    g2 = 1.0 + 0.1 * jax.random.normal(keys[5], (Cout,), jnp.float32)
    be2 = 0.1 * jax.random.normal(keys[6], (Cout,), jnp.float32)

    params = dict(w1=w1_4d, g1=g1, be1=be1, w2=w2_4d, g2=g2, be2=be2)

    out = jax.block_until_ready(double_conv(x, params))
    assert out.shape == (N, Cout, H, W), out.shape

    ref = jax.block_until_ready(_reference(x, w1_4d, b1, g1, be1,
                                           w2_4d, b2, g2, be2))
    if not jnp.allclose(out, ref, rtol=5e-2, atol=5e-2):
        max_err = float(jnp.max(jnp.abs(out - ref)))
        raise AssertionError(f"mismatch vs reference, max abs err = {max_err}")

    print("KERNEL_OK")
</pallas_src>

<mosaic_0001>
module attributes {stable_mosaic.version = 11 : i64} {
  func.func @kernel(%arg0: i32, %arg1: i32, %arg2: memref<1x1x456x128xbf16, #tpu.memory_space<vmem>>, %arg3: memref<9x128x128xbf16, #tpu.memory_space<vmem>>, %arg4: memref<1x384x128xbf16, #tpu.memory_space<vmem>>, %arg5: memref<1x1x2x128xf32, #tpu.memory_space<vmem>>) attributes {dimension_semantics = [#tpu.dimension_semantics<parallel>, #tpu.dimension_semantics<parallel>], iteration_bounds = array<i64: 2, 1>, scalar_prefetch = 0 : i64, scratch_operands = 0 : i64, tpu.core_type = #tpu.core_type<tc>, window_params = [{transform_indices = @transform_0, window_bounds = array<i64: 1, 1, 456, 128>}, {pipeline_mode = #tpu.pipeline_mode<synchronous>, transform_indices = @transform_1, window_bounds = array<i64: 9, 128, 128>}, {transform_indices = @transform_2, window_bounds = array<i64: 1, 384, 128>}, {transform_indices = @transform_3, window_bounds = array<i64: 1, 1, 2, 128>}]} {
    %c0 = arith.constant 0 : index
    %c0_0 = arith.constant 0 : index
    %c0_1 = arith.constant 0 : index
    %c0_2 = arith.constant 0 : index
    %0 = vector.load %arg2[%c0, %c0_0, %c0_1, %c0_2] : memref<1x1x456x128xbf16, #tpu.memory_space<vmem>>, vector<1x1x384x128xbf16>
    %1 = vector.shape_cast %0 : vector<1x1x384x128xbf16> to vector<384x128xbf16>
    %c0_3 = arith.constant 0 : index
    %c0_4 = arith.constant 0 : index
    %c0_5 = arith.constant 0 : index
    %2 = vector.load %arg3[%c0_3, %c0_4, %c0_5] : memref<9x128x128xbf16, #tpu.memory_space<vmem>>, vector<1x128x128xbf16>
    %3 = vector.shape_cast %2 : vector<1x128x128xbf16> to vector<128x128xbf16>
    %cst = arith.constant dense<0.000000e+00> : vector<384x128xf32>
    %4 = tpu.matmul %1, %3, %cst {dimension_numbers = #tpu.dot_dimension_numbers<[1], [0], [0], [1], [0, 0, 1, 1], [], []>} : vector<384x128xbf16>, vector<128x128xbf16>, vector<384x128xf32> -> vector<384x128xf32>
    %c0_6 = arith.constant 0 : index
    %c0_7 = arith.constant 0 : index
    %c1 = arith.constant 1 : index
    %c0_8 = arith.constant 0 : index
    %5 = vector.load %arg2[%c0_6, %c0_7, %c1, %c0_8] : memref<1x1x456x128xbf16, #tpu.memory_space<vmem>>, vector<1x1x384x128xbf16>
    %6 = vector.shape_cast %5 : vector<1x1x384x128xbf16> to vector<384x128xbf16>
    %c1_9 = arith.constant 1 : index
    %c0_10 = arith.constant 0 : index
    %c0_11 = arith.constant 0 : index
    %7 = vector.load %arg3[%c1_9, %c0_10, %c0_11] : memref<9x128x128xbf16, #tpu.memory_space<vmem>>, vector<1x128x128xbf16>
    %8 = vector.shape_cast %7 : vector<1x128x128xbf16> to vector<128x128xbf16>
    %cst_12 = arith.constant dense<0.000000e+00> : vector<384x128xf32>
    %9 = tpu.matmul %6, %8, %cst_12 {dimension_numbers = #tpu.dot_dimension_numbers<[1], [0], [0], [1], [0, 0, 1, 1], [], []>} : vector<384x128xbf16>, vector<128x128xbf16>, vector<384x128xf32> -> vector<384x128xf32>
    %10 = arith.addf %4, %9 : vector<384x128xf32>
    %c0_13 = arith.constant 0 : index
    %c0_14 = arith.constant 0 : index
    %c2 = arith.constant 2 : index
    %c0_15 = arith.constant 0 : index
    %11 = vector.load %arg2[%c0_13, %c0_14, %c2, %c0_15] : memref<1x1x456x128xbf16, #tpu.memory_space<vmem>>, vector<1x1x384x128xbf16>
    %12 = vector.shape_cast %11 : vector<1x1x384x128xbf16> to vector<384x128xbf16>
    %c2_16 = arith.constant 2 : index
    %c0_17 = arith.constant 0 : index
    %c0_18 = arith.constant 0 : index
    %13 = vector.load %arg3[%c2_16, %c0_17, %c0_18] : memref<9x128x128xbf16, #tpu.memory_space<vmem>>, vector<1x128x128xbf16>
    %14 = vector.shape_cast %13 : vector<1x128x128xbf16> to vector<128x128xbf16>
    %cst_19 = arith.constant dense<0.000000e+00> : vector<384x128xf32>
    %15 = tpu.matmul %12, %14, %cst_19 {dimension_numbers = #tpu.dot_dimension_numbers<[1], [0], [0], [1], [0, 0, 1, 1], [], []>} : vector<384x128xbf16>, vector<128x128xbf16>, vector<384x128xf32> -> vector<384x128xf32>
    %16 = arith.addf %10, %15 : vector<384x128xf32>
    %c0_20 = arith.constant 0 : index
    %c0_21 = arith.constant 0 : index
    %c24 = arith.constant 24 : index
    %c0_22 = arith.constant 0 : index
    %17 = vector.load %arg2[%c0_20, %c0_21, %c24, %c0_22] : memref<1x1x456x128xbf16, #tpu.memory_space<vmem>>, vector<1x1x384x128xbf16>
    %18 = vector.shape_cast %17 : vector<1x1x384x128xbf16> to vector<384x128xbf16>
    %c3 = arith.constant 3 : index
    %c0_23 = arith.constant 0 : index
    %c0_24 = arith.constant 0 : index
    %19 = vector.load %arg3[%c3, %c0_23, %c0_24] : memref<9x128x128xbf16, #tpu.memory_space<vmem>>, vector<1x128x128xbf16>
    %20 = vector.shape_cast %19 : vector<1x128x128xbf16> to vector<128x128xbf16>
    %cst_25 = arith.constant dense<0.000000e+00> : vector<384x128xf32>
    %21 = tpu.matmul %18, %20, %cst_25 {dimension_numbers = #tpu.dot_dimension_numbers<[1], [0], [0], [1], [0, 0, 1, 1], [], []>} : vector<384x128xbf16>, vector<128x128xbf16>, vector<384x128xf32> -> vector<384x128xf32>
    %22 = arith.addf %16, %21 : vector<384x128xf32>
    %c0_26 = arith.constant 0 : index
    %c0_27 = arith.constant 0 : index
    %c25 = arith.constant 25 : index
    %c0_28 = arith.constant 0 : index
    %23 = vector.load %arg2[%c0_26, %c0_27, %c25, %c0_28] : memref<1x1x456x128xbf16, #tpu.memory_space<vmem>>, vector<1x1x384x128xbf16>
    %24 = vector.shape_cast %23 : vector<1x1x384x128xbf16> to vector<384x128xbf16>
    %c4 = arith.constant 4 : index
    %c0_29 = arith.constant 0 : index
    %c0_30 = arith.constant 0 : index
    %25 = vector.load %arg3[%c4, %c0_29, %c0_30] : memref<9x128x128xbf16, #tpu.memory_space<vmem>>, vector<1x128x128xbf16>
    %26 = vector.shape_cast %25 : vector<1x128x128xbf16> to vector<128x128xbf16>
    %cst_31 = arith.constant dense<0.000000e+00> : vector<384x128xf32>
    %27 = tpu.matmul %24, %26, %cst_31 {dimension_numbers = #tpu.dot_dimension_numbers<[1], [0], [0], [1], [0, 0, 1, 1], [], []>} : vector<384x128xbf16>, vector<128x128xbf16>, vector<384x128xf32> -> vector<384x128xf32>
    %28 = arith.addf %22, %27 : vector<384x128xf32>
    %c0_32 = arith.constant 0 : index
    %c0_33 = arith.constant 0 : index
    %c26 = arith.constant 26 : index
    %c0_34 = arith.constant 0 : index
    %29 = vector.load %arg2[%c0_32, %c0_33, %c26, %c0_34] : memref<1x1x456x128xbf16, #tpu.memory_space<vmem>>, vector<1x1x384x128xbf16>
    %30 = vector.shape_cast %29 : vector<1x1x384x128xbf16> to vector<384x128xbf16>
    %c5 = arith.constant 5 : index
    %c0_35 = arith.constant 0 : index
    %c0_36 = arith.constant 0 : index
    %31 = vector.load %arg3[%c5, %c0_35, %c0_36] : memref<9x128x128xbf16, #tpu.memory_space<vmem>>, vector<1x128x128xbf16>
    %32 = vector.shape_cast %31 : vector<1x128x128xbf16> to vector<128x128xbf16>
    %cst_37 = arith.constant dense<0.000000e+00> : vector<384x128xf32>
    %33 = tpu.matmul %30, %32, %cst_37 {dimension_numbers = #tpu.dot_dimension_numbers<[1], [0], [0], [1], [0, 0, 1, 1], [], []>} : vector<384x128xbf16>, vector<128x128xbf16>, vector<384x128xf32> -> vector<384x128xf32>
    %34 = arith.addf %28, %33 : vector<384x128xf32>
    %c0_38 = arith.constant 0 : index
    %c0_39 = arith.constant 0 : index
    %c48 = arith.constant 48 : index
    %c0_40 = arith.constant 0 : index
    %35 = vector.load %arg2[%c0_38, %c0_39, %c48, %c0_40] : memref<1x1x456x128xbf16, #tpu.memory_space<vmem>>, vector<1x1x384x128xbf16>
    %36 = vector.shape_cast %35 : vector<1x1x384x128xbf16> to vector<384x128xbf16>
    %c6 = arith.constant 6 : index
    %c0_41 = arith.constant 0 : index
    %c0_42 = arith.constant 0 : index
    %37 = vector.load %arg3[%c6, %c0_41, %c0_42] : memref<9x128x128xbf16, #tpu.memory_space<vmem>>, vector<1x128x128xbf16>
    %38 = vector.shape_cast %37 : vector<1x128x128xbf16> to vector<128x128xbf16>
    %cst_43 = arith.constant dense<0.000000e+00> : vector<384x128xf32>
    %39 = tpu.matmul %36, %38, %cst_43 {dimension_numbers = #tpu.dot_dimension_numbers<[1], [0], [0], [1], [0, 0, 1, 1], [], []>} : vector<384x128xbf16>, vector<128x128xbf16>, vector<384x128xf32> -> vector<384x128xf32>
    %40 = arith.addf %34, %39 : vector<384x128xf32>
    %c0_44 = arith.constant 0 : index
    %c0_45 = arith.constant 0 : index
    %c49 = arith.constant 49 : index
    %c0_46 = arith.constant 0 : index
    %41 = vector.load %arg2[%c0_44, %c0_45, %c49, %c0_46] : memref<1x1x456x128xbf16, #tpu.memory_space<vmem>>, vector<1x1x384x128xbf16>
    %42 = vector.shape_cast %41 : vector<1x1x384x128xbf16> to vector<384x128xbf16>
    %c7 = arith.constant 7 : index
    %c0_47 = arith.constant 0 : index
    %c0_48 = arith.constant 0 : index
    %43 = vector.load %arg3[%c7, %c0_47, %c0_48] : memref<9x128x128xbf16, #tpu.memory_space<vmem>>, vector<1x128x128xbf16>
    %44 = vector.shape_cast %43 : vector<1x128x128xbf16> to vector<128x128xbf16>
    %cst_49 = arith.constant dense<0.000000e+00> : vector<384x128xf32>
    %45 = tpu.matmul %42, %44, %cst_49 {dimension_numbers = #tpu.dot_dimension_numbers<[1], [0], [0], [1], [0, 0, 1, 1], [], []>} : vector<384x128xbf16>, vector<128x128xbf16>, vector<384x128xf32> -> vector<384x128xf32>
    %46 = arith.addf %40, %45 : vector<384x128xf32>
    %c0_50 = arith.constant 0 : index
    %c0_51 = arith.constant 0 : index
    %c50 = arith.constant 50 : index
    %c0_52 = arith.constant 0 : index
    %47 = vector.load %arg2[%c0_50, %c0_51, %c50, %c0_52] : memref<1x1x456x128xbf16, #tpu.memory_space<vmem>>, vector<1x1x384x128xbf16>
    %48 = vector.shape_cast %47 : vector<1x1x384x128xbf16> to vector<384x128xbf16>
    %c8 = arith.constant 8 : index
    %c0_53 = arith.constant 0 : index
    %c0_54 = arith.constant 0 : index
    %49 = vector.load %arg3[%c8, %c0_53, %c0_54] : memref<9x128x128xbf16, #tpu.memory_space<vmem>>, vector<1x128x128xbf16>
    %50 = vector.shape_cast %49 : vector<1x128x128xbf16> to vector<128x128xbf16>
    %cst_55 = arith.constant dense<0.000000e+00> : vector<384x128xf32>
    %51 = tpu.matmul %48, %50, %cst_55 {dimension_numbers = #tpu.dot_dimension_numbers<[1], [0], [0], [1], [0, 0, 1, 1], [], []>} : vector<384x128xbf16>, vector<128x128xbf16>, vector<384x128xf32> -> vector<384x128xf32>
    %52 = arith.addf %46, %51 : vector<384x128xf32>
    %53 = tpu.iota {dimensions = array<i32: 0>} : vector<384x1xi32>
    %c24_i32 = arith.constant 24 : i32
    %c0_i32 = arith.constant 0 : i32
    %54 = arith.cmpi eq, %c24_i32, %c0_i32 : i32
    %c1_i32 = arith.constant 1 : i32
    %55 = arith.select %54, %c1_i32, %c24_i32 : i32
    %56 = vector.broadcast %55 : i32 to vector<384x1xi32>
    %57 = arith.remsi %53, %56 : vector<384x1xi32>
    %c0_i32_56 = arith.constant 0 : i32
    %58 = vector.broadcast %c0_i32_56 : i32 to vector<384x1xi32>
    %59 = arith.cmpi ne, %57, %58 : vector<384x1xi32>
    %c0_i32_57 = arith.constant 0 : i32
    %60 = vector.broadcast %c0_i32_57 : i32 to vector<384x1xi32>
    %61 = arith.cmpi slt, %57, %60 : vector<384x1xi32>
    %c0_i32_58 = arith.constant 0 : i32
    %62 = arith.cmpi slt, %55, %c0_i32_58 : i32
    %63 = vector.broadcast %62 : i1 to vector<384x1xi1>
    %64 = vector.broadcast %63 : vector<384x1xi1> to vector<384x1xi1>
    %65 = arith.xori %61, %64 : vector<384x1xi1>
    %66 = arith.andi %65, %59 : vector<384x1xi1>
    %67 = vector.broadcast %55 : i32 to vector<384x1xi32>
    %68 = arith.addi %57, %67 : vector<384x1xi32>
    %69 = arith.select %66, %68, %57 : vector<384x1xi1>, vector<384x1xi32>
    %c16_i32 = arith.constant 16 : i32
    %70 = vector.broadcast %c16_i32 : i32 to vector<384x1xi32>
    %71 = arith.cmpi slt, %69, %70 : vector<384x1xi32>
    %cst_59 = arith.constant 0.000000e+00 : f32
    %72 = vector.shape_cast %71 : vector<384x1xi1> to vector<384x1xi1>
    %73 = vector.broadcast %72 : vector<384x1xi1> to vector<384x128xi1>
    %74 = vector.broadcast %cst_59 : f32 to vector<384x128xf32>
    %75 = arith.select %73, %52, %74 : vector<384x128xi1>, vector<384x128xf32>
    %cst_60 = arith.constant dense<0.000000e+00> : vector<128xf32>
    %76 = vector.multi_reduction <add>, %75, %cst_60 [0] : vector<384x128xf32> to vector<128xf32>
    %77 = vector.shape_cast %76 : vector<128xf32> to vector<1x128xf32>
    %78 = arith.mulf %75, %75 : vector<384x128xf32>
    %cst_61 = arith.constant dense<0.000000e+00> : vector<128xf32>
    %79 = vector.multi_reduction <add>, %78, %cst_61 [0] : vector<384x128xf32> to vector<128xf32>
    %80 = vector.shape_cast %79 : vector<128xf32> to vector<1x128xf32>
    %81 = tpu.concatenate %77, %80 in 0 : vector<1x128xf32>, vector<1x128xf32> -> vector<2x128xf32>
    %c0_62 = arith.constant 0 : index
    %c0_63 = arith.constant 0 : index
    %c0_64 = arith.constant 0 : index
    %c0_65 = arith.constant 0 : index
    %82 = vector.load %arg5[%c0_62, %c0_63, %c0_64, %c0_65] : memref<1x1x2x128xf32, #tpu.memory_space<vmem>>, vector<1x1x2x128xf32>
    %83 = vector.shape_cast %82 : vector<1x1x2x128xf32> to vector<2x128xf32>
    %84 = vector.shape_cast %81 : vector<2x128xf32> to vector<1x1x2x128xf32>
    tpu.vector_store %arg5[%c0_62, %c0_63, %c0_64, %c0_65], %84 {strides = array<i32>} : memref<1x1x2x128xf32, #tpu.memory_space<vmem>>, vector<1x1x2x128xf32>,
    %85 = arith.truncf %52 : vector<384x128xf32> to vector<384x128xbf16>
    %c0_66 = arith.constant 0 : index
    %c0_67 = arith.constant 0 : index
    %c0_68 = arith.constant 0 : index
    %86 = vector.load %arg4[%c0_66, %c0_67, %c0_68] : memref<1x384x128xbf16, #tpu.memory_space<vmem>>, vector<1x384x128xbf16>
    %87 = vector.shape_cast %86 : vector<1x384x128xbf16> to vector<384x128xbf16>
    %88 = vector.shape_cast %85 : vector<384x128xbf16> to vector<1x384x128xbf16>
    tpu.vector_store %arg4[%c0_66, %c0_67, %c0_68], %88 {strides = array<i32>} : memref<1x384x128xbf16, #tpu.memory_space<vmem>>, vector<1x384x128xbf16>,
    return
  }
  func.func @transform_0(%arg0: i32, %arg1: i32) -> (i32, i32, i32, i32) {
    %c0_i32 = arith.constant 0 : i32
    %c0_i32_0 = arith.constant 0 : i32
    %c0_i32_1 = arith.constant 0 : i32
    return %arg0, %arg1, %c0_i32, %c0_i32_0 : i32, i32, i32, i32
  }
  func.func @transform_1(%arg0: i32, %arg1: i32) -> (i32, i32, i32) {
    %c0_i32 = arith.constant 0 : i32
    %c0_i32_0 = arith.constant 0 : i32
    %c0_i32_1 = arith.constant 0 : i32
    %c0_i32_2 = arith.constant 0 : i32
    return %c0_i32, %c0_i32_0, %c0_i32_1 : i32, i32, i32
  }
  func.func @transform_2(%arg0: i32, %arg1: i32) -> (i32, i32, i32) {
    %c0_i32 = arith.constant 0 : i32
    %c0_i32_0 = arith.constant 0 : i32
    return %arg0, %arg1, %c0_i32 : i32, i32, i32
  }
  func.func @transform_3(%arg0: i32, %arg1: i32) -> (i32, i32, i32, i32) {
    %c0_i32 = arith.constant 0 : i32
    %c0_i32_0 = arith.constant 0 : i32
    %c0_i32_1 = arith.constant 0 : i32
    return %arg0, %arg1, %c0_i32, %c0_i32_0 : i32, i32, i32, i32
  }
}

module attributes {stable_mosaic.version = 11 : i64} {
  func.func @_bn_relu_kernel(%arg0: i32, %arg1: i32, %arg2: memref<1x384x128xbf16, #tpu.memory_space<vmem>>, %arg3: memref<1x128xf32, #tpu.memory_space<vmem>>, %arg4: memref<1x128xf32, #tpu.memory_space<vmem>>, %arg5: memref<1x384x128xbf16, #tpu.memory_space<vmem>>) attributes {dimension_semantics = [#tpu.dimension_semantics<parallel>, #tpu.dimension_semantics<parallel>], iteration_bounds = array<i64: 2, 1>, scalar_prefetch = 0 : i64, scratch_operands = 0 : i64, tpu.core_type = #tpu.core_type<tc>, window_params = [{transform_indices = @transform_0, window_bounds = array<i64: 1, 384, 128>}, {pipeline_mode = #tpu.pipeline_mode<synchronous>, transform_indices = @transform_1, window_bounds = array<i64: 1, 128>}, {pipeline_mode = #tpu.pipeline_mode<synchronous>, transform_indices = @transform_2, window_bounds = array<i64: 1, 128>}, {transform_indices = @transform_3, window_bounds = array<i64: 1, 384, 128>}]} {
    %c0 = arith.constant 0 : index
    %c0_0 = arith.constant 0 : index
    %c0_1 = arith.constant 0 : index
    %0 = vector.load %arg2[%c0, %c0_0, %c0_1] : memref<1x384x128xbf16, #tpu.memory_space<vmem>>, vector<1x384x128xbf16>
    %1 = vector.shape_cast %0 : vector<1x384x128xbf16> to vector<384x128xbf16>
    %2 = arith.extf %1 : vector<384x128xbf16> to vector<384x128xf32>
    %c0_2 = arith.constant 0 : index
    %c0_3 = arith.constant 0 : index
    %3 = vector.load %arg3[%c0_2, %c0_3] : memref<1x128xf32, #tpu.memory_space<vmem>>, vector<1x128xf32>
    %4 = vector.broadcast %3 : vector<1x128xf32> to vector<384x128xf32>
    %5 = arith.mulf %2, %4 : vector<384x128xf32>
    %c0_4 = arith.constant 0 : index
    %c0_5 = arith.constant 0 : index
    %6 = vector.load %arg4[%c0_4, %c0_5] : memref<1x128xf32, #tpu.memory_space<vmem>>, vector<1x128xf32>
    %7 = vector.broadcast %6 : vector<1x128xf32> to vector<384x128xf32>
    %8 = arith.addf %5, %7 : vector<384x128xf32>
    %cst = arith.constant 0.000000e+00 : f32
    %9 = vector.broadcast %cst : f32 to vector<384x128xf32>
    %10 = arith.maximumf %8, %9 : vector<384x128xf32>
    %11 = arith.truncf %10 : vector<384x128xf32> to vector<384x128xbf16>
    %c0_6 = arith.constant 0 : index
    %c0_7 = arith.constant 0 : index
    %c0_8 = arith.constant 0 : index
    %12 = vector.load %arg5[%c0_6, %c0_7, %c0_8] : memref<1x384x128xbf16, #tpu.memory_space<vmem>>, vector<1x384x128xbf16>
    %13 = vector.shape_cast %12 : vector<1x384x128xbf16> to vector<384x128xbf16>
    %14 = vector.shape_cast %11 : vector<384x128xbf16> to vector<1x384x128xbf16>
    tpu.vector_store %arg5[%c0_6, %c0_7, %c0_8], %14 {strides = array<i32>} : memref<1x384x128xbf16, #tpu.memory_space<vmem>>, vector<1x384x128xbf16>,
    return
  }
  func.func @transform_0(%arg0: i32, %arg1: i32) -> (i32, i32, i32) {
    %c0_i32 = arith.constant 0 : i32
    %c0_i32_0 = arith.constant 0 : i32
    return %arg0, %arg1, %c0_i32 : i32, i32, i32
  }
  func.func @transform_1(%arg0: i32, %arg1: i32) -> (i32, i32) {
    %c0_i32 = arith.constant 0 : i32
    %c0_i32_0 = arith.constant 0 : i32
    %c0_i32_1 = arith.constant 0 : i32
    return %c0_i32, %c0_i32_0 : i32, i32
  }
  func.func @transform_2(%arg0: i32, %arg1: i32) -> (i32, i32) {
    %c0_i32 = arith.constant 0 : i32
    %c0_i32_0 = arith.constant 0 : i32
    %c0_i32_1 = arith.constant 0 : i32
    return %c0_i32, %c0_i32_0 : i32, i32
  }
  func.func @transform_3(%arg0: i32, %arg1: i32) -> (i32, i32, i32) {
    %c0_i32 = arith.constant 0 : i32
    %c0_i32_0 = arith.constant 0 : i32
    return %arg0, %arg1, %c0_i32 : i32, i32, i32
  }
}

</mosaic_0001>

<bundles_post_ra>
// kernel: double_conv.5
= control target key start
LH: loop header
LB: loop body
LE: loop exit
PB: predicated region body
PF: predicated region fallthrough
CT: control target
= control target key end

     0   :  { %s983_s12 = smov 0   ;;  %s985_s13 = smov 0   ;;  %s1181_s0 = inlined_call_operand.vmem [shape: bf16[2,384,128], index: 0, kind: input, shape index: {}]   ;;  %s1182_s1 = inlined_call_operand.vmem [shape: f32[1,128], index: 1, kind: input, shape index: {}]   ;;  %s1183_s2 = inlined_call_operand.vmem [shape: f32[1,128], index: 2, kind: input, shape index: {}]   ;;  %s1184_s3 = inlined_call_operand.vmem [shape: bf16[2,384,128], index: 3, kind: output, shape index: {}]  }
   0x1   :  { %s987_s14 = smov 0  }
   0x2 LB: > { %s25_s15 = sadd.s32 1, %s957_s13  ;;  %p645_p0 = scmp.ge.s32.totalorder %s961_s14, 1  ;;  %s961_s14 = sphi %s987_s14, %s13_s14   ;;  %s957_s13 = sphi %s985_s13, %s1186_s13   ;;  %s953_s12 = sphi %s983_s12, %s1185_s12  }
   0x3   : > { %p27_p1 = scmp.ge.s32.totalorder %s25_s15, 2  ;;  %p158_p2 = scmp.lt.s32.totalorder %s961_s14, 3 }
   0x5   : > { %s1188_s15 = smov (%p27_p1, %s25_s15), 0  ;;  %p159_p3 = pnand %p645_p0, %p158_p2 }
   0x6   : > { %p191_p4 = scmp.lt.s32.totalorder (!%p159_p3), %s953_s12, 1 }
   0x7   : > { %162 = sbr.rel (%p159_p3) target bundleno = 77 (0x4d), region = 32 }
   0xc   : > { %s1190_s12 = smov (!%p191_p4, %s953_s12), 1  ;;  %v1014_v0 = vld [vmem:[%s1182_s1] ss:$0 sm:$0xff] }
   0xd   : > { %s912_s16 = smul.u32 192, %s1190_s12  ;;  %v1022_v6 = vld [vmem:[%s1183_s2] ss:$0 sm:$0xff] }
   0xf   : > { %s1009_s19 = scalar_lea.vmem %s1181_s0, %s912_s16  ;;  %s1048_s26 = scalar_lea.vmem %s1184_s3, %s912_s16 }
  0x10   : > { %v651_v1 = vld [vmem:[%s1009_s19] sm:$0xff]   ;;  %v866_v2 = vld [vmem:[%s1009_s19 + $0x8] sm:$0xff]   ;;  %v867_v3 = vld [vmem:[%s1009_s19 + $0x10] sm:$0xff]  }
  0x11   : > { %v652_v4 = vunpack.c.l.bf16 %v651_v1  ;;  %v653_v5 = vunpack.c.h.bf16 %v651_v1  ;;  %v656_v7 = vunpack.c.l.bf16 %v866_v2  ;;  %v657_v8 = vunpack.c.h.bf16 %v866_v2  ;;  %v868_v9 = vld [vmem:[%s1009_s19 + $0x18] sm:$0xff]   ;;  %v869_v30 = vld [vmem:[%s1009_s19 + $0x20] sm:$0xff]   ;;  %v870_v35 = vld [vmem:[%s1009_s19 + $0x28] sm:$0xff]  }
  0x12   : > { %v660_v10 = vunpack.c.l.bf16 %v867_v3  ;;  %v661_v11 = vunpack.c.h.bf16 %v867_v3  ;;  %v664_v12 = vunpack.c.l.bf16 %v868_v9  ;;  %v665_v13 = vunpack.c.h.bf16 %v868_v9  ;;  %v871_v40 = vld [vmem:[%s1009_s19 + $0x30] sm:$0xff]   ;;  %v872_v45 = vld [vmem:[%s1009_s19 + $0x38] sm:$0xff]   ;;  %v873_v3 = vld [vmem:[%s1009_s19 + $0x40] sm:$0xff]  }
  0x13   : > { %v310_v14 = vmul.f32 %v1014_v0, %v652_v4  ;;  %v311_v15 = vmul.f32 %v1014_v0, %v653_v5  ;;  %v312_v16 = vmul.f32 %v1014_v0, %v656_v7  ;;  %v313_v17 = vmul.f32 %v1014_v0, %v657_v8 }
  0x14   : > { %v314_v18 = vmul.f32 %v1014_v0, %v660_v10  ;;  %v315_v19 = vmul.f32 %v1014_v0, %v661_v11  ;;  %v316_v20 = vmul.f32 %v1014_v0, %v664_v12  ;;  %v317_v21 = vmul.f32 %v1014_v0, %v665_v13  ;;  %v874_v13 = vld [vmem:[%s1009_s19 + $0x48] sm:$0xff]  }
  0x15   : > { %v362_v22 = vadd.f32 %v1022_v6, %v310_v14  ;;  %v363_v23 = vadd.f32 %v1022_v6, %v311_v15  ;;  %v364_v24 = vadd.f32 %v1022_v6, %v312_v16  ;;  %v365_v25 = vadd.f32 %v1022_v6, %v313_v17 }
  0x16   : > { %v366_v26 = vadd.f32 %v1022_v6, %v314_v18  ;;  %v367_v27 = vadd.f32 %v1022_v6, %v315_v19  ;;  %v368_v28 = vadd.f32 %v1022_v6, %v316_v20  ;;  %v369_v29 = vadd.f32 %v1022_v6, %v317_v21  ;;  %v875_v18 = vld [vmem:[%s1009_s19 + $0x50] sm:$0xff]  }
  0x17   : > { %v410_v31 = vmax.f32 %v362_v22, 0.0  ;;  %v411_v32 = vmax.f32 %v363_v23, 0.0  ;;  %v412_v33 = vmax.f32 %v364_v24, 0.0  ;;  %v413_v34 = vmax.f32 %v365_v25, 0.0  ;;  %v876_v23 = vld [vmem:[%s1009_s19 + $0x58] sm:$0xff]  }
  0x18   : > { %v414_v36 = vmax.f32 %v366_v26, 0.0  ;;  %v415_v37 = vmax.f32 %v367_v27, 0.0  ;;  %v416_v38 = vmax.f32 %v368_v28, 0.0  ;;  %v417_v39 = vmax.f32 %v369_v29, 0.0 }
  0x19   : > { %v749_v41 = vpack.c.bf16 %v411_v32, %v410_v31  ;;  %v754_v42 = vpack.c.bf16 %v413_v34, %v412_v33  ;;  %v668_v43 = vunpack.c.l.bf16 %v869_v30  ;;  %v669_v44 = vunpack.c.h.bf16 %v869_v30 }
  0x1a   : > { %v759_v46 = vpack.c.bf16 %v415_v37, %v414_v36  ;;  %v764_v47 = vpack.c.bf16 %v417_v39, %v416_v38  ;;  %v672_v48 = vunpack.c.l.bf16 %v870_v35  ;;  %v673_v49 = vunpack.c.h.bf16 %v870_v35 }
  0x1b   : > { %750 = vst [vmem:[%s1048_s26] sm:$0xff] %v749_v41   ;;  %v318_v50 = vmul.f32 %v1014_v0, %v668_v43  ;;  %v319_v51 = vmul.f32 %v1014_v0, %v669_v44  ;;  %v676_v52 = vunpack.c.l.bf16 %v871_v40  ;;  %v677_v53 = vunpack.c.h.bf16 %v871_v40  ;;  %v877_v40 = vld [vmem:[%s1009_s19 + $0x60] sm:$0xff]  }
  0x1c   : > { %889 = vst [vmem:[%s1048_s26 + $0x8] sm:$0xff] %v754_v42   ;;  %v320_v54 = vmul.f32 %v1014_v0, %v672_v48  ;;  %v321_v55 = vmul.f32 %v1014_v0, %v673_v49  ;;  %v680_v56 = vunpack.c.l.bf16 %v872_v45  ;;  %v681_v57 = vunpack.c.h.bf16 %v872_v45 }
  0x1d   : > { %890 = vst [vmem:[%s1048_s26 + $0x10] sm:$0xff] %v759_v46   ;;  %v370_v58 = vadd.f32 %v1022_v6, %v318_v50  ;;  %v371_v59 = vadd.f32 %v1022_v6, %v319_v51  ;;  %v322_v60 = vmul.f32 %v1014_v0, %v676_v52  ;;  %v323_v61 = vmul.f32 %v1014_v0, %v677_v53  ;;  %v878_v53 = vld [vmem:[%s1009_s19 + $0x68] sm:$0xff]  }
  0x1e   : > { %891 = vst [vmem:[%s1048_s26 + $0x18] sm:$0xff] %v764_v47   ;;  %v372_v62 = vadd.f32 %v1022_v6, %v320_v54  ;;  %v373_v63 = vadd.f32 %v1022_v6, %v321_v55  ;;  %v324_v1 = vmul.f32 %v1014_v0, %v680_v56  ;;  %v325_v2 = vmul.f32 %v1014_v0, %v681_v57 }
  0x1f   : > { %v418_v4 = vmax.f32 %v370_v58, 0.0  ;;  %v419_v5 = vmax.f32 %v371_v59, 0.0  ;;  %v374_v7 = vadd.f32 %v1022_v6, %v322_v60  ;;  %v375_v8 = vadd.f32 %v1022_v6, %v323_v61  ;;  %v879_v58 = vld [vmem:[%s1009_s19 + $0x70] sm:$0xff]  }
  0x20   : > { %v420_v9 = vmax.f32 %v372_v62, 0.0  ;;  %v421_v10 = vmax.f32 %v373_v63, 0.0  ;;  %v376_v11 = vadd.f32 %v1022_v6, %v324_v1  ;;  %v377_v12 = vadd.f32 %v1022_v6, %v325_v2  ;;  %v880_v63 = vld [vmem:[%s1009_s19 + $0x78] sm:$0xff]  }
  0x21   : > { %v769_v14 = vpack.c.bf16 %v419_v5, %v418_v4  ;;  %v422_v15 = vmax.f32 %v374_v7, 0.0  ;;  %v423_v16 = vmax.f32 %v375_v8, 0.0  ;;  %v684_v17 = vunpack.c.l.bf16 %v873_v3 }
  0x22   : > { %v774_v19 = vpack.c.bf16 %v421_v10, %v420_v9  ;;  %v424_v20 = vmax.f32 %v376_v11, 0.0  ;;  %v425_v21 = vmax.f32 %v377_v12, 0.0  ;;  %v685_v22 = vunpack.c.h.bf16 %v873_v3 }
  0x23   : > { %892 = vst [vmem:[%s1048_s26 + $0x20] sm:$0xff] %v769_v14   ;;  %v779_v24 = vpack.c.bf16 %v423_v16, %v422_v15  ;;  %v326_v25 = vmul.f32 %v1014_v0, %v684_v17  ;;  %v688_v26 = vunpack.c.l.bf16 %v874_v13  ;;  %v689_v27 = vunpack.c.h.bf16 %v874_v13  ;;  %v881_v14 = vld [vmem:[%s1009_s19 + $0x80] sm:$0xff]  }
  0x24   : > { %893 = vst [vmem:[%s1048_s26 + $0x28] sm:$0xff] %v774_v19   ;;  %v784_v28 = vpack.c.bf16 %v425_v21, %v424_v20  ;;  %v327_v29 = vmul.f32 %v1014_v0, %v685_v22  ;;  %v692_v30 = vunpack.c.l.bf16 %v875_v18  ;;  %v693_v31 = vunpack.c.h.bf16 %v875_v18 }
  0x25   : > { %894 = vst [vmem:[%s1048_s26 + $0x30] sm:$0xff] %v779_v24   ;;  %v378_v32 = vadd.f32 %v1022_v6, %v326_v25  ;;  %v328_v33 = vmul.f32 %v1014_v0, %v688_v26  ;;  %v329_v34 = vmul.f32 %v1014_v0, %v689_v27  ;;  %v696_v35 = vunpack.c.l.bf16 %v876_v23 }
  0x26   : > { %895 = vst [vmem:[%s1048_s26 + $0x38] sm:$0xff] %v784_v28   ;;  %v379_v36 = vadd.f32 %v1022_v6, %v327_v29  ;;  %v330_v37 = vmul.f32 %v1014_v0, %v692_v30  ;;  %v331_v38 = vmul.f32 %v1014_v0, %v693_v31  ;;  %v697_v39 = vunpack.c.h.bf16 %v876_v23  ;;  %v882_v31 = vld [vmem:[%s1009_s19 + $0x88] sm:$0xff]  }
  0x27   : > { %v426_v41 = vmax.f32 %v378_v32, 0.0  ;;  %v380_v42 = vadd.f32 %v1022_v6, %v328_v33  ;;  %v381_v43 = vadd.f32 %v1022_v6, %v329_v34  ;;  %v332_v44 = vmul.f32 %v1014_v0, %v696_v35 }
  0x28   : > { %v427_v45 = vmax.f32 %v379_v36, 0.0  ;;  %v382_v46 = vadd.f32 %v1022_v6, %v330_v37  ;;  %v383_v47 = vadd.f32 %v1022_v6, %v331_v38  ;;  %v333_v48 = vmul.f32 %v1014_v0, %v697_v39  ;;  %v883_v36 = vld [vmem:[%s1009_s19 + $0x90] sm:$0xff]  }
  0x29   : > { %v428_v49 = vmax.f32 %v380_v42, 0.0  ;;  %v429_v50 = vmax.f32 %v381_v43, 0.0  ;;  %v384_v51 = vadd.f32 %v1022_v6, %v332_v44  ;;  %v700_v52 = vunpack.c.l.bf16 %v877_v40 }
  0x2a   : > { %v789_v54 = vpack.c.bf16 %v427_v45, %v426_v41  ;;  %v430_v55 = vmax.f32 %v382_v46, 0.0  ;;  %v431_v56 = vmax.f32 %v383_v47, 0.0  ;;  %v385_v57 = vadd.f32 %v1022_v6, %v333_v48  ;;  %v884_v41 = vld [vmem:[%s1009_s19 + $0x98] sm:$0xff]  }
  0x2b   : > { %v794_v59 = vpack.c.bf16 %v429_v50, %v428_v49  ;;  %v432_v60 = vmax.f32 %v384_v51, 0.0  ;;  %v701_v61 = vunpack.c.h.bf16 %v877_v40  ;;  %v334_v62 = vmul.f32 %v1014_v0, %v700_v52 }
  0x2c   : > { %896 = vst [vmem:[%s1048_s26 + $0x40] sm:$0xff] %v789_v54   ;;  %v799_v1 = vpack.c.bf16 %v431_v56, %v430_v55  ;;  %v433_v2 = vmax.f32 %v385_v57, 0.0  ;;  %v704_v3 = vunpack.c.l.bf16 %v878_v53  ;;  %v705_v4 = vunpack.c.h.bf16 %v878_v53  ;;  %v885_v54 = vld [vmem:[%s1009_s19 + $0xa0] sm:$0xff]  }
  0x2d   : > { %897 = vst [vmem:[%s1048_s26 + $0x48] sm:$0xff] %v794_v59   ;;  %v335_v5 = vmul.f32 %v1014_v0, %v701_v61  ;;  %v386_v7 = vadd.f32 %v1022_v6, %v334_v62  ;;  %v708_v8 = vunpack.c.l.bf16 %v879_v58  ;;  %v709_v9 = vunpack.c.h.bf16 %v879_v58 }
  0x2e   : > { %898 = vst [vmem:[%s1048_s26 + $0x50] sm:$0xff] %v799_v1   ;;  %v804_v10 = vpack.c.bf16 %v433_v2, %v432_v60  ;;  %v336_v11 = vmul.f32 %v1014_v0, %v704_v3  ;;  %v337_v12 = vmul.f32 %v1014_v0, %v705_v4  ;;  %v712_v13 = vunpack.c.l.bf16 %v880_v63  ;;  %v886_v4 = vld [vmem:[%s1009_s19 + $0xa8] sm:$0xff]  }
  0x2f   : > { %v387_v15 = vadd.f32 %v1022_v6, %v335_v5  ;;  %v434_v16 = vmax.f32 %v386_v7, 0.0  ;;  %v338_v17 = vmul.f32 %v1014_v0, %v708_v8  ;;  %v339_v18 = vmul.f32 %v1014_v0, %v709_v9 }
  0x30   : > { %899 = vst [vmem:[%s1048_s26 + $0x58] sm:$0xff] %v804_v10   ;;  %v388_v19 = vadd.f32 %v1022_v6, %v336_v11  ;;  %v389_v20 = vadd.f32 %v1022_v6, %v337_v12  ;;  %v713_v21 = vunpack.c.h.bf16 %v880_v63  ;;  %v340_v22 = vmul.f32 %v1014_v0, %v712_v13 }
  0x31   : > { %v435_v23 = vmax.f32 %v387_v15, 0.0  ;;  %v390_v24 = vadd.f32 %v1022_v6, %v338_v17  ;;  %v391_v25 = vadd.f32 %v1022_v6, %v339_v18  ;;  %v716_v26 = vunpack.c.l.bf16 %v881_v14 }
  0x32   : > { %v436_v27 = vmax.f32 %v388_v19, 0.0  ;;  %v437_v28 = vmax.f32 %v389_v20, 0.0  ;;  %v341_v29 = vmul.f32 %v1014_v0, %v713_v21  ;;  %v392_v30 = vadd.f32 %v1022_v6, %v340_v22  ;;  %v888_v19 = vld [vmem:[%s1009_s19 + $0xb8] sm:$0xff]  }
  0x33   : > { %v809_v32 = vpack.c.bf16 %v435_v23, %v434_v16  ;;  %v438_v33 = vmax.f32 %v390_v24, 0.0  ;;  %v439_v34 = vmax.f32 %v391_v25, 0.0  ;;  %v717_v35 = vunpack.c.h.bf16 %v881_v14  ;;  %v887_v14 = vld [vmem:[%s1009_s19 + $0xb0] sm:$0xff]  }
  0x34   : > { %v814_v37 = vpack.c.bf16 %v437_v28, %v436_v27  ;;  %v393_v38 = vadd.f32 %v1022_v6, %v341_v29  ;;  %v440_v39 = vmax.f32 %v392_v30, 0.0  ;;  %v342_v40 = vmul.f32 %v1014_v0, %v716_v26 }
  0x35   : > { %900 = vst [vmem:[%s1048_s26 + $0x60] sm:$0xff] %v809_v32   ;;  %v819_v42 = vpack.c.bf16 %v439_v34, %v438_v33  ;;  %v343_v43 = vmul.f32 %v1014_v0, %v717_v35  ;;  %v720_v44 = vunpack.c.l.bf16 %v882_v31  ;;  %v721_v45 = vunpack.c.h.bf16 %v882_v31 }
  0x36   : > { %901 = vst [vmem:[%s1048_s26 + $0x68] sm:$0xff] %v814_v37   ;;  %v441_v46 = vmax.f32 %v393_v38, 0.0  ;;  %v394_v47 = vadd.f32 %v1022_v6, %v342_v40  ;;  %v724_v48 = vunpack.c.l.bf16 %v883_v36  ;;  %v725_v49 = vunpack.c.h.bf16 %v883_v36 }
  0x37   : > { %902 = vst [vmem:[%s1048_s26 + $0x70] sm:$0xff] %v819_v42   ;;  %v395_v50 = vadd.f32 %v1022_v6, %v343_v43  ;;  %v344_v51 = vmul.f32 %v1014_v0, %v720_v44  ;;  %v345_v52 = vmul.f32 %v1014_v0, %v721_v45  ;;  %v728_v53 = vunpack.c.l.bf16 %v884_v41 }
  0x38   : > { %v824_v55 = vpack.c.bf16 %v441_v46, %v440_v39  ;;  %v442_v56 = vmax.f32 %v394_v47, 0.0  ;;  %v346_v57 = vmul.f32 %v1014_v0, %v724_v48  ;;  %v347_v58 = vmul.f32 %v1014_v0, %v725_v49 }
  0x39   : > { %v443_v59 = vmax.f32 %v395_v50, 0.0  ;;  %v396_v60 = vadd.f32 %v1022_v6, %v344_v51  ;;  %v397_v61 = vadd.f32 %v1022_v6, %v345_v52  ;;  %v729_v62 = vunpack.c.h.bf16 %v884_v41 }
  0x3a   : > { %903 = vst [vmem:[%s1048_s26 + $0x78] sm:$0xff] %v824_v55   ;;  %v398_v63 = vadd.f32 %v1022_v6, %v346_v57  ;;  %v399_v1 = vadd.f32 %v1022_v6, %v347_v58  ;;  %v348_v2 = vmul.f32 %v1014_v0, %v728_v53  ;;  %v732_v3 = vunpack.c.l.bf16 %v885_v54 }
  0x3b   : > { %v829_v5 = vpack.c.bf16 %v443_v59, %v442_v56  ;;  %v444_v7 = vmax.f32 %v396_v60, 0.0  ;;  %v445_v8 = vmax.f32 %v397_v61, 0.0  ;;  %v349_v9 = vmul.f32 %v1014_v0, %v729_v62 }
  0x3c   : > { %v446_v10 = vmax.f32 %v398_v63, 0.0  ;;  %v447_v11 = vmax.f32 %v399_v1, 0.0  ;;  %v400_v12 = vadd.f32 %v1022_v6, %v348_v2  ;;  %v733_v13 = vunpack.c.h.bf16 %v885_v54 }
  0x3d   : > { %904 = vst [vmem:[%s1048_s26 + $0x80] sm:$0xff] %v829_v5   ;;  %v834_v15 = vpack.c.bf16 %v445_v8, %v444_v7  ;;  %v401_v16 = vadd.f32 %v1022_v6, %v349_v9  ;;  %v350_v17 = vmul.f32 %v1014_v0, %v732_v3  ;;  %v736_v18 = vunpack.c.l.bf16 %v886_v4 }
  0x3e   : > { %v839_v20 = vpack.c.bf16 %v447_v11, %v446_v10  ;;  %v448_v21 = vmax.f32 %v400_v12, 0.0  ;;  %v351_v22 = vmul.f32 %v1014_v0, %v733_v13  ;;  %v737_v23 = vunpack.c.h.bf16 %v886_v4 }
  0x3f   : > { %905 = vst [vmem:[%s1048_s26 + $0x88] sm:$0xff] %v834_v15   ;;  %v449_v24 = vmax.f32 %v401_v16, 0.0  ;;  %v402_v25 = vadd.f32 %v1022_v6, %v350_v17  ;;  %v352_v26 = vmul.f32 %v1014_v0, %v736_v18  ;;  %v740_v27 = vunpack.c.l.bf16 %v887_v14 }
  0x40   : > { %906 = vst [vmem:[%s1048_s26 + $0x90] sm:$0xff] %v839_v20   ;;  %v403_v28 = vadd.f32 %v1022_v6, %v351_v22  ;;  %v353_v29 = vmul.f32 %v1014_v0, %v737_v23  ;;  %v741_v30 = vunpack.c.h.bf16 %v887_v14  ;;  %v744_v31 = vunpack.c.l.bf16 %v888_v19 }
  0x41   : > { %v844_v32 = vpack.c.bf16 %v449_v24, %v448_v21  ;;  %v450_v33 = vmax.f32 %v402_v25, 0.0  ;;  %v404_v34 = vadd.f32 %v1022_v6, %v352_v26  ;;  %v354_v35 = vmul.f32 %v1014_v0, %v740_v27 }
  0x42   : > { %v451_v36 = vmax.f32 %v403_v28, 0.0  ;;  %v405_v37 = vadd.f32 %v1022_v6, %v353_v29  ;;  %v355_v38 = vmul.f32 %v1014_v0, %v741_v30  ;;  %v745_v39 = vunpack.c.h.bf16 %v888_v19 }
  0x43   : > { %907 = vst [vmem:[%s1048_s26 + $0x98] sm:$0xff] %v844_v32   ;;  %v452_v40 = vmax.f32 %v404_v34, 0.0  ;;  %v406_v41 = vadd.f32 %v1022_v6, %v354_v35  ;;  %v356_v42 = vmul.f32 %v1014_v0, %v744_v31 }
  0x44   : > { %v849_v43 = vpack.c.bf16 %v451_v36, %v450_v33  ;;  %v453_v44 = vmax.f32 %v405_v37, 0.0  ;;  %v407_v45 = vadd.f32 %v1022_v6, %v355_v38  ;;  %v357_v46 = vmul.f32 %v1014_v0, %v745_v39 }
  0x45   : > { %v454_v47 = vmax.f32 %v406_v41, 0.0  ;;  %v408_v48 = vadd.f32 %v1022_v6, %v356_v42 }
  0x46   : > { %908 = vst [vmem:[%s1048_s26 + $0xa0] sm:$0xff] %v849_v43   ;;  %v854_v49 = vpack.c.bf16 %v453_v44, %v452_v40  ;;  %v455_v50 = vmax.f32 %v407_v45, 0.0  ;;  %v409_v51 = vadd.f32 %v1022_v6, %v357_v46 }
  0x47   : > { %v456_v52 = vmax.f32 %v408_v48, 0.0 }
  0x48   : > { %909 = vst [vmem:[%s1048_s26 + $0xa8] sm:$0xff] %v854_v49   ;;  %v859_v53 = vpack.c.bf16 %v455_v50, %v454_v47  ;;  %v457_v54 = vmax.f32 %v409_v51, 0.0 }
  0x4a   : > { %910 = vst [vmem:[%s1048_s26 + $0xb0] sm:$0xff] %v859_v53   ;;  %v864_v55 = vpack.c.bf16 %v457_v54, %v456_v52 }
  0x4c   : > { %911 = vst [vmem:[%s1048_s26 + $0xb8] sm:$0xff] %v864_v55  }
  0x4d PF: > { %s13_s14 = sadd.s32 1, %s961_s14   ;;  %s1185_s12 = smov %s957_s13 }
  0x4e   : > { %p10_p5 = scmp.ge.s32.totalorder %s13_s14, 4   ;;  %s1186_s13 = smov %s1188_s15 }
  0x50   :  { %12 = sbr.rel (!%p10_p5) target bundleno = 2 (0x2), region = 62 }

// kernel: double_conv.4
= control target key start
LH: loop header
LB: loop body
LE: loop exit
PB: predicated region body
PF: predicated region fallthrough
CT: control target
= control target key end

     0   :  { %s7757_s12 = smov 0   ;;  %s7759_s13 = smov 0   ;;  %s10068_s0 = inlined_call_operand.vmem [shape: bf16[2,1,456,128], index: 0, kind: input, shape index: {}]   ;;  %s10069_s1 = inlined_call_operand.vmem [shape: bf16[9,128,128], index: 1, kind: input, shape index: {}]   ;;  %s10070_s2 = inlined_call_operand.vmem [shape: bf16[2,384,128], index: 2, kind: output, shape index: {0}]   ;;  %s10071_s3 = inlined_call_operand.vmem [shape: f32[2,1,2,128], index: 3, kind: output, shape index: {1}]  }
   0x1   :  { %s7761_s14 = smov 0  }
   0x2 LB: > { %s26_s15 = sadd.s32 1, %s7730_s13  ;;  %p6386_p0 = scmp.ge.s32.totalorder %s7734_s14, 1  ;;  %s7734_s14 = sphi %s7761_s14, %s14_s14   ;;  %s7730_s13 = sphi %s7759_s13, %s10235_s13   ;;  %s7726_s12 = sphi %s7757_s12, %s10234_s12  }
   0x3   : > { %p28_p1 = scmp.ge.s32.totalorder %s26_s15, 2  ;;  %p162_p2 = scmp.lt.s32.totalorder %s7734_s14, 3 }
   0x5   : > { %s10237_s15 = smov (%p28_p1, %s26_s15), 0  ;;  %p163_p3 = pnand %p6386_p0, %p162_p2 }
   0x7   : > { %166 = sbr.rel (%p163_p3) target bundleno = 1122 (0x462), region = 28 }
   0xc   : > { %v7314_v0 = vld [vmem:[%s10069_s1 + $0x78] sm:$0xff]  ;;  %p201_p4 = scmp.lt.s32.totalorder %s7726_s12, 1  ;;  %v7313_v1 = vld [vmem:[%s10069_s1 + $0x70] sm:$0xff]  ;;  %v7312_v2 = vld [vmem:[%s10069_s1 + $0x68] sm:$0xff]  ;;  %vm432_vm0 = vsmask.f32 7424 }
   0xd   : > { %7623 = vmatpush.bf16.msra.mxu1 %v7314_v0  ;;  %7624 = vmatpush.bf16.msra.mxu2 %v7314_v0  ;;  %v7311_v3 = vld [vmem:[%s10069_s1 + $0x60] sm:$0xff]  ;;  %v7310_v4 = vld [vmem:[%s10069_s1 + $0x58] sm:$0xff]  ;;  %v7309_v11 = vld [vmem:[%s10069_s1 + $0x50] sm:$0xff]  ;;  %vm1052_vm1 = vcmask 1046528  }
   0xe   : > { %7625 = vmatpush.bf16.msra.mxu3 %v7314_v0  ;;  %701 = vmatpush.bf16.msra.mxu0 %v7314_v0  ;;  %s10239_s12 = smov (!%p201_p4, %s7726_s12), 1  ;;  %v7308_v22 = vld [vmem:[%s10069_s1 + $0x48] sm:$0xff]  ;;  %v7307_v31 = vld [vmem:[%s10069_s1 + $0x40] sm:$0xff]  ;;  %v7322_v40 = vld [vmem:[%s10069_s1 + $0xb8] sm:$0xff] }
   0xf   : > { %s7647_s22 = smul.u32 228, %s10239_s12  ;;  %v7354_v41 = vld [vmem:[%s10069_s1 + $0xf8] sm:$0xff]  ;;  %v7321_v48 = vld [vmem:[%s10069_s1 + $0xb0] sm:$0xff]  ;;  %v7320_v56 = vld [vmem:[%s10069_s1 + $0xa8] sm:$0xff] }
  0x10   : > { %v7306_v46 = vld [vmem:[%s10069_s1 + $0x38] sm:$0xff]  ;;  %v7353_v49 = vld [vmem:[%s10069_s1 + $0xf0] sm:$0xff]  ;;  %v7352_v57 = vld [vmem:[%s10069_s1 + $0xe8] sm:$0xff]  ;;  %s7648_s5 = smul.u32 192, %s10239_s12 }
  0x11   : > { %7626 = vmatpush.bf16.msra.mxu1 %v7313_v1  ;;  %7627 = vmatpush.bf16.msra.mxu2 %v7313_v1  ;;  %s7793_s27 = scalar_lea.vmem %s10068_s0, %s7647_s22  ;;  %v7385_v47 = vld [vmem:[%s10069_s1 + $0x138] sm:$0xff]  ;;  %v7305_v53 = vld [vmem:[%s10069_s1 + $0x30] sm:$0xff] }
  0x12   : > { %7628 = vmatpush.bf16.msra.mxu3 %v7313_v1  ;;  %702 = vmatpush.bf16.msra.mxu0 %v7313_v1  ;;  %v7799_v5 = vld [vmem:[%s7793_s27 + $0x30] sm:$0xff]  ;;  %v7287_v6 = vld [vmem:[%s7793_s27 + $0x60] sm:$0xff]  ;;  %v7807_v9 = vld [vmem:[%s7793_s27 + $0x38] sm:$0xff]  ;;  %s8941_s8 = scalar_lea.vmem %s10070_s2, %s7648_s5 }
  0x13   : > { %v7293_v7 = vld [vmem:[%s7793_s27 + $0x90] sm:$0xff]  ;;  %v7804_v8 = vld [vmem:[%s7793_s27] sm:$0xff]   ;;  %v7810_v10 = vld [vmem:[%s7793_s27 + $0x68] sm:$0xff]  ;;  %v481_v12 = vshll.u32 %v7799_v5, 16  ;;  %v529_v13 = vshll.u32 %v7287_v6, 16  ;;  %v485_v18 = vshrl.u32 %v7799_v5, 16 }
  0x14   : > { %v7817_v14 = vld [vmem:[%s7793_s27 + $0x98] sm:$0xff]  ;;  %v577_v15 = vshll.u32 %v7293_v7, 16  ;;  %v7820_v16 = vld [vmem:[%s7793_s27 + $0x8] sm:$0xff]  ;;  %v436_v17 = vshll.u32 %v7804_v8, 16  ;;  %v489_v19 = vshll.u32 %v7807_v9, 16  ;;  %v533_v20 = vshrl.u32 %v7287_v6, 16 }
  0x15   : > { %7629 = vmatpush.bf16.msra.mxu1 %v7312_v2  ;;  %7630 = vmatpush.bf16.msra.mxu2 %v7312_v2  ;;  %v537_v21 = vshll.u32 %v7810_v10, 16  ;;  %v7829_v23 = vrot.slane %v481_v12, 1  ;;  %v7831_v24 = vrot.slane %v529_v13, 1  ;;  %v581_v25 = vshrl.u32 %v7293_v7, 16  ;;  %v7867_v50 = vld [vmem:[%s7793_s27 + $0x40] sm:$0xff]  ;;  %v7870_v51 = vld [vmem:[%s7793_s27 + $0x70] sm:$0xff] }
  0x16   : > { %7631 = vmatpush.bf16.msra.mxu3 %v7312_v2  ;;  %703 = vmatpush.bf16.msra.mxu0 %v7312_v2  ;;  %v585_v26 = vshll.u32 %v7817_v14, 16  ;;  %v7834_v27 = vrot.slane %v577_v15, 1  ;;  %v434_v28 = vshrl.u32 %v7804_v8, 16  ;;  %v438_v29 = vrot.slane %v436_v17, 1  ;;  %v7873_v52 = vld [vmem:[%s7793_s27 + $0xa0] sm:$0xff]  ;;  %v7879_v54 = vld [vmem:[%s7793_s27 + $0x10] sm:$0xff] }
  0x17   : > { %v441_v30 = vshll.u32 %v7820_v16, 16  ;;  %v487_v32 = vor.u32 %v485_v18, %v7829_v23  ;;  %v491_v33 = vrot.slane %v489_v19, 1  ;;  %v535_v34 = vor.u32 %v533_v20, %v7831_v24  ;;  %v7384_v55 = vld [vmem:[%s10069_s1 + $0x130] sm:$0xff]  ;;  %v7304_v2 = vld [vmem:[%s10069_s1 + $0x28] sm:$0xff]  ;;  %v7351_v6 = vld [vmem:[%s10069_s1 + $0xe0] sm:$0xff] }
  0x18   : > { %v539_v35 = vrot.slane %v537_v21, 1  ;;  %v583_v36 = vor.u32 %v581_v25, %v7834_v27  ;;  %v587_v37 = vrot.slane %v585_v26, 1  ;;  %v439_v38 = vor.u32 %v438_v29, %v434_v28  ;;  %v7303_v18 = vld [vmem:[%s10069_s1 + $0x20] sm:$0xff]  ;;  %v7921_v26 = vld [vmem:[%s7793_s27 + $0x48] sm:$0xff]  ;;  %v7924_v28 = vld [vmem:[%s7793_s27 + $0x78] sm:$0xff] }
  0x19   : > { %7632 = vmatpush.bf16.msra.mxu1 %v7311_v3  ;;  %7633 = vmatpush.bf16.msra.mxu2 %v7311_v3  ;;  %v443_v39 = vrot.slane %v441_v30, 1  ;;  %v492_v42 = vsel %vm432_vm0, %v487_v32, %v491_v33  ;;  %v493_v58 = vshrl.u32 %v7807_v9, 16  ;;  %v497_v59 = vshll.u32 %v7867_v50, 16  ;;  %v7382_v19 = vld [vmem:[%s10069_s1 + $0x120] sm:$0xff]  ;;  %v7318_v29 = vld [vmem:[%s10069_s1 + $0x98] sm:$0xff]  ;;  %v7296_v32 = vld [vmem:[%s7793_s27 + $0xa8] sm:$0xff] }
  0x1a   : > { %7634 = vmatpush.bf16.msra.mxu3 %v7311_v3  ;;  %704 = vmatpush.bf16.msra.mxu0 %v7311_v3  ;;  %v540_v43 = vsel %vm432_vm0, %v535_v34, %v539_v35  ;;  %v588_v44 = vsel %vm432_vm0, %v583_v36, %v587_v37  ;;  %v541_v60 = vshrl.u32 %v7810_v10, 16  ;;  %v545_v61 = vshll.u32 %v7870_v51, 16  ;;  %v7383_v3 = vld [vmem:[%s10069_s1 + $0x128] sm:$0xff]  ;;  %v7350_v30 = vld [vmem:[%s10069_s1 + $0xd8] sm:$0xff]  ;;  %v7349_v36 = vld [vmem:[%s10069_s1 + $0xd0] sm:$0xff] }
  0x1b   : > { %v444_v45 = vsel %vm432_vm0, %v439_v38, %v443_v39  ;;  %v589_v62 = vshrl.u32 %v7817_v14, 16  ;;  %v593_v63 = vshll.u32 %v7873_v52, 16  ;;  %v445_v0 = vshrl.u32 %v7820_v16, 16  ;;  %v7381_v34 = vld [vmem:[%s10069_s1 + $0x118] sm:$0xff] }
  0x1c   : > { %v449_v1 = vshll.u32 %v7879_v54, 16  ;;  %v495_v7 = vor.u32 %v493_v58, %v491_v33  ;;  %v499_v10 = vrot.slane %v497_v59, 1  ;;  %v547_v12 = vrot.slane %v545_v61, 1  ;;  %v7937_v33 = vld [vmem:[%s7793_s27 + $0x18] sm:$0xff]  ;;  %v7960_v59 = vld [vmem:[%s7793_s27 + $0x50] sm:$0xff] }
  0x1d   : > { %7635 = vmatpush.bf16.msra.mxu1 %v7310_v4  ;;  %7636 = vmatpush.bf16.msra.mxu2 %v7310_v4  ;;  %v591_v13 = vor.u32 %v589_v62, %v587_v37  ;;  %v595_v14 = vrot.slane %v593_v63, 1  ;;  %v447_v15 = vor.u32 %v445_v0, %v443_v39  ;;  %v501_v37 = vshrl.u32 %v7867_v50, 16  ;;  %v7301_v61 = vld [vmem:[%s10069_s1 + $0x10] sm:$0xff]  ;;  %v7316_v63 = vld [vmem:[%s10069_s1 + $0x88] sm:$0xff] }
  0x1e   : > { %7637 = vmatpush.bf16.msra.mxu3 %v7310_v4  ;;  %705 = vmatpush.bf16.msra.mxu0 %v7310_v4  ;;  %v7319_v4 = vld [vmem:[%s10069_s1 + $0xa0] sm:$0xff]  ;;  %v451_v17 = vrot.slane %v449_v1, 1  ;;  %v500_v20 = vsel %vm432_vm0, %v495_v7, %v499_v10  ;;  %v505_v38 = vshll.u32 %v7921_v26, 16  ;;  %v549_v39 = vshrl.u32 %v7870_v51, 16  ;;  %v7380_v62 = vld [vmem:[%s10069_s1 + $0x110] sm:$0xff] }
  0x1f   : > { %v7297_v0 = vld [vmem:[%s7793_s27 + $0xb0] sm:$0xff]  ;;  %v7976_v1 = vld [vmem:[%s7793_s27 + $0x20] sm:$0xff]  ;;  %v557_v7 = vshrl.u32 %v7924_v28, 16 }
  0x20   : > { %v452_v25 = vsel %vm432_vm0, %v447_v15, %v451_v17 }
  0x21   : > { %7638 = vmatpush.bf16.msra.mxu1 %v7309_v11  ;;  %7639 = vmatpush.bf16.msra.mxu2 %v7309_v11 }
  0x22   : > { %7640 = vmatpush.bf16.msra.mxu3 %v7309_v11  ;;  %706 = vmatpush.bf16.msra.mxu0 %v7309_v11  ;;  %v543_v11 = vor.u32 %v541_v60, %v539_v35  ;;  %v7317_v35 = vld [vmem:[%s10069_s1 + $0x90] sm:$0xff]  ;;  %v7963_v60 = vld [vmem:[%s7793_s27 + $0x80] sm:$0xff] }
  0x24   : > { %v548_v21 = vsel %vm432_vm0, %v543_v11, %v547_v12  ;;  %v605_v11 = vshrl.u32 %v7296_v32, 16 }
  0x25   : > { %7641 = vmatpush.bf16.msra.mxu1 %v7308_v22  ;;  %7642 = vmatpush.bf16.msra.mxu2 %v7308_v22 }
  0x26   : > { %7643 = vmatpush.bf16.msra.mxu3 %v7308_v22  ;;  %707 = vmatpush.bf16.msra.mxu0 %v7308_v22  ;;  %v596_v22 = vsel %vm432_vm0, %v591_v13, %v595_v14  ;;  %v461_v13 = vshrl.u32 %v7937_v33, 16 }
  0x29   : > { %7644 = vmatpush.bf16.msra.mxu1 %v7307_v31  ;;  %7645 = vmatpush.bf16.msra.mxu2 %v7307_v31 }
  0x2a   : > { %7646 = vmatpush.bf16.msra.mxu3 %v7307_v31  ;;  %708 = vmatpush.bf16.msra.mxu0 %v7307_v31  ;;  %v7302_v31 = vld [vmem:[%s10069_s1 + $0x18] sm:$0xff] }
  0x2c   : > { %739 = vmatmul.bf16.vlgmr.msra.gmra.mxu1 %v492_v42  ;;  %769 = vmatmul.bf16.vlgmr.msra.gmra.mxu2 %v540_v43  ;;  %v601_v42 = vshll.u32 %v7296_v32, 16  ;;  %v453_v43 = vshrl.u32 %v7879_v54, 16  ;;  %v7995_v32 = vld [vmem:[%s7793_s27 + $0x58] sm:$0xff] }
  0x2d   : > { %1174 = vmatpush.bf16.msrb.mxu2 %v7322_v40  ;;  %799 = vmatmul.bf16.vlgmr.msra.gmra.mxu3 %v588_v44  ;;  %v553_v40 = vshll.u32 %v7924_v28, 16  ;;  %v457_v44 = vshll.u32 %v7937_v33, 16 }
  0x2e   : > { %1608 = vmatpush.bf16.msrb.mxu3 %v7354_v41  ;;  %709 = vmatmul.bf16.vlgmr.msra.gmra.mxu0 %v444_v45  ;;  %v597_v41 = vshrl.u32 %v7873_v52, 16  ;;  %v503_v45 = vor.u32 %v501_v37, %v499_v10  ;;  %v455_v51 = vor.u32 %v453_v43, %v451_v17  ;;  %v561_v10 = vshll.u32 %v7963_v60, 16  ;;  %v7347_v37 = vld [vmem:[%s10069_s1 + $0xc0] sm:$0xff] }
  0x2f   : > { %902 = vmatpush.bf16.msrb.mxu1 %v7306_v46  ;;  %2242 = vmatpush.bf16.msrb.mxu0 %v7385_v47  ;;  %v507_v46 = vrot.slane %v505_v38, 1  ;;  %v551_v47 = vor.u32 %v549_v39, %v547_v12  ;;  %v609_v12 = vshll.u32 %v7297_v0, 16  ;;  %v7298_v38 = vld [vmem:[%s7793_s27 + $0xb8] sm:$0xff]  ;;  %v8011_v39 = vld [vmem:[%s7793_s27 + $0x28] sm:$0xff]  ;;  %v521_v43 = vshll.u32 %v7995_v32, 16 }
  0x31   : > { %1175 = vmatpush.bf16.msrb.mxu2 %v7321_v48  ;;  %v555_v48 = vrot.slane %v553_v40, 1  ;;  %v508_v52 = vsel %vm432_vm0, %v503_v45, %v507_v46  ;;  %v7299_v40 = vld [vmem:[%s10069_s1] sm:$0xff] }
  0x32   : > { %1609 = vmatpush.bf16.msrb.mxu3 %v7353_v49  ;;  %v599_v49 = vor.u32 %v597_v41, %v595_v14  ;;  %v465_v14 = vshll.u32 %v7976_v1, 16  ;;  %v7378_v41 = vld [vmem:[%s10069_s1 + $0x100] sm:$0xff] }
  0x33   : > { %903 = vmatpush.bf16.msrb.mxu1 %v7305_v53  ;;  %2243 = vmatpush.bf16.msrb.mxu0 %v7384_v55  ;;  %v603_v53 = vrot.slane %v601_v42, 1  ;;  %v459_v55 = vrot.slane %v457_v44, 1  ;;  %v517_v42 = vshrl.u32 %v7960_v59, 16  ;;  %v565_v44 = vshrl.u32 %v7963_v60, 16 }
  0x35   : > { %1176 = vmatpush.bf16.msrb.mxu2 %v7320_v56  ;;  %v556_v56 = vsel %vm432_vm0, %v551_v47, %v555_v48  ;;  %v460_v58 = vsel %vm432_vm0, %v455_v51, %v459_v55  ;;  %v617_v47 = vshll.u32 %v7298_v38, 16  ;;  %v523_v51 = vrot.slane %v521_v43, 1 }
  0x36   : > { %1610 = vmatpush.bf16.msrb.mxu3 %v7352_v57  ;;  %v604_v57 = vsel %vm432_vm0, %v599_v49, %v603_v53  ;;  %v473_v49 = vshll.u32 %v8011_v39, 16 }
  0x37   : > { %904 = vmatpush.bf16.msrb.mxu1 %v7304_v2  ;;  %2244 = vmatpush.bf16.msrb.mxu0 %v7383_v3  ;;  %v7348_v2 = vld [vmem:[%s10069_s1 + $0xc8] sm:$0xff] }
  0x38   : > { %v7300_v3 = vld [vmem:[%s10069_s1 + $0x8] sm:$0xff] }
  0x39   : > { %1177 = vmatpush.bf16.msrb.mxu2 %v7319_v4  ;;  %v509_v4 = vshrl.u32 %v7921_v26, 16 }
  0x3a   : > { %1611 = vmatpush.bf16.msrb.mxu3 %v7351_v6  ;;  %v513_v6 = vshll.u32 %v7960_v59, 16 }
  0x3b   : > { %905 = vmatpush.bf16.msrb.mxu1 %v7303_v18  ;;  %2245 = vmatpush.bf16.msrb.mxu0 %v7382_v19  ;;  %v511_v15 = vor.u32 %v509_v4, %v507_v46  ;;  %v559_v18 = vor.u32 %v557_v7, %v555_v48  ;;  %v563_v19 = vrot.slane %v561_v10, 1  ;;  %v613_v46 = vshrl.u32 %v7297_v0, 16  ;;  %v7456_v7 = vld [vmem:[%s10069_s1 + $0x1f8] sm:$0xff] }
  0x3c   : > { %744 = vmatmul.bf16.gmra.mxu1 %v500_v20  ;;  %774 = vmatmul.bf16.gmra.mxu2 %v548_v21  ;;  %v515_v17 = vrot.slane %v513_v6, 1  ;;  %v607_v20 = vor.u32 %v605_v11, %v603_v53  ;;  %v611_v21 = vrot.slane %v609_v12, 1  ;;  %v469_v48 = vshrl.u32 %v7976_v1, 16  ;;  %v7425_v6 = vld [vmem:[%s10069_s1 + $0x1b8] sm:$0xff] }
  0x3d   : > { %804 = vmatmul.bf16.gmra.mxu3 %v596_v22  ;;  %1178 = vmatpush.bf16.msrb.mxu2 %v7318_v29  ;;  %v463_v22 = vor.u32 %v461_v13, %v459_v55  ;;  %v564_v29 = vsel %vm432_vm0, %v559_v18, %v563_v19  ;;  %v567_v55 = vor.u32 %v565_v44, %v563_v19  ;;  %v7393_v10 = vld [vmem:[%s10069_s1 + $0x178] sm:$0xff]  ;;  %v525_v13 = vshrl.u32 %v7995_v32, 16  ;;  %v1785_v19 = vld [vmem:[%s7793_s27 + $0xc] sm:$0xff]  }
  0x3e   : > { %714 = vmatmul.bf16.gmra.mxu0 %v452_v25  ;;  %1612 = vmatpush.bf16.msrb.mxu3 %v7350_v30  ;;  %v467_v25 = vrot.slane %v465_v14, 1  ;;  %v516_v28 = vsel %vm432_vm0, %v511_v15, %v515_v17  ;;  %v612_v30 = vsel %vm432_vm0, %v607_v20, %v611_v21  ;;  %v519_v53 = vor.u32 %v517_v42, %v515_v17  ;;  %v7464_v12 = vld [vmem:[%s10069_s1 + $0x238] sm:$0xff]  ;;  %v8050_v20 = vld [vmem:[%s7793_s27 + $0xc] sm:$0xf0] }
  0x3f   : > { %906 = vmatpush.bf16.msrb.mxu1 %v7302_v31  ;;  %2246 = vmatpush.bf16.msrb.mxu0 %v7381_v34  ;;  %v7998_v34 = vld [vmem:[%s7793_s27 + $0x88] sm:$0xff]  ;;  %v621_v15 = vshrl.u32 %v7298_v38, 16  ;;  %v477_v18 = vshrl.u32 %v8011_v39, 16  ;;  %v7594_v38 = vld [vmem:[%s7793_s27] sm:$0xe] }
  0x40   : > { %v468_v31 = vsel %vm432_vm0, %v463_v22, %v467_v25  ;;  %v569_v45 = vshll.u32 %v7998_v34, 16  ;;  %v573_v14 = vshrl.u32 %v7998_v34, 16 }
  0x41   : > { %1179 = vmatpush.bf16.msrb.mxu2 %v7317_v35  ;;  %v7379_v35 = vld [vmem:[%s10069_s1 + $0x108] sm:$0xff] }
  0x42   : > { %1613 = vmatpush.bf16.msrb.mxu3 %v7349_v36  ;;  %v7315_v36 = vld [vmem:[%s10069_s1 + $0x80] sm:$0xff] }
  0x43   : > { %907 = vmatpush.bf16.msrb.mxu1 %v7301_v61  ;;  %2247 = vmatpush.bf16.msrb.mxu0 %v7380_v62  ;;  %v475_v61 = vrot.slane %v473_v49, 1  ;;  %v291_v62 = vld [vmem:[%s7793_s27 + $0xc0] sm:$0x1] }
  0x44   : > { %v406_v4 = vunpack.c.l.b16 %v291_v62 }
  0x45   : > { %1180 = vmatpush.bf16.msrb.mxu2 %v7316_v63  ;;  %v524_v63 = vsel %vm432_vm0, %v519_v53, %v523_v51  ;;  %v7356_v53 = vld [vmem:[%s7793_s27 + $0x1c] sm:$0xff] }
  0x46   : > { %1614 = vmatpush.bf16.msrb.mxu3 %v7348_v2  ;;  %v8039_v11 = vpack.c.b16 %v406_v4, %v406_v4  ;;  %v7463_v4 = vld [vmem:[%s10069_s1 + $0x230] sm:$0xff] }
  0x47   : > { %908 = vmatpush.bf16.msrb.mxu1 %v7300_v3  ;;  %2248 = vmatpush.bf16.msrb.mxu0 %v7379_v35 }
  0x48   : > { %v625_v17 = vshll.u32 %v8039_v11, 16 }
  0x49   : > { %1181 = vmatpush.bf16.msrb.mxu2 %v7315_v36 }
  0x4a   : > { %1615 = vmatpush.bf16.msrb.mxu3 %v7347_v37  ;;  %v7593_v37 = vld [vmem:[%s7793_s27] sm:$0xf0] }
  0x4b   : > { %909 = vmatpush.bf16.msrb.mxu1 %v7299_v40  ;;  %2249 = vmatpush.bf16.msrb.mxu0 %v7378_v41  ;;  %v7355_v40 = vld [vmem:[%s7793_s27 + $0x14] sm:$0xff]  ;;  %v1977_v41 = vshll.u32 %v1785_v19, 16  ;;  %v7595_v42 = vor.u32 %v7594_v38, %v7593_v37 }
  0x4c   : > { %749 = vmatmul.bf16.gmra.mxu1 %v508_v52  ;;  %779 = vmatmul.bf16.gmra.mxu2 %v556_v56  ;;  %v571_v52 = vrot.slane %v569_v45, 1  ;;  %v615_v56 = vor.u32 %v613_v46, %v611_v21  ;;  %v527_v21 = vor.u32 %v525_v13, %v523_v51  ;;  %v1982_v44 = vshll.u32 %v7355_v40, 16 }
  0x4d   : > { %809 = vmatmul.bf16.gmra.mxu3 %v604_v57  ;;  %v619_v57 = vrot.slane %v617_v47, 1  ;;  %2995 = vmatpush.bf16.msra.mxu2 %v7425_v6  ;;  %v1979_v43 = vrot.slane %v1977_v41, 1  ;;  %v1054_v45 = vrot.slane %v7820_v16, 1  ;;  %v1986_v51 = vshrl.u32 %v7355_v40, 16  ;;  %v7326_v40 = vld [vmem:[%s7793_s27 + $0x24] sm:$0xff] }
  0x4e   : > { %719 = vmatmul.bf16.gmra.mxu0 %v460_v58  ;;  %v471_v58 = vor.u32 %v469_v48, %v467_v25  ;;  %v572_v2 = vsel %vm432_vm0, %v567_v55, %v571_v52  ;;  %3629 = vmatpush.bf16.msra.mxu3 %v7456_v7  ;;  %v575_v22 = vor.u32 %v573_v14, %v571_v52  ;;  %v7323_v48 = vld [vmem:[%s7793_s27 + $0xc] sm:$0xff]  ;;  %v1990_v55 = vshll.u32 %v7356_v53, 16  ;;  %v7325_v14 = vld [vmem:[%s7793_s27 + $0x1c] sm:$0xff] }
  0x4f   : > { %v620_v0 = vsel %vm432_vm0, %v615_v56, %v619_v57  ;;  %2561 = vmatpush.bf16.msra.mxu1 %v7393_v10  ;;  %3948 = vmatpush.bf16.msra.mxu0 %v7464_v12  ;;  %v623_v25 = vor.u32 %v621_v15, %v619_v57  ;;  %v1056_v52 = vrot.slane %v7879_v54, 1  ;;  %v1058_v6 = vrot.slane %v7937_v33, 1 }
  0x50   : > { %v476_v3 = vsel %vm432_vm0, %v471_v58, %v475_v61  ;;  %v1992_v57 = vrot.slane %v1990_v55, 1 }
  0x51   : > { %v1057_v58 = vsel %vm1052_vm1, %v1054_v45, %v1056_v52  ;;  %v1059_v13 = vsel %vm1052_vm1, %v1056_v52, %v1058_v6  ;;  %v7327_v52 = vld [vmem:[%s7793_s27 + $0x2c] sm:$0xff] }
  0x53   : > { %3949 = vmatpush.bf16.msra.mxu0 %v7463_v4  ;;  %v7462_v4 = vld [vmem:[%s10069_s1 + $0x228] sm:$0xff] }
  0x57   : > { %3950 = vmatpush.bf16.msra.mxu0 %v7462_v4 }
  0x5c   : > { %754 = vmatmul.bf16.gmra.mxu1 %v516_v28  ;;  %784 = vmatmul.bf16.gmra.mxu2 %v564_v29  ;;  %v627_v28 = vrot.slane %v625_v17, 1  ;;  %v479_v29 = vor.u32 %v477_v18, %v475_v61  ;;  %v7324_v61 = vld [vmem:[%s7793_s27 + $0x14] sm:$0xff]  ;;  %v7358_v18 = vld [vmem:[%s7793_s27 + $0x2c] sm:$0xff] }
  0x5d   : > { %814 = vmatmul.bf16.gmra.mxu3 %v612_v30  ;;  %v532_v30 = vsel %vm432_vm0, %v527_v21, %v7831_v24  ;;  %v1975_v24 = vshrl.u32 %v1785_v19, 16 }
  0x5e   : > { %724 = vmatmul.bf16.gmra.mxu0 %v468_v31  ;;  %v580_v31 = vsel %vm432_vm0, %v575_v22, %v7834_v27  ;;  %v628_v35 = vsel %vm432_vm0, %v623_v25, %v627_v28  ;;  %v484_v36 = vsel %vm432_vm0, %v479_v29, %v7829_v23  ;;  %v1053_v27 = vrot.slane %v7595_v42, 1 }
  0x5f   : > { %v1980_v46 = vor.u32 %v1979_v43, %v1975_v24  ;;  %v1984_v23 = vrot.slane %v1982_v44, 1  ;;  %v2006_v29 = vshll.u32 %v7358_v18, 16  ;;  %v7359_v24 = vld [vmem:[%s7793_s27 + $0x34] sm:$0xff] }
  0x60   : > { %v1055_v47 = vsel %vm1052_vm1, %v1053_v27, %v1054_v45 }
  0x61   : > { %v1985_v49 = vsel %vm432_vm0, %v1980_v46, %v1984_v23  ;;  %v1988_v56 = vor.u32 %v1986_v51, %v1984_v23  ;;  %v2010_v46 = vshrl.u32 %v7358_v18, 16  ;;  %v2014_v23 = vshll.u32 %v7359_v24, 16 }
  0x63   : > { %v1993_v62 = vsel %vm432_vm0, %v1988_v56, %v1992_v57 }
  0x6c   : > { %759 = vmatmul.bf16.gmra.mxu1 %v524_v63  ;;  %789 = vmatmul.bf16.gmra.mxu2 %v572_v2  ;;  %v7455_v63 = vld [vmem:[%s10069_s1 + $0x1f0] sm:$0xff]  ;;  %v7357_v2 = vld [vmem:[%s7793_s27 + $0x24] sm:$0xff] }
  0x6d   : > { %819 = vmatmul.bf16.gmra.mxu3 %v620_v0  ;;  %v7392_v0 = vld [vmem:[%s10069_s1 + $0x170] sm:$0xff]  ;;  %v2002_v28 = vshrl.u32 %v7357_v2, 16 }
  0x6e   : > { %729 = vmatmul.bf16.gmra.mxu0 %v476_v3  ;;  %3630 = vmatpush.bf16.msra.mxu3 %v7455_v63  ;;  %v1998_v3 = vshll.u32 %v7357_v2, 16 }
  0x6f   : > { %2562 = vmatpush.bf16.msra.mxu1 %v7392_v0 }
  0x70   : > { %v2000_v10 = vrot.slane %v1998_v3, 1 }
  0x7c   : > { %764 = vmatmul.bf16.gmra.mxu1 %v532_v30  ;;  %794 = vmatmul.bf16.gmra.mxu2 %v580_v31  ;;  %v1060_v30 = vrot.slane %v7976_v1, 1  ;;  %v2004_v31 = vor.u32 %v2002_v28, %v2000_v10  ;;  %v7328_v28 = vld [vmem:[%s7793_s27 + $0x34] sm:$0xff] }
  0x7d   : > { %824 = vmatmul.bf16.gmra.mxu3 %v628_v35 }
  0x7e   : > { %734 = vmatmul.bf16.gmra.mxu0 %v484_v36  ;;  %v1061_v38 = vsel %vm1052_vm1, %v1058_v6, %v1060_v30  ;;  %v1064_v6 = vrot.slane %v7799_v5, 1 }
  0x8c   : > { %910 = vmatmul.bf16.vlgmr.msrb.gmra.mxu1 %v7804_v8  ;;  %1182 = vmatmul.bf16.vlgmr.msrb.gmra.mxu2 %v1055_v47  ;;  %v7424_v8 = vld [vmem:[%s10069_s1 + $0x1b0] sm:$0xff]  ;;  %v1062_v47 = vrot.slane %v8011_v39, 1 }
  0x8d   : > { %1616 = vmatmul.bf16.vlgmr.msrb.gmra.mxu3 %v7323_v48  ;;  %2996 = vmatpush.bf16.msra.mxu2 %v7424_v8 }
  0x8e   : > { %2250 = vmatmul.bf16.vlgmr.msrb.gmra.mxu0 %v1985_v49  ;;  %v1063_v55 = vsel %vm1052_vm1, %v1060_v30, %v1062_v47  ;;  %v1065_v18 = vsel %vm1052_vm1, %v1062_v47, %v1064_v6 }
  0x9c   : > { %915 = vmatmul.bf16.gmra.mxu1 %v7820_v16  ;;  %1187 = vmatmul.bf16.gmra.mxu2 %v1057_v58  ;;  %v1994_v16 = vshrl.u32 %v7356_v53, 16  ;;  %v7423_v58 = vld [vmem:[%s10069_s1 + $0x1a8] sm:$0xff] }
  0x9d   : > { %1621 = vmatmul.bf16.gmra.mxu3 %v7324_v61  ;;  %v7454_v61 = vld [vmem:[%s10069_s1 + $0x1e8] sm:$0xff]  ;;  %2997 = vmatpush.bf16.msra.mxu2 %v7423_v58 }
  0x9e   : > { %2255 = vmatmul.bf16.gmra.mxu0 %v1993_v62  ;;  %v1996_v7 = vor.u32 %v1994_v16, %v1992_v57  ;;  %v7360_v62 = vld [vmem:[%s7793_s27 + $0x3c] sm:$0xff]  ;;  %3631 = vmatpush.bf16.msra.mxu3 %v7454_v61  ;;  %v2018_v16 = vshrl.u32 %v7359_v24, 16 }
  0x9f   : > { %v2022_v3 = vshll.u32 %v7360_v62, 16  ;;  %v2026_v24 = vshrl.u32 %v7360_v62, 16  ;;  %v7362_v62 = vld [vmem:[%s7793_s27 + $0x4c] sm:$0xff] }
  0xa0   : > { %v2001_v17 = vsel %vm432_vm0, %v1996_v7, %v2000_v10 }
  0xa1   : > { %v2024_v10 = vrot.slane %v2022_v3, 1 }
  0xa3   : > { %v2028_v47 = vor.u32 %v2026_v24, %v2024_v10 }
  0xa9   : > { %v8087_v12 = vpop.f32.mrf.mxu1 }
  0xab   : > { %v8091_v15 = vpop.f32.mrf.mxu0 }
  0xac   : > { %920 = vmatmul.bf16.gmra.mxu1 %v7879_v54  ;;  %1192 = vmatmul.bf16.gmra.mxu2 %v1059_v13  ;;  %v2008_v54 = vrot.slane %v2006_v29, 1 }
  0xad   : > { %1626 = vmatmul.bf16.gmra.mxu3 %v7325_v14 }
  0xae   : > { %2260 = vmatmul.bf16.gmra.mxu0 %v2001_v17  ;;  %v2009_v42 = vsel %vm432_vm0, %v2004_v31, %v2008_v54  ;;  %v2012_v48 = vor.u32 %v2010_v46, %v2008_v54  ;;  %v7361_v31 = vld [vmem:[%s7793_s27 + $0x44] sm:$0xff] }
  0xaf   : > { %v8096_v19 = vpop.f32.mrf.mxu2  ;;  %v2030_v46 = vshll.u32 %v7361_v31, 16 }
  0xb0   : > { %v8098_v21 = vpop.f32.mrf.mxu3 }
  0xb1   : > { %10078 = vst [vmem:[#allocation2_spill] sm:$0xff] %v8098_v21  ;;  %v8100_v22 = vpop.f32.mrf.mxu1 }
  0xb3   : > { %v8102_v25 = vpop.f32.mrf.mxu0 }
  0xb7   : > { %v8105_v35 = vpop.f32.mrf.mxu2 }
  0xb8   : > { %v8107_v36 = vpop.f32.mrf.mxu3 }
  0xb9   : > { %10079 = vst [vmem:[#allocation3_spill] sm:$0xff] %v8107_v36  ;;  %v8109_v37 = vpop.f32.mrf.mxu1 }
  0xbb   : > { %v8113_v41 = vpop.f32.mrf.mxu0 }
  0xbc   : > { %925 = vmatmul.bf16.gmra.mxu1 %v7937_v33  ;;  %1197 = vmatmul.bf16.gmra.mxu2 %v1061_v38  ;;  %v2016_v33 = vrot.slane %v2014_v23, 1  ;;  %v1066_v23 = vrot.slane %v7807_v9, 1 }
  0xbd   : > { %1631 = vmatmul.bf16.gmra.mxu3 %v7326_v40 }
  0xbe   : > { %2265 = vmatmul.bf16.gmra.mxu0 %v2009_v42  ;;  %v2017_v57 = vsel %vm432_vm0, %v2012_v48, %v2016_v33  ;;  %v2020_v7 = vor.u32 %v2018_v16, %v2016_v33 }
  0xbf   : > { %v8118_v43 = vpop.f32.mrf.mxu2 }
  0xc0   : > { %v8120_v44 = vpop.f32.mrf.mxu3  ;;  %v2025_v30 = vsel %vm432_vm0, %v2020_v7, %v2024_v10  ;;  %v2038_v7 = vshll.u32 %v7362_v62, 16  ;;  %v1068_v10 = vrot.slane %v7867_v50, 1 }
  0xc1   : > { %10080 = vst [vmem:[#allocation4_spill] sm:$0xff] %v8120_v44  ;;  %v8122_v27 = vpop.f32.mrf.mxu1 }
  0xc3   : > { %v8124_v45 = vpop.f32.mrf.mxu0 }
  0xc7   : > { %v8127_v49 = vpop.f32.mrf.mxu2 }
  0xc8   : > { %v8129_v53 = vpop.f32.mrf.mxu3 }
  0xc9   : > { %10081 = vst [vmem:[#allocation5_spill] sm:$0xff] %v8129_v53  ;;  %v8131_v51 = vpop.f32.mrf.mxu1 }
  0xcb   : > { %v8135_v56 = vpop.f32.mrf.mxu0 }
  0xcc   : > { %930 = vmatmul.bf16.gmra.mxu1 %v7976_v1  ;;  %1202 = vmatmul.bf16.gmra.mxu2 %v1063_v55  ;;  %v7391_v1 = vld [vmem:[%s10069_s1 + $0x168] sm:$0xff] }
  0xcd   : > { %1636 = vmatmul.bf16.gmra.mxu3 %v7327_v52  ;;  %2563 = vmatpush.bf16.msra.mxu1 %v7391_v1  ;;  %v1067_v52 = vsel %vm1052_vm1, %v1064_v6, %v1066_v23  ;;  %v2034_v6 = vshrl.u32 %v7361_v31, 16  ;;  %v7422_v31 = vld [vmem:[%s10069_s1 + $0x1a0] sm:$0xff] }
  0xce   : > { %2270 = vmatmul.bf16.gmra.mxu0 %v2017_v57  ;;  %v7329_v57 = vld [vmem:[%s7793_s27 + $0x3c] sm:$0xff]  ;;  %2998 = vmatpush.bf16.msra.mxu2 %v7422_v31  ;;  %v1070_v31 = vrot.slane %v7921_v26, 1 }
  0xcf   : > { %v8146_v8 = vpop.f32.mrf.mxu2 }
  0xd0   : > { %v8148_v63 = vpop.f32.mrf.mxu3 }
  0xd1   : > { %10082 = vst [vmem:[#allocation6_spill] sm:$0xff] %v8148_v63  ;;  %v8153_v2 = vpop.f32.mrf.mxu1 }
  0xd3   : > { %v8155_v0 = vpop.f32.mrf.mxu0 }
  0xd7   : > { %v8161_v13 = vpop.f32.mrf.mxu2 }
  0xd8   : > { %v8163_v14 = vpop.f32.mrf.mxu3 }
  0xd9   : > { %10083 = vst [vmem:[#allocation7_spill] sm:$0xff] %v8163_v14  ;;  %v8165_v17 = vpop.f32.mrf.mxu1 }
  0xdb   : > { %v8169_v29 = vpop.f32.mrf.mxu0 }
  0xdc   : > { %935 = vmatmul.bf16.gmra.mxu1 %v8011_v39  ;;  %1207 = vmatmul.bf16.gmra.mxu2 %v1065_v18  ;;  %v2032_v39 = vrot.slane %v2030_v46, 1  ;;  %v1069_v46 = vsel %vm1052_vm1, %v1066_v23, %v1068_v10 }
  0xdd   : > { %1641 = vmatmul.bf16.gmra.mxu3 %v7328_v28 }
  0xde   : > { %2275 = vmatmul.bf16.gmra.mxu0 %v2025_v30  ;;  %v2033_v61 = vsel %vm432_vm0, %v2028_v47, %v2032_v39  ;;  %v2036_v18 = vor.u32 %v2034_v6, %v2032_v39  ;;  %v7330_v47 = vld [vmem:[%s7793_s27 + $0x44] sm:$0xff] }
  0xdf   : > { %v8174_v54 = vpop.f32.mrf.mxu2  ;;  %v7453_v39 = vld [vmem:[%s10069_s1 + $0x1e0] sm:$0xff] }
  0xe0   : > { %v8176_v38 = vpop.f32.mrf.mxu3  ;;  %3632 = vmatpush.bf16.msra.mxu3 %v7453_v39 }
  0xe1   : > { %10084 = vst [vmem:[#allocation8_spill] sm:$0xff] %v8176_v38  ;;  %v8178_v40 = vpop.f32.mrf.mxu1  ;;  %v7331_v38 = vld [vmem:[%s7793_s27 + $0x4c] sm:$0xff] }
  0xe3   : > { %v8180_v42 = vpop.f32.mrf.mxu0 }
  0xe7   : > { %v8183_v48 = vpop.f32.mrf.mxu2 }
  0xe8   : > { %v8185_v33 = vpop.f32.mrf.mxu3 }
  0xe9   : > { %10085 = vst [vmem:[#allocation9_spill] sm:$0xff] %v8185_v33  ;;  %v8187_v55 = vpop.f32.mrf.mxu1  ;;  %v1071_v33 = vsel %vm1052_vm1, %v1068_v10, %v1070_v31 }
  0xeb   : > { %v8191_v58 = vpop.f32.mrf.mxu0 }
  0xec   : > { %940 = vmatmul.bf16.gmra.mxu1 %v7799_v5  ;;  %1212 = vmatmul.bf16.gmra.mxu2 %v1067_v52  ;;  %v2040_v5 = vrot.slane %v2038_v7, 1 }
  0xed   : > { %1646 = vmatmul.bf16.gmra.mxu3 %v7329_v57 }
  0xee   : > { %2280 = vmatmul.bf16.gmra.mxu0 %v2033_v61  ;;  %v2041_v57 = vsel %vm432_vm0, %v2036_v18, %v2040_v5  ;;  %v7363_v61 = vld [vmem:[%s7793_s27 + $0x54] sm:$0xff]  ;;  %v2042_v18 = vshrl.u32 %v7362_v62, 16 }
  0xef   : > { %v8196_v1 = vpop.f32.mrf.mxu2  ;;  %v2050_v10 = vshrl.u32 %v7363_v61, 16 }
  0xf0   : > { %v8198_v16 = vpop.f32.mrf.mxu3  ;;  %v2044_v39 = vor.u32 %v2042_v18, %v2040_v5  ;;  %v7364_v5 = vld [vmem:[%s7793_s27 + $0x5c] sm:$0xff] }
  0xf1   : > { %10086 = vst [vmem:[#allocation10_spill] sm:$0xff] %v8198_v16  ;;  %v8200_v3 = vpop.f32.mrf.mxu1  ;;  %v2054_v36 = vshll.u32 %v7364_v5, 16 }
  0xf3   : > { %v8202_v4 = vpop.f32.mrf.mxu0 }
  0xf7   : > { %v8205_v28 = vpop.f32.mrf.mxu2 }
  0xf8   : > { %v8207_v30 = vpop.f32.mrf.mxu3 }
  0xf9   : > { %10087 = vst [vmem:[#allocation11_spill] sm:$0xff] %v8207_v30  ;;  %v8209_v24 = vpop.f32.mrf.mxu1 }
  0xfb   : > { %v8213_v52 = vpop.f32.mrf.mxu0 }
  0xfc   : > { %945 = vmatmul.bf16.gmra.mxu1 %v7807_v9  ;;  %1217 = vmatmul.bf16.gmra.mxu2 %v1069_v46  ;;  %v2046_v46 = vshll.u32 %v7363_v61, 16 }
  0xfd   : > { %1651 = vmatmul.bf16.gmra.mxu3 %v7330_v47  ;;  %v7390_v47 = vld [vmem:[%s10069_s1 + $0x160] sm:$0xff] }
  0xfe   : > { %2285 = vmatmul.bf16.gmra.mxu0 %v2041_v57  ;;  %v7461_v57 = vld [vmem:[%s10069_s1 + $0x220] sm:$0xff]  ;;  %2564 = vmatpush.bf16.msra.mxu1 %v7390_v47 }
  0xff   : > { %v8224_v23 = vpop.f32.mrf.mxu2  ;;  %3951 = vmatpush.bf16.msra.mxu0 %v7461_v57 }
 0x100   : > { %v8226_v6 = vpop.f32.mrf.mxu3 }
 0x101   : > { %10088 = vst [vmem:[#allocation12_spill] sm:$0xff] %v8226_v6  ;;  %v8228_v9 = vpop.f32.mrf.mxu1  ;;  %v2048_v6 = vrot.slane %v2046_v46, 1 }
 0x103   : > { %v8230_v7 = vpop.f32.mrf.mxu0  ;;  %v2049_v63 = vsel %vm432_vm0, %v2044_v39, %v2048_v6  ;;  %v1072_v39 = vrot.slane %v7960_v59, 1 }
 0x107   : > { %v8239_v30 = vpop.f32.mrf.mxu2 }
 0x108   : > { %10089 = vst [vmem:[#allocation13_spill] sm:$0xff] %v8239_v30  ;;  %v8241_v16 = vpop.f32.mrf.mxu3  ;;  %v7332_v30 = vld [vmem:[%s7793_s27 + $0x54] sm:$0xff] }
 0x109   : > { %10090 = vst [vmem:[#allocation14_spill] sm:$0xff] %v8241_v16  ;;  %v911_v62 = vpop.f32.mrf.mxu1 }
 0x10a   : > { %v912_v47 = vadd.f32 %v911_v62, %v8091_v15 }
 0x10b   : > { %v2251_v14 = vpop.f32.mrf.mxu0 }
 0x10c   : > { %950 = vmatmul.bf16.gmra.mxu1 %v7867_v50  ;;  %1222 = vmatmul.bf16.gmra.mxu2 %v1071_v33 }
 0x10d   : > { %1656 = vmatmul.bf16.gmra.mxu3 %v7331_v38  ;;  %v2052_v38 = vor.u32 %v2050_v10, %v2048_v6 }
 0x10e   : > { %2290 = vmatmul.bf16.gmra.mxu0 %v2049_v63  ;;  %v2056_v63 = vrot.slane %v2054_v36, 1  ;;  %v7365_v36 = vld [vmem:[%s7793_s27 + $0x64] sm:$0xff] }
 0x10f   : > { %v1183_v18 = vpop.f32.mrf.mxu2 }
 0x110   : > { %v1303_v46 = vadd.f32 %v1183_v18, %v912_v47  ;;  %v1617_v57 = vpop.f32.mrf.mxu3  ;;  %v1073_v18 = vsel %vm1052_vm1, %v1070_v31, %v1072_v39  ;;  %v2057_v61 = vsel %vm432_vm0, %v2052_v38, %v2056_v63 }
 0x111   : > { %v913_v16 = vpop.f32.mrf.mxu1 }
 0x112   : > { %v1737_v53 = vadd.f32 %v1617_v57, %v1303_v46  ;;  %v914_v50 = vadd.f32 %v913_v16, %v8102_v25 }
 0x113   : > { %v2253_v44 = vpop.f32.mrf.mxu0 }
 0x114   : > { %v8249_v21 = vadd.f32 %v2251_v14, %v1737_v53 }
 0x117   : > { %v1185_v15 = vpop.f32.mrf.mxu2 }
 0x118   : > { %v1304_v33 = vadd.f32 %v1185_v15, %v914_v50  ;;  %v1619_v62 = vpop.f32.mrf.mxu3  ;;  %v2058_v15 = vshrl.u32 %v7364_v5, 16 }
 0x119   : > { %v916_v47 = vpop.f32.mrf.mxu1 }
 0x11a   : > { %v1738_v46 = vadd.f32 %v1619_v62, %v1304_v33  ;;  %v917_v25 = vadd.f32 %v916_v47, %v8113_v41  ;;  %v2062_v33 = vshll.u32 %v7365_v36, 16 }
 0x11b   : > { %v2256_v57 = vpop.f32.mrf.mxu0 }
 0x11c   : > { %955 = vmatmul.bf16.gmra.mxu1 %v7921_v26  ;;  %1227 = vmatmul.bf16.gmra.mxu2 %v1073_v18  ;;  %v8257_v53 = vadd.f32 %v2253_v44, %v1738_v46  ;;  %v1074_v26 = vrot.slane %v7995_v32, 1  ;;  %v2064_v62 = vrot.slane %v2062_v33, 1 }
 0x11d   : > { %1661 = vmatmul.bf16.gmra.mxu3 %v7332_v30  ;;  %v2060_v30 = vor.u32 %v2058_v15, %v2056_v63 }
 0x11e   : > { %2295 = vmatmul.bf16.gmra.mxu0 %v2057_v61  ;;  %v1075_v61 = vsel %vm1052_vm1, %v1072_v39, %v1074_v26  ;;  %v7452_v39 = vld [vmem:[%s10069_s1 + $0x1d8] sm:$0xff] }
 0x11f   : > { %v1188_v14 = vpop.f32.mrf.mxu2  ;;  %v2065_v5 = vsel %vm432_vm0, %v2060_v30, %v2064_v62  ;;  %3633 = vmatpush.bf16.msra.mxu3 %v7452_v39 }
 0x120   : > { %v1305_v16 = vadd.f32 %v1188_v14, %v917_v25  ;;  %v1622_v6 = vpop.f32.mrf.mxu3  ;;  %v7333_v25 = vld [vmem:[%s7793_s27 + $0x5c] sm:$0xff] }
 0x121   : > { %v918_v31 = vpop.f32.mrf.mxu1 }
 0x122   : > { %v1739_v10 = vadd.f32 %v1622_v6, %v1305_v16  ;;  %v919_v44 = vadd.f32 %v918_v31, %v8124_v45  ;;  %v7421_v45 = vld [vmem:[%s10069_s1 + $0x198] sm:$0xff]  ;;  %v7366_v6 = vld [vmem:[%s7793_s27 + $0x6c] sm:$0xff] }
 0x123   : > { %v2258_v50 = vpop.f32.mrf.mxu0  ;;  %2999 = vmatpush.bf16.msra.mxu2 %v7421_v45  ;;  %v2070_v30 = vshll.u32 %v7366_v6, 16 }
 0x124   : > { %v8261_v38 = vadd.f32 %v2256_v57, %v1739_v10 }
 0x127   : > { %v1190_v18 = vpop.f32.mrf.mxu2 }
 0x128   : > { %v1306_v41 = vadd.f32 %v1190_v18, %v919_v44  ;;  %v1624_v47 = vpop.f32.mrf.mxu3  ;;  %v2066_v44 = vshrl.u32 %v7365_v36, 16  ;;  %v7389_v18 = vld [vmem:[%s10069_s1 + $0x158] sm:$0xff]  ;;  %v2072_v36 = vrot.slane %v2070_v30, 1 }
 0x129   : > { %v921_v46 = vpop.f32.mrf.mxu1  ;;  %2565 = vmatpush.bf16.msra.mxu1 %v7389_v18 }
 0x12a   : > { %v1740_v14 = vadd.f32 %v1624_v47, %v1306_v41  ;;  %v922_v63 = vadd.f32 %v921_v46, %v8135_v56  ;;  %v7460_v56 = vld [vmem:[%s10069_s1 + $0x218] sm:$0xff]  ;;  %v7674_v47 = vld [vmem:[%s7793_s27 + $0x60] sm:$0xff] }
 0x12b   : > { %v2261_v16 = vpop.f32.mrf.mxu0  ;;  %3952 = vmatpush.bf16.msra.mxu0 %v7460_v56  ;;  %v1076_v46 = vrot.slane %v7674_v47, 1 }
 0x12c   : > { %960 = vmatmul.bf16.gmra.mxu1 %v7960_v59  ;;  %1232 = vmatmul.bf16.gmra.mxu2 %v1075_v61  ;;  %v8269_v57 = vadd.f32 %v2258_v50, %v1740_v14 }
 0x12d   : > { %1666 = vmatmul.bf16.gmra.mxu3 %v7333_v25  ;;  %v2068_v25 = vor.u32 %v2066_v44, %v2064_v62  ;;  %v7367_v62 = vld [vmem:[%s7793_s27 + $0x74] sm:$0xff] }
 0x12e   : > { %2300 = vmatmul.bf16.gmra.mxu0 %v2065_v5 }
 0x12f   : > { %v1193_v31 = vpop.f32.mrf.mxu2  ;;  %v2073_v18 = vsel %vm432_vm0, %v2068_v25, %v2072_v36  ;;  %v2078_v25 = vshll.u32 %v7367_v62, 16 }
 0x130   : > { %v1307_v59 = vadd.f32 %v1193_v31, %v922_v63  ;;  %v1627_v10 = vpop.f32.mrf.mxu3  ;;  %v1077_v63 = vsel %vm1052_vm1, %v1074_v26, %v1076_v46  ;;  %v7334_v31 = vld [vmem:[%s7793_s27 + $0x64] sm:$0xff] }
 0x131   : > { %v923_v50 = vpop.f32.mrf.mxu1 }
 0x132   : > { %v1741_v15 = vadd.f32 %v1627_v10, %v1307_v59  ;;  %v924_v61 = vadd.f32 %v923_v50, %v8155_v0 }
 0x133   : > { %v2263_v33 = vpop.f32.mrf.mxu0 }
 0x134   : > { %v8285_v41 = vadd.f32 %v2261_v16, %v1741_v15 }
 0x137   : > { %v1195_v14 = vpop.f32.mrf.mxu2 }
 0x138   : > { %v1308_v5 = vadd.f32 %v1195_v14, %v924_v61  ;;  %v1629_v45 = vpop.f32.mrf.mxu3  ;;  %v2074_v61 = vshrl.u32 %v7366_v6, 16 }
 0x139   : > { %v926_v39 = vpop.f32.mrf.mxu1 }
 0x13a   : > { %v1742_v59 = vadd.f32 %v1629_v45, %v1308_v5  ;;  %v927_v0 = vadd.f32 %v926_v39, %v8169_v29  ;;  %v2076_v45 = vor.u32 %v2074_v61, %v2072_v36  ;;  %v7368_v36 = vld [vmem:[%s7793_s27 + $0x7c] sm:$0xff] }
 0x13b   : > { %v2266_v10 = vpop.f32.mrf.mxu0 }
 0x13c   : > { %965 = vmatmul.bf16.gmra.mxu1 %v7995_v32  ;;  %1237 = vmatmul.bf16.gmra.mxu2 %v1077_v63  ;;  %v8293_v16 = vadd.f32 %v2263_v33, %v1742_v59  ;;  %v7675_v32 = vld [vmem:[%s7793_s27 + $0x68] sm:$0xff]  ;;  %v2080_v63 = vrot.slane %v2078_v25, 1 }
 0x13d   : > { %1671 = vmatmul.bf16.gmra.mxu3 %v7334_v31  ;;  %v1078_v5 = vrot.slane %v7675_v32, 1 }
 0x13e   : > { %2305 = vmatmul.bf16.gmra.mxu0 %v2073_v18  ;;  %v2081_v6 = vsel %vm432_vm0, %v2076_v45, %v2080_v63 }
 0x13f   : > { %v1198_v50 = vpop.f32.mrf.mxu2  ;;  %v1079_v18 = vsel %vm1052_vm1, %v1076_v46, %v1078_v5 }
 0x140   : > { %v1309_v15 = vadd.f32 %v1198_v50, %v927_v0  ;;  %v1632_v44 = vpop.f32.mrf.mxu3  ;;  %v7335_v0 = vld [vmem:[%s7793_s27 + $0x6c] sm:$0xff] }
 0x141   : > { %v928_v26 = vpop.f32.mrf.mxu1 }
 0x142   : > { %v1743_v30 = vadd.f32 %v1632_v44, %v1309_v15  ;;  %v929_v33 = vadd.f32 %v928_v26, %v8180_v42 }
 0x143   : > { %v2268_v56 = vpop.f32.mrf.mxu0 }
 0x144   : > { %v8297_v14 = vadd.f32 %v2266_v10, %v1743_v30 }
 0x147   : > { %v1200_v29 = vpop.f32.mrf.mxu2 }
 0x148   : > { %v1310_v39 = vadd.f32 %v1200_v29, %v929_v33  ;;  %v1634_v31 = vpop.f32.mrf.mxu3  ;;  %v2082_v33 = vshrl.u32 %v7367_v62, 16  ;;  %v2086_v29 = vshll.u32 %v7368_v36, 16 }
 0x149   : > { %v931_v59 = vpop.f32.mrf.mxu1 }
 0x14a   : > { %v1744_v50 = vadd.f32 %v1634_v31, %v1310_v39  ;;  %v932_v42 = vadd.f32 %v931_v59, %v8191_v58  ;;  %v2084_v31 = vor.u32 %v2082_v33, %v2080_v63  ;;  %v7451_v63 = vld [vmem:[%s10069_s1 + $0x1d0] sm:$0xff] }
 0x14b   : > { %v2271_v15 = vpop.f32.mrf.mxu0  ;;  %3634 = vmatpush.bf16.msra.mxu3 %v7451_v63 }
 0x14c   : > { %970 = vmatmul.bf16.gmra.mxu1 %v7674_v47  ;;  %1242 = vmatmul.bf16.gmra.mxu2 %v1079_v18  ;;  %v8304_v10 = vadd.f32 %v2268_v56, %v1744_v50  ;;  %v7676_v47 = vld [vmem:[%s7793_s27 + $0x70] sm:$0xff]  ;;  %v2088_v18 = vrot.slane %v2086_v29, 1 }
 0x14d   : > { %1676 = vmatmul.bf16.gmra.mxu3 %v7335_v0  ;;  %v1080_v39 = vrot.slane %v7676_v47, 1 }
 0x14e   : > { %2310 = vmatmul.bf16.gmra.mxu0 %v2081_v6  ;;  %v2089_v62 = vsel %vm432_vm0, %v2084_v31, %v2088_v18 }
 0x14f   : > { %v1203_v44 = vpop.f32.mrf.mxu2  ;;  %v1081_v6 = vsel %vm1052_vm1, %v1078_v5, %v1080_v39 }
 0x150   : > { %v1311_v26 = vadd.f32 %v1203_v44, %v932_v42  ;;  %v1637_v30 = vpop.f32.mrf.mxu3  ;;  %v7336_v42 = vld [vmem:[%s7793_s27 + $0x74] sm:$0xff] }
 0x151   : > { %v933_v61 = vpop.f32.mrf.mxu1 }
 0x152   : > { %v1745_v46 = vadd.f32 %v1637_v30, %v1311_v26  ;;  %v934_v56 = vadd.f32 %v933_v61, %v8202_v4  ;;  %v7420_v4 = vld [vmem:[%s10069_s1 + $0x190] sm:$0xff]  ;;  %v7369_v30 = vld [vmem:[%s7793_s27 + $0x84] sm:$0xff] }
 0x153   : > { %v2273_v25 = vpop.f32.mrf.mxu0  ;;  %3000 = vmatpush.bf16.msra.mxu2 %v7420_v4  ;;  %v2094_v31 = vshll.u32 %v7369_v30, 16 }
 0x154   : > { %v8308_v45 = vadd.f32 %v2271_v15, %v1745_v46 }
 0x157   : > { %v1205_v0 = vpop.f32.mrf.mxu2 }
 0x158   : > { %v1312_v58 = vadd.f32 %v1205_v0, %v934_v56  ;;  %v1639_v59 = vpop.f32.mrf.mxu3  ;;  %v2090_v56 = vshrl.u32 %v7368_v36, 16  ;;  %v7388_v0 = vld [vmem:[%s10069_s1 + $0x150] sm:$0xff]  ;;  %v2096_v36 = vrot.slane %v2094_v31, 1 }
 0x159   : > { %v936_v50 = vpop.f32.mrf.mxu1  ;;  %2566 = vmatpush.bf16.msra.mxu1 %v7388_v0 }
 0x15a   : > { %v1746_v44 = vadd.f32 %v1639_v59, %v1312_v58  ;;  %v937_v5 = vadd.f32 %v936_v50, %v8213_v52  ;;  %v7459_v52 = vld [vmem:[%s10069_s1 + $0x210] sm:$0xff]  ;;  %v7677_v59 = vld [vmem:[%s7793_s27 + $0x78] sm:$0xff] }
 0x15b   : > { %v2276_v26 = vpop.f32.mrf.mxu0  ;;  %3953 = vmatpush.bf16.msra.mxu0 %v7459_v52  ;;  %v1082_v50 = vrot.slane %v7677_v59, 1 }
 0x15c   : > { %975 = vmatmul.bf16.gmra.mxu1 %v7675_v32  ;;  %1247 = vmatmul.bf16.gmra.mxu2 %v1081_v6  ;;  %v8315_v15 = vadd.f32 %v2273_v25, %v1746_v44 }
 0x15d   : > { %1681 = vmatmul.bf16.gmra.mxu3 %v7336_v42  ;;  %v2092_v42 = vor.u32 %v2090_v56, %v2088_v18  ;;  %v7370_v18 = vld [vmem:[%s7793_s27 + $0x8c] sm:$0xff] }
 0x15e   : > { %2315 = vmatmul.bf16.gmra.mxu0 %v2089_v62 }
 0x15f   : > { %v1208_v61 = vpop.f32.mrf.mxu2  ;;  %v2097_v0 = vsel %vm432_vm0, %v2092_v42, %v2096_v36 }
 0x160   : > { %v1313_v32 = vadd.f32 %v1208_v61, %v937_v5  ;;  %v1642_v46 = vpop.f32.mrf.mxu3  ;;  %v1083_v5 = vsel %vm1052_vm1, %v1080_v39, %v1082_v50  ;;  %v7337_v61 = vld [vmem:[%s7793_s27 + $0x7c] sm:$0xff] }
 0x161   : > { %v938_v25 = vpop.f32.mrf.mxu1 }
 0x162   : > { %v1747_v33 = vadd.f32 %v1642_v46, %v1313_v32  ;;  %v939_v6 = vadd.f32 %v938_v25, %v8230_v7 }
 0x163   : > { %v2278_v29 = vpop.f32.mrf.mxu0 }
 0x164   : > { %v8331_v58 = vadd.f32 %v2276_v26, %v1747_v33 }
 0x167   : > { %v1210_v44 = vpop.f32.mrf.mxu2 }
 0x168   : > { %v1314_v62 = vadd.f32 %v1210_v44, %v939_v6  ;;  %v1644_v4 = vpop.f32.mrf.mxu3  ;;  %v2098_v6 = vshrl.u32 %v7369_v30, 16  ;;  %v2102_v44 = vshll.u32 %v7370_v18, 16 }
 0x169   : > { %v941_v63 = vpop.f32.mrf.mxu1 }
 0x16a   : > { %v1748_v32 = vadd.f32 %v1644_v4, %v1314_v62  ;;  %v942_v7 = vadd.f32 %v941_v63, %v8087_v12  ;;  %v2100_v42 = vor.u32 %v2098_v6, %v2096_v36  ;;  %v2104_v4 = vrot.slane %v2102_v44, 1 }
 0x16b   : > { %v2281_v46 = vpop.f32.mrf.mxu0  ;;  %v2106_v6 = vshrl.u32 %v7370_v18, 16 }
 0x16c   : > { %980 = vmatmul.bf16.gmra.mxu1 %v7676_v47  ;;  %1252 = vmatmul.bf16.gmra.mxu2 %v1083_v5  ;;  %v8338_v26 = vadd.f32 %v2278_v29, %v1748_v32  ;;  %v1084_v47 = vrot.slane %v7963_v60, 1  ;;  %v2105_v30 = vsel %vm432_vm0, %v2100_v42, %v2104_v4 }
 0x16d   : > { %1686 = vmatmul.bf16.gmra.mxu3 %v7337_v61  ;;  %v2108_v42 = vor.u32 %v2106_v6, %v2104_v4 }
 0x16e   : > { %2320 = vmatmul.bf16.gmra.mxu0 %v2097_v0  ;;  %v1085_v32 = vsel %vm1052_vm1, %v1082_v50, %v1084_v47  ;;  %v7338_v0 = vld [vmem:[%s7793_s27 + $0x84] sm:$0xff] }
 0x16f   : > { %v1213_v25 = vpop.f32.mrf.mxu2 }
 0x170   : > { %v1315_v33 = vadd.f32 %v1213_v25, %v942_v7  ;;  %v1647_v56 = vpop.f32.mrf.mxu3 }
 0x171   : > { %v943_v31 = vpop.f32.mrf.mxu1 }
 0x172   : > { %v1749_v39 = vadd.f32 %v1647_v56, %v1315_v33  ;;  %v944_v29 = vadd.f32 %v943_v31, %v8100_v22  ;;  %v7371_v22 = vld [vmem:[%s7793_s27 + $0x94] sm:$0xff] }
 0x173   : > { %v2283_v52 = vpop.f32.mrf.mxu0  ;;  %v2110_v44 = vshll.u32 %v7371_v22, 16  ;;  %v2114_v6 = vshrl.u32 %v7371_v22, 16 }
 0x174   : > { %v8342_v62 = vadd.f32 %v2281_v46, %v1749_v39 }
 0x177   : > { %v1215_v12 = vpop.f32.mrf.mxu2 }
 0x178   : > { %v1316_v63 = vadd.f32 %v1215_v12, %v944_v29  ;;  %v1649_v5 = vpop.f32.mrf.mxu3  ;;  %v2112_v12 = vrot.slane %v2110_v44, 1 }
 0x179   : > { %v946_v61 = vpop.f32.mrf.mxu1 }
 0x17a   : > { %v1750_v7 = vadd.f32 %v1649_v5, %v1316_v63  ;;  %v947_v60 = vadd.f32 %v946_v61, %v8109_v37  ;;  %v2116_v22 = vor.u32 %v2114_v6, %v2112_v12 }
 0x17b   : > { %v2286_v25 = vpop.f32.mrf.mxu0 }
 0x17c   : > { %985 = vmatmul.bf16.gmra.mxu1 %v7677_v59  ;;  %1257 = vmatmul.bf16.gmra.mxu2 %v1085_v32  ;;  %v8349_v46 = vadd.f32 %v2283_v52, %v1750_v7  ;;  %v1086_v59 = vrot.slane %v7998_v34, 1 }
 0x17d   : > { %1691 = vmatmul.bf16.gmra.mxu3 %v7338_v0  ;;  %v7339_v0 = vld [vmem:[%s7793_s27 + $0x8c] sm:$0xff] }
 0x17e   : > { %2325 = vmatmul.bf16.gmra.mxu0 %v2105_v30  ;;  %v1087_v32 = vsel %vm1052_vm1, %v1084_v47, %v1086_v59  ;;  %v2113_v30 = vsel %vm432_vm0, %v2108_v42, %v2112_v12  ;;  %v7450_v47 = vld [vmem:[%s10069_s1 + $0x1c8] sm:$0xff] }
 0x17f   : > { %v1218_v36 = vpop.f32.mrf.mxu2  ;;  %3635 = vmatpush.bf16.msra.mxu3 %v7450_v47  ;;  %v7373_v12 = vld [vmem:[%s7793_s27 + $0xa4] sm:$0xff] }
 0x180   : > { %v1317_v33 = vadd.f32 %v1218_v36, %v947_v60  ;;  %v1652_v56 = vpop.f32.mrf.mxu3  ;;  %v7372_v60 = vld [vmem:[%s7793_s27 + $0x9c] sm:$0xff] }
 0x181   : > { %v948_v31 = vpop.f32.mrf.mxu1  ;;  %v2118_v44 = vshll.u32 %v7372_v60, 16 }
 0x182   : > { %v1751_v50 = vadd.f32 %v1652_v56, %v1317_v33  ;;  %v949_v52 = vadd.f32 %v948_v31, %v8122_v27  ;;  %v7419_v27 = vld [vmem:[%s10069_s1 + $0x188] sm:$0xff] }
 0x183   : > { %v2288_v39 = vpop.f32.mrf.mxu0  ;;  %3001 = vmatpush.bf16.msra.mxu2 %v7419_v27  ;;  %v7340_v27 = vld [vmem:[%s7793_s27 + $0x94] sm:$0xff] }
 0x184   : > { %v8353_v29 = vadd.f32 %v2286_v25, %v1751_v50  ;;  %v7678_v25 = vld [vmem:[%s7793_s27 + $0x80] sm:$0xff] }
 0x187   : > { %v1220_v37 = vpop.f32.mrf.mxu2 }
 0x188   : > { %v1318_v63 = vadd.f32 %v1220_v37, %v949_v52  ;;  %v1654_v5 = vpop.f32.mrf.mxu3  ;;  %v7387_v52 = vld [vmem:[%s10069_s1 + $0x148] sm:$0xff]  ;;  %v7679_v37 = vld [vmem:[%s7793_s27 + $0x90] sm:$0xff] }
 0x189   : > { %v951_v61 = vpop.f32.mrf.mxu1  ;;  %2567 = vmatpush.bf16.msra.mxu1 %v7387_v52  ;;  %v2122_v52 = vshrl.u32 %v7372_v60, 16 }
 0x18a   : > { %v1752_v7 = vadd.f32 %v1654_v5, %v1318_v63  ;;  %v952_v4 = vadd.f32 %v951_v61, %v8131_v51  ;;  %v7458_v51 = vld [vmem:[%s10069_s1 + $0x208] sm:$0xff]  ;;  %v1088_v63 = vrot.slane %v7679_v37, 1  ;;  %v2120_v61 = vrot.slane %v2118_v44, 1 }
 0x18b   : > { %v2291_v18 = vpop.f32.mrf.mxu0  ;;  %3954 = vmatpush.bf16.msra.mxu0 %v7458_v51  ;;  %v2126_v51 = vshll.u32 %v7373_v12, 16 }
 0x18c   : > { %990 = vmatmul.bf16.gmra.mxu1 %v7678_v25  ;;  %1262 = vmatmul.bf16.gmra.mxu2 %v1087_v32  ;;  %v8361_v34 = vadd.f32 %v2288_v39, %v1752_v7  ;;  %v1089_v25 = vsel %vm1052_vm1, %v1086_v59, %v1088_v63 }
 0x18d   : > { %1696 = vmatmul.bf16.gmra.mxu3 %v7339_v0 }
 0x18e   : > { %2330 = vmatmul.bf16.gmra.mxu0 %v2113_v30 }
 0x18f   : > { %v1223_v36 = vpop.f32.mrf.mxu2 }
 0x190   : > { %v1319_v33 = vadd.f32 %v1223_v36, %v952_v4  ;;  %v1657_v56 = vpop.f32.mrf.mxu3  ;;  %v2121_v36 = vsel %vm432_vm0, %v2116_v22, %v2120_v61  ;;  %v7681_v22 = vld [vmem:[%s7793_s27 + $0x98] sm:$0xff] }
 0x191   : > { %v953_v31 = vpop.f32.mrf.mxu1 }
 0x192   : > { %v1753_v50 = vadd.f32 %v1657_v56, %v1319_v33  ;;  %v954_v5 = vadd.f32 %v953_v31, %v8153_v2 }
 0x193   : > { %v2293_v39 = vpop.f32.mrf.mxu0 }
 0x194   : > { %v8377_v42 = vadd.f32 %v2291_v18, %v1753_v50  ;;  %v7680_v18 = vld [vmem:[%s7793_s27 + $0x88] sm:$0xff] }
 0x197   : > { %v1225_v32 = vpop.f32.mrf.mxu2 }
 0x198   : > { %v1320_v0 = vadd.f32 %v1225_v32, %v954_v5  ;;  %v1659_v7 = vpop.f32.mrf.mxu3  ;;  %v1090_v32 = vrot.slane %v7681_v22, 1 }
 0x199   : > { %v956_v30 = vpop.f32.mrf.mxu1 }
 0x19a   : > { %v1754_v47 = vadd.f32 %v1659_v7, %v1320_v0  ;;  %v957_v2 = vadd.f32 %v956_v30, %v8165_v17  ;;  %v2124_v0 = vor.u32 %v2122_v52, %v2120_v61  ;;  %v2128_v7 = vrot.slane %v2126_v51, 1  ;;  %v7374_v61 = vld [vmem:[%s7793_s27 + $0xac] sm:$0xff] }
 0x19b   : > { %v2296_v4 = vpop.f32.mrf.mxu0  ;;  %v2130_v52 = vshrl.u32 %v7373_v12, 16  ;;  %v2134_v51 = vshll.u32 %v7374_v61, 16 }
 0x19c   : > { %995 = vmatmul.bf16.gmra.mxu1 %v7680_v18  ;;  %1267 = vmatmul.bf16.gmra.mxu2 %v1089_v25  ;;  %v8385_v33 = vadd.f32 %v2293_v39, %v1754_v47  ;;  %v1091_v47 = vsel %vm1052_vm1, %v1088_v63, %v1090_v32  ;;  %v2129_v60 = vsel %vm432_vm0, %v2124_v0, %v2128_v7 }
 0x19d   : > { %1701 = vmatmul.bf16.gmra.mxu3 %v7340_v27 }
 0x19e   : > { %2335 = vmatmul.bf16.gmra.mxu0 %v2121_v36  ;;  %v7341_v36 = vld [vmem:[%s7793_s27 + $0x9c] sm:$0xff] }
 0x19f   : > { %v1228_v56 = vpop.f32.mrf.mxu2 }
 0x1a0   : > { %v1321_v31 = vadd.f32 %v1228_v56, %v957_v2  ;;  %v1662_v50 = vpop.f32.mrf.mxu3 }
 0x1a1   : > { %v958_v59 = vpop.f32.mrf.mxu1 }
 0x1a2   : > { %v1755_v6 = vadd.f32 %v1662_v50, %v1321_v31  ;;  %v959_v39 = vadd.f32 %v958_v59, %v8178_v40 }
 0x1a3   : > { %v2298_v44 = vpop.f32.mrf.mxu0 }
 0x1a4   : > { %v8389_v5 = vadd.f32 %v2296_v4, %v1755_v6 }
 0x1a6   : > { %10091 = vst [vmem:[#allocation15_spill] sm:$0xff] %v8389_v5 }
 0x1a7   : > { %v1230_v17 = vpop.f32.mrf.mxu2 }
 0x1a8   : > { %v1322_v30 = vadd.f32 %v1230_v17, %v959_v39  ;;  %v1664_v25 = vpop.f32.mrf.mxu3  ;;  %v2132_v17 = vor.u32 %v2130_v52, %v2128_v7  ;;  %v7449_v7 = vld [vmem:[%s10069_s1 + $0x1c0] sm:$0xff]  ;;  %v2138_v52 = vshrl.u32 %v7374_v61, 16 }
 0x1a9   : > { %v961_v27 = vpop.f32.mrf.mxu1  ;;  %3636 = vmatpush.bf16.msra.mxu3 %v7449_v7  ;;  %v7343_v7 = vld [vmem:[%s7793_s27 + $0xac] sm:$0xff] }
 0x1aa   : > { %v1756_v18 = vadd.f32 %v1664_v25, %v1322_v30  ;;  %v962_v40 = vadd.f32 %v961_v27, %v8187_v55  ;;  %v2136_v30 = vrot.slane %v2134_v51, 1 }
 0x1ab   : > { %v2301_v2 = vpop.f32.mrf.mxu0 }
 0x1ac   : > { %1000 = vmatmul.bf16.gmra.mxu1 %v7679_v37  ;;  %1272 = vmatmul.bf16.gmra.mxu2 %v1091_v47  ;;  %v8396_v4 = vadd.f32 %v2298_v44, %v1756_v18  ;;  %v7682_v37 = vld [vmem:[%s7793_s27 + $0xa0] sm:$0xff]  ;;  %v2137_v12 = vsel %vm432_vm0, %v2132_v17, %v2136_v30 }
 0x1ad   : > { %1706 = vmatmul.bf16.gmra.mxu3 %v7341_v36  ;;  %v1092_v0 = vrot.slane %v7682_v37, 1  ;;  %v7342_v18 = vld [vmem:[%s7793_s27 + $0xa4] sm:$0xff] }
 0x1ae   : > { %10092 = vst [vmem:[#allocation16_spill] sm:$0xff] %v8396_v4  ;;  %2340 = vmatmul.bf16.gmra.mxu0 %v2129_v60 }
 0x1af   : > { %v1233_v56 = vpop.f32.mrf.mxu2  ;;  %v1093_v36 = vsel %vm1052_vm1, %v1090_v32, %v1092_v0 }
 0x1b0   : > { %v1323_v31 = vadd.f32 %v1233_v56, %v962_v40  ;;  %v1667_v50 = vpop.f32.mrf.mxu3  ;;  %v7375_v56 = vld [vmem:[%s7793_s27 + $0xb4] sm:$0xff] }
 0x1b1   : > { %v963_v59 = vpop.f32.mrf.mxu1  ;;  %v2142_v51 = vshll.u32 %v7375_v56, 16 }
 0x1b2   : > { %v1757_v63 = vadd.f32 %v1667_v50, %v1323_v31  ;;  %v964_v44 = vadd.f32 %v963_v59, %v8200_v3  ;;  %v7418_v3 = vld [vmem:[%s10069_s1 + $0x180] sm:$0xff] }
 0x1b3   : > { %v2303_v6 = vpop.f32.mrf.mxu0  ;;  %3002 = vmatpush.bf16.msra.mxu2 %v7418_v3  ;;  %v2144_v61 = vrot.slane %v2142_v51, 1 }
 0x1b4   : > { %v8400_v39 = vadd.f32 %v2301_v2, %v1757_v63 }
 0x1b6   : > { %10093 = vst [vmem:[#allocation17_spill] sm:$0xff] %v8400_v39  ;;  %v10142_v39 = vld [vmem:[#allocation12_spill] sm:$0xff] }
 0x1b7   : > { %v1235_v25 = vpop.f32.mrf.mxu2 }
 0x1b8   : > { %v1324_v55 = vadd.f32 %v1235_v25, %v964_v44  ;;  %v1669_v27 = vpop.f32.mrf.mxu3  ;;  %v7386_v44 = vld [vmem:[%s10069_s1 + $0x140] sm:$0xff]  ;;  %v7683_v25 = vld [vmem:[%s7793_s27 + $0xa8] sm:$0xff] }
 0x1b9   : > { %v966_v47 = vpop.f32.mrf.mxu1  ;;  %2568 = vmatpush.bf16.msra.mxu1 %v7386_v44  ;;  %v2146_v44 = vshrl.u32 %v7375_v56, 16 }
 0x1ba   : > { %v1758_v60 = vadd.f32 %v1669_v27, %v1324_v55  ;;  %v967_v32 = vadd.f32 %v966_v47, %v8209_v24  ;;  %v7457_v24 = vld [vmem:[%s10069_s1 + $0x200] sm:$0xff]  ;;  %v1094_v55 = vrot.slane %v7683_v25, 1  ;;  %v2140_v47 = vor.u32 %v2138_v52, %v2136_v30 }
 0x1bb   : > { %v2306_v40 = vpop.f32.mrf.mxu0  ;;  %3955 = vmatpush.bf16.msra.mxu0 %v7457_v24  ;;  %v7376_v30 = vld [vmem:[%s7793_s27 + $0xbc] sm:$0xff] }
 0x1bc   : > { %1005 = vmatmul.bf16.gmra.mxu1 %v7681_v22  ;;  %1277 = vmatmul.bf16.gmra.mxu2 %v1093_v36  ;;  %v8407_v2 = vadd.f32 %v2303_v6, %v1758_v60  ;;  %v1095_v3 = vsel %vm1052_vm1, %v1092_v0, %v1094_v55  ;;  %v2150_v24 = vshll.u32 %v7376_v30, 16 }
 0x1bd   : > { %1711 = vmatmul.bf16.gmra.mxu3 %v7342_v18 }
 0x1be   : > { %10094 = vst [vmem:[#allocation18_spill] sm:$0xff] %v8407_v2  ;;  %2345 = vmatmul.bf16.gmra.mxu0 %v2137_v12  ;;  %v7401_v2 = vld [vmem:[%s7793_s27 + $0x50] sm:$0xff] }
 0x1bf   : > { %v1238_v31 = vpop.f32.mrf.mxu2 }
 0x1c0   : > { %v1325_v22 = vadd.f32 %v1238_v31, %v967_v32  ;;  %v1672_v50 = vpop.f32.mrf.mxu3 }
 0x1c1   : > { %v968_v59 = vpop.f32.mrf.mxu1 }
 0x1c2   : > { %v1759_v63 = vadd.f32 %v1672_v50, %v1325_v22  ;;  %v969_v27 = vadd.f32 %v968_v59, %v8228_v9  ;;  %v2145_v22 = vsel %vm432_vm0, %v2140_v47, %v2144_v61 }
 0x1c3   : > { %v2308_v6 = vpop.f32.mrf.mxu0 }
 0x1c4   : > { %v8423_v17 = vadd.f32 %v2306_v40, %v1759_v63 }
 0x1c6   : > { %10095 = vst [vmem:[#allocation19_spill] sm:$0xff] %v8423_v17 }
 0x1c7   : > { %v1240_v36 = vpop.f32.mrf.mxu2 }
 0x1c8   : > { %v1326_v18 = vadd.f32 %v1240_v36, %v969_v27  ;;  %v1674_v60 = vpop.f32.mrf.mxu3  ;;  %v2148_v36 = vor.u32 %v2146_v44, %v2144_v61  ;;  %v7377_v61 = vld [vmem:[%s7793_s27 + $0xc4] sm:$0xff]  ;;  %v2154_v44 = vshrl.u32 %v7376_v30, 16 }
 0x1c9   : > { %v971_v12 = vpop.f32.mrf.mxu1 }
 0x1ca   : > { %v1760_v32 = vadd.f32 %v1674_v60, %v1326_v18  ;;  %v972_v9 = vadd.f32 %v971_v12, %v8096_v19  ;;  %v2152_v18 = vrot.slane %v2150_v24, 1  ;;  %v2158_v24 = vshll.u32 %v7377_v61, 16 }
 0x1cb   : > { %v2311_v31 = vpop.f32.mrf.mxu0 }
 0x1cc   : > { %1010 = vmatmul.bf16.gmra.mxu1 %v7682_v37  ;;  %1282 = vmatmul.bf16.gmra.mxu2 %v1095_v3  ;;  %v8430_v40 = vadd.f32 %v2308_v6, %v1760_v32  ;;  %v7684_v37 = vld [vmem:[%s7793_s27 + $0xb0] sm:$0xff]  ;;  %v2153_v56 = vsel %vm432_vm0, %v2148_v36, %v2152_v18 }
 0x1cd   : > { %1716 = vmatmul.bf16.gmra.mxu3 %v7343_v7  ;;  %v1096_v47 = vrot.slane %v7684_v37, 1  ;;  %v7344_v32 = vld [vmem:[%s7793_s27 + $0xb4] sm:$0xff] }
 0x1ce   : > { %10096 = vst [vmem:[#allocation20_spill] sm:$0xff] %v8430_v40  ;;  %2350 = vmatmul.bf16.gmra.mxu0 %v2145_v22 }
 0x1cf   : > { %v1243_v50 = vpop.f32.mrf.mxu2  ;;  %v1097_v7 = vsel %vm1052_vm1, %v1094_v55, %v1096_v47 }
 0x1d0   : > { %v1327_v59 = vadd.f32 %v1243_v50, %v972_v9  ;;  %v1677_v63 = vpop.f32.mrf.mxu3 }
 0x1d1   : > { %v973_v52 = vpop.f32.mrf.mxu1 }
 0x1d2   : > { %v1761_v0 = vadd.f32 %v1677_v63, %v1327_v59  ;;  %v974_v6 = vadd.f32 %v973_v52, %v8105_v35 }
 0x1d3   : > { %v2313_v51 = vpop.f32.mrf.mxu0 }
 0x1d4   : > { %v8434_v27 = vadd.f32 %v2311_v31, %v1761_v0 }
 0x1d6   : > { %10097 = vst [vmem:[#allocation21_spill] sm:$0xff] %v8434_v27 }
 0x1d7   : > { %v1245_v19 = vpop.f32.mrf.mxu2 }
 0x1d8   : > { %v1328_v60 = vadd.f32 %v1245_v19, %v974_v6  ;;  %v1679_v12 = vpop.f32.mrf.mxu3  ;;  %v7685_v6 = vld [vmem:[%s7793_s27 + $0xb8] sm:$0xff]  ;;  %v2156_v19 = vor.u32 %v2154_v44, %v2152_v18 }
 0x1d9   : > { %v976_v3 = vpop.f32.mrf.mxu1 }
 0x1da   : > { %v1762_v22 = vadd.f32 %v1679_v12, %v1328_v60  ;;  %v977_v35 = vadd.f32 %v976_v3, %v8118_v43  ;;  %v2160_v60 = vrot.slane %v2158_v24, 1  ;;  %v1833_v12 = vld [vmem:[%s7793_s27 + $0xcc] sm:$0x1]  ;;  %v2162_v24 = vshrl.u32 %v7377_v61, 16  ;;  %v7346_v61 = vld [vmem:[%s7793_s27 + $0xc4] sm:$0xff] }
 0x1db   : > { %v2316_v9 = vpop.f32.mrf.mxu0 }
 0x1dc   : > { %1015 = vmatmul.bf16.gmra.mxu1 %v7683_v25  ;;  %1287 = vmatmul.bf16.gmra.mxu2 %v1097_v7  ;;  %v8441_v31 = vadd.f32 %v2313_v51, %v1762_v22  ;;  %v1098_v25 = vrot.slane %v7685_v6, 1  ;;  %v2161_v30 = vsel %vm432_vm0, %v2156_v19, %v2160_v60  ;;  %v1100_v19 = vrot.slane %v8039_v11, 1  ;;  %v7596_v11 = vld [vmem:[%s7793_s27 + $0x18] sm:$0xff]  }
 0x1dd   : > { %1721 = vmatmul.bf16.gmra.mxu3 %v7344_v32 }
 0x1de   : > { %10098 = vst [vmem:[#allocation22_spill] sm:$0xff] %v8441_v31  ;;  %2355 = vmatmul.bf16.gmra.mxu0 %v2153_v56  ;;  %v1099_v22 = vsel %vm1052_vm1, %v1096_v47, %v1098_v25  ;;  %v7345_v56 = vld [vmem:[%s7793_s27 + $0xbc] sm:$0xff] }
 0x1df   : > { %v1248_v50 = vpop.f32.mrf.mxu2 }
 0x1e0   : > { %v1329_v59 = vadd.f32 %v1248_v50, %v977_v35  ;;  %v1682_v63 = vpop.f32.mrf.mxu3 }
 0x1e1   : > { %v978_v55 = vpop.f32.mrf.mxu1 }
 0x1e2   : > { %v1763_v52 = vadd.f32 %v1682_v63, %v1329_v59  ;;  %v979_v51 = vadd.f32 %v978_v55, %v8127_v49  ;;  %v1948_v59 = vunpack.c.l.b16 %v1833_v12 }
 0x1e3   : > { %v2318_v0 = vpop.f32.mrf.mxu0 }
 0x1e4   : > { %v8446_v36 = vadd.f32 %v2316_v9, %v1763_v52  ;;  %v8454_v18 = vpack.c.b16 %v1948_v59, %v1948_v59 }
 0x1e6   : > { %10099 = vst [vmem:[#allocation23_spill] sm:$0xff] %v8446_v36 }
 0x1e7   : > { %v1250_v43 = vpop.f32.mrf.mxu2  ;;  %10100 = vst [vmem:[#allocation24_spill] sm:$0xff] %v8454_v18 }
 0x1e8   : > { %v1330_v3 = vadd.f32 %v1250_v43, %v979_v51  ;;  %v1684_v7 = vpop.f32.mrf.mxu3  ;;  %v2166_v51 = vshll.u32 %v8454_v18, 16  ;;  %v2164_v43 = vor.u32 %v2162_v24, %v2160_v60 }
 0x1e9   : > { %v981_v32 = vpop.f32.mrf.mxu1 }
 0x1ea   : > { %v1764_v35 = vadd.f32 %v1684_v7, %v1330_v3  ;;  %v982_v49 = vadd.f32 %v981_v32, %v8146_v8  ;;  %v2168_v12 = vrot.slane %v2166_v51, 1 }
 0x1eb   : > { %v2321_v50 = vpop.f32.mrf.mxu0 }
 0x1ec   : > { %1020 = vmatmul.bf16.gmra.mxu1 %v7684_v37  ;;  %1292 = vmatmul.bf16.gmra.mxu2 %v1099_v22  ;;  %v8457_v37 = vadd.f32 %v2318_v0, %v1764_v35  ;;  %v2169_v0 = vsel %vm432_vm0, %v2164_v43, %v2168_v12  ;;  %v7710_v35 = vld [vmem:[%s7793_s27 + $0xc] sm:$0xe] }
 0x1ed   : > { %1726 = vmatmul.bf16.gmra.mxu3 %v7345_v56  ;;  %v1101_v56 = vsel %vm1052_vm1, %v1098_v25, %v1100_v19  ;;  %v8470_v25 = vld [vmem:[%s7793_s27 + $0x20] sm:$0xff]  ;;  %v7711_v19 = vor.u32 %v7710_v35, %v8050_v20 }
 0x1ee   : > { %2360 = vmatmul.bf16.gmra.mxu0 %v2161_v30  ;;  %10101 = vst [vmem:[#allocation25_spill] sm:$0xff] %v8457_v37  ;;  %v3369_v43 = vshll.u32 %v8470_v25, 16 }
 0x1ef   : > { %v1253_v9 = vpop.f32.mrf.mxu2 }
 0x1f0   : > { %v1331_v63 = vadd.f32 %v1253_v9, %v982_v49  ;;  %v1687_v55 = vpop.f32.mrf.mxu3 }
 0x1f1   : > { %v983_v52 = vpop.f32.mrf.mxu1 }
 0x1f2   : > { %v1765_v47 = vadd.f32 %v1687_v55, %v1331_v63  ;;  %v984_v8 = vadd.f32 %v983_v52, %v8161_v13  ;;  %v3364_v13 = vshll.u32 %v7596_v11, 16  ;;  %v7597_v63 = vld [vmem:[%s7793_s27 + $0x18] sm:$0xf0]  ;;  %v7598_v55 = vld [vmem:[%s7793_s27 + $0x18] sm:$0xe] }
 0x1f3   : > { %v2323_v44 = vpop.f32.mrf.mxu0  ;;  %v7599_v12 = vor.u32 %v7598_v55, %v7597_v63 }
 0x1f4   : > { %v8466_v49 = vadd.f32 %v2321_v50, %v1765_v47  ;;  %v3362_v50 = vshrl.u32 %v7596_v11, 16  ;;  %v3366_v47 = vrot.slane %v3364_v13, 1  ;;  %v7394_v13 = vld [vmem:[%s7793_s27 + $0x18] sm:$0xff] }
 0x1f6   : > { %10102 = vst [vmem:[#allocation26_spill] sm:$0xff] %v8466_v49 }
 0x1f7   : > { %v1255_v3 = vpop.f32.mrf.mxu2 }
 0x1f8   : > { %v1332_v7 = vadd.f32 %v1255_v3, %v984_v8  ;;  %v1689_v32 = vpop.f32.mrf.mxu3  ;;  %v7686_v3 = vld [vmem:[%s7793_s27 + $0x14] sm:$0xff] }
 0x1f9   : > { %v986_v22 = vpop.f32.mrf.mxu1 }
 0x1fa   : > { %v1766_v30 = vadd.f32 %v1689_v32, %v1332_v7  ;;  %v987_v60 = vadd.f32 %v986_v22, %v8174_v54  ;;  %v2440_v54 = vrot.slane %v7711_v19, 1  ;;  %v2441_v7 = vrot.slane %v7686_v3, 1 }
 0x1fb   : > { %v2326_v59 = vpop.f32.mrf.mxu0  ;;  %v3367_v32 = vor.u32 %v3366_v47, %v3362_v50  ;;  %v3373_v3 = vshrl.u32 %v8470_v25, 16 }
 0x1fc   : > { %1025 = vmatmul.bf16.gmra.mxu1 %v7685_v6  ;;  %1297 = vmatmul.bf16.gmra.mxu2 %v1101_v56  ;;  %v3371_v56 = vrot.slane %v3369_v43, 1  ;;  %v8479_v20 = vadd.f32 %v2323_v44, %v1766_v30  ;;  %v2442_v63 = vsel %vm1052_vm1, %v2440_v54, %v2441_v7  ;;  %v7427_v30 = vld [vmem:[%s7793_s27 + $0x28] sm:$0xff] }
 0x1fd   : > { %1731 = vmatmul.bf16.gmra.mxu3 %v7346_v61  ;;  %v3827_v61 = vrot.slane %v7599_v12, 1 }
 0x1fe   : > { %2365 = vmatmul.bf16.gmra.mxu0 %v2169_v0  ;;  %v3828_v0 = vrot.slane %v8470_v25, 1  ;;  %10103 = vst [vmem:[#allocation27_spill] sm:$0xff] %v8479_v20 }
 0x1ff   : > { %v1258_v9 = vpop.f32.mrf.mxu2 }
 0x200   : > { %v1333_v52 = vadd.f32 %v1258_v9, %v987_v60  ;;  %v1692_v24 = vpop.f32.mrf.mxu3 }
 0x201   : > { %v988_v51 = vpop.f32.mrf.mxu1 }
 0x202   : > { %v1767_v6 = vadd.f32 %v1692_v24, %v1333_v52  ;;  %v989_v22 = vadd.f32 %v988_v51, %v8183_v48  ;;  %v3372_v24 = vsel %vm432_vm0, %v3367_v32, %v3371_v56  ;;  %v3829_v48 = vsel %vm1052_vm1, %v3827_v61, %v3828_v0 }
 0x203   : > { %v2328_v8 = vpop.f32.mrf.mxu0  ;;  %v3377_v32 = vshll.u32 %v7427_v30, 16 }
 0x204   : > { %v8487_v19 = vadd.f32 %v2326_v59, %v1767_v6 }
 0x206   : > { %10104 = vst [vmem:[#allocation28_spill] sm:$0xff] %v8487_v19 }
 0x207   : > { %v1260_v60 = vpop.f32.mrf.mxu2 }
 0x208   : > { %v1334_v35 = vadd.f32 %v1260_v60, %v989_v22  ;;  %v1694_v11 = vpop.f32.mrf.mxu3  ;;  %v7687_v22 = vld [vmem:[%s7793_s27 + $0x1c] sm:$0xff] }
 0x209   : > { %v991_v9 = vpop.f32.mrf.mxu1  ;;  %v2443_v61 = vrot.slane %v7687_v22, 1 }
 0x20a   : > { %v1768_v55 = vadd.f32 %v1694_v11, %v1334_v35  ;;  %v992_v44 = vadd.f32 %v991_v9, %v8196_v1  ;;  %v3375_v35 = vor.u32 %v3373_v3, %v3371_v56  ;;  %v3379_v11 = vrot.slane %v3377_v32, 1  ;;  %v7395_v9 = vld [vmem:[%s7793_s27 + $0x20] sm:$0xff]  ;;  %v7428_v56 = vld [vmem:[%s7793_s27 + $0x30] sm:$0xff] }
 0x20b   : > { %v2331_v52 = vpop.f32.mrf.mxu0  ;;  %v3830_v1 = vrot.slane %v7427_v30, 1 }
 0x20c   : > { %2569 = vmatmul.bf16.vlgmr.msra.gmra.mxu1 %v2442_v63  ;;  %3003 = vmatmul.bf16.vlgmr.msra.gmra.mxu2 %v7394_v13  ;;  %v3380_v25 = vsel %vm432_vm0, %v3375_v35, %v3379_v11  ;;  %v3385_v35 = vshll.u32 %v7428_v56, 16 }
 0x20d   : > { %3637 = vmatmul.bf16.vlgmr.msra.gmra.mxu3 %v3372_v24  ;;  %v2444_v24 = vsel %vm1052_vm1, %v2441_v7, %v2443_v61 }
 0x20e   : > { %3956 = vmatmul.bf16.vlgmr.msra.gmra.mxu0 %v3829_v48 }
 0x20f   : > { %v1263_v51 = vpop.f32.mrf.mxu2 }
 0x210   : > { %v1335_v50 = vadd.f32 %v1263_v51, %v992_v44  ;;  %v1697_v47 = vpop.f32.mrf.mxu3  ;;  %v3831_v51 = vsel %vm1052_vm1, %v3828_v0, %v3830_v1 }
 0x211   : > { %v993_v43 = vpop.f32.mrf.mxu1 }
 0x212   : > { %v1769_v12 = vadd.f32 %v1697_v47, %v1335_v50  ;;  %v994_v60 = vadd.f32 %v993_v43, %v8205_v28  ;;  %v8496_v50 = vadd.f32 %v2328_v8, %v1768_v55  ;;  %v7688_v8 = vld [vmem:[%s7793_s27 + $0x24] sm:$0xff] }
 0x213   : > { %v2333_v54 = vpop.f32.mrf.mxu0  ;;  %v2445_v55 = vrot.slane %v7688_v8, 1 }
 0x214   : > { %10105 = vst [vmem:[#allocation29_spill] sm:$0xff] %v8496_v50  ;;  %v8500_v0 = vadd.f32 %v2331_v52, %v1769_v12 }
 0x216   : > { %10106 = vst [vmem:[#allocation30_spill] sm:$0xff] %v8500_v0  ;;  %v4125_v0 = vlaneseq }
 0x217   : > { %v1265_v13 = vpop.f32.mrf.mxu2 }
 0x218   : > { %v1336_v59 = vadd.f32 %v1265_v13, %v994_v60  ;;  %v1699_v6 = vpop.f32.mrf.mxu3  ;;  %v3381_v60 = vshrl.u32 %v7427_v30, 16  ;;  %v10107_v13 = vld [vmem:[#allocation13_spill] sm:$0xff] }
 0x219   : > { %v996_v63 = vpop.f32.mrf.mxu1 }
 0x21a   : > { %v1770_v48 = vadd.f32 %v1699_v6, %v1336_v59  ;;  %v997_v28 = vadd.f32 %v996_v63, %v8224_v23  ;;  %v3383_v6 = vor.u32 %v3381_v60, %v3379_v11  ;;  %v7429_v60 = vld [vmem:[%s7793_s27 + $0x38] sm:$0xff] }
 0x21b   : > { %v2336_v44 = vpop.f32.mrf.mxu0 }
 0x21c   : > { %2574 = vmatmul.bf16.gmra.mxu1 %v2444_v24  ;;  %3008 = vmatmul.bf16.gmra.mxu2 %v7395_v9  ;;  %v3387_v9 = vrot.slane %v3385_v35, 1  ;;  %v3832_v24 = vrot.slane %v7428_v56, 1  ;;  %v8508_v11 = vadd.f32 %v2333_v54, %v1770_v48 }
 0x21d   : > { %3642 = vmatmul.bf16.gmra.mxu3 %v3380_v25 }
 0x21e   : > { %3961 = vmatmul.bf16.gmra.mxu0 %v3831_v51  ;;  %v7396_v51 = vld [vmem:[%s7793_s27 + $0x28] sm:$0xff]  ;;  %v3388_v52 = vsel %vm432_vm0, %v3383_v6, %v3387_v9  ;;  %v3833_v12 = vsel %vm1052_vm1, %v3830_v1, %v3832_v24  ;;  %10108 = vst [vmem:[#allocation13_spill] sm:$0xff] %v8508_v11  ;;  %v3389_v6 = vshrl.u32 %v7428_v56, 16  ;;  %v3393_v1 = vshll.u32 %v7429_v60, 16 }
 0x21f   : > { %v1268_v47 = vpop.f32.mrf.mxu2 }
 0x220   : > { %v1337_v43 = vadd.f32 %v1268_v47, %v997_v28  ;;  %v1702_v3 = vpop.f32.mrf.mxu3  ;;  %v2446_v47 = vsel %vm1052_vm1, %v2443_v61, %v2445_v55  ;;  %v3391_v48 = vor.u32 %v3389_v6, %v3387_v9  ;;  %v10113_v9 = vld [vmem:[#allocation4_spill] sm:$0xff]  ;;  %v7430_v6 = vld [vmem:[%s7793_s27 + $0x40] sm:$0xff] }
 0x221   : > { %v998_v7 = vpop.f32.mrf.mxu1 }
 0x222   : > { %v1771_v32 = vadd.f32 %v1702_v3, %v1337_v43  ;;  %v999_v59 = vadd.f32 %v998_v7, %v10107_v13  ;;  %v10109_v3 = vld [vmem:[#allocation2_spill] sm:$0xff] }
 0x223   : > { %v2338_v22 = vpop.f32.mrf.mxu0 }
 0x227   : > { %v1270_v23 = vpop.f32.mrf.mxu2 }
 0x228   : > { %v1338_v63 = vadd.f32 %v1270_v23, %v999_v59  ;;  %v1704_v25 = vpop.f32.mrf.mxu3 }
 0x229   : > { %v1001_v28 = vpop.f32.mrf.mxu1 }
 0x22a   : > { %v1772_v43 = vadd.f32 %v1704_v25, %v1338_v63  ;;  %v1002_v7 = vadd.f32 %v1001_v28, %v10109_v3  ;;  %v7689_v63 = vld [vmem:[%s7793_s27 + $0x2c] sm:$0xff]  ;;  %v3834_v28 = vrot.slane %v7429_v60, 1 }
 0x22b   : > { %v2341_v30 = vpop.f32.mrf.mxu0  ;;  %v2447_v25 = vrot.slane %v7689_v63, 1 }
 0x22c   : > { %2579 = vmatmul.bf16.gmra.mxu1 %v2446_v47  ;;  %3013 = vmatmul.bf16.gmra.mxu2 %v7396_v51  ;;  %v8515_v51 = vadd.f32 %v2336_v44, %v1771_v32  ;;  %v10111_v47 = vld [vmem:[#allocation3_spill] sm:$0xff]  ;;  %v3835_v44 = vsel %vm1052_vm1, %v3832_v24, %v3834_v28  ;;  %v8524_v32 = vadd.f32 %v2338_v22, %v1772_v43  ;;  %v3401_v24 = vshll.u32 %v7430_v6, 16 }
 0x22d   : > { %3647 = vmatmul.bf16.gmra.mxu3 %v3388_v52  ;;  %v3395_v52 = vrot.slane %v3393_v1, 1  ;;  %v3836_v43 = vrot.slane %v7430_v6, 1 }
 0x22e   : > { %3966 = vmatmul.bf16.gmra.mxu0 %v3833_v12  ;;  %10110 = vst [vmem:[#allocation2_spill] sm:$0xff] %v8515_v51  ;;  %v3403_v22 = vrot.slane %v3401_v24, 1 }
 0x22f   : > { %v1273_v35 = vpop.f32.mrf.mxu2  ;;  %v3396_v63 = vsel %vm432_vm0, %v3391_v48, %v3395_v52  ;;  %10112 = vst [vmem:[#allocation3_spill] sm:$0xff] %v8524_v32  ;;  %v3397_v48 = vshrl.u32 %v7429_v60, 16 }
 0x230   : > { %v1339_v8 = vadd.f32 %v1273_v35, %v1002_v7  ;;  %v1707_v13 = vpop.f32.mrf.mxu3  ;;  %v7397_v35 = vld [vmem:[%s7793_s27 + $0x30] sm:$0xff] }
 0x231   : > { %v1003_v61 = vpop.f32.mrf.mxu1 }
 0x232   : > { %v1773_v59 = vadd.f32 %v1707_v13, %v1339_v8  ;;  %v1004_v54 = vadd.f32 %v1003_v61, %v10111_v47  ;;  %v2448_v8 = vsel %vm1052_vm1, %v2445_v55, %v2447_v25 }
 0x233   : > { %v8512_v23 = vpop.f32.mrf.mxu0 }
 0x237   : > { %v1275_v12 = vpop.f32.mrf.mxu2 }
 0x238   : > { %v1340_v3 = vadd.f32 %v1275_v12, %v1004_v54  ;;  %v1709_v7 = vpop.f32.mrf.mxu3 }
 0x239   : > { %v1006_v11 = vpop.f32.mrf.mxu1 }
 0x23a   : > { %v1774_v13 = vadd.f32 %v1709_v7, %v1340_v3  ;;  %v1007_v61 = vadd.f32 %v1006_v11, %v10113_v9  ;;  %v7690_v7 = vld [vmem:[%s7793_s27 + $0x34] sm:$0xff]  ;;  %v8532_v11 = vadd.f32 %v2341_v30, %v1773_v59  ;;  %v10116_v30 = vld [vmem:[#allocation6_spill] sm:$0xff] }
 0x23b   : > { %v8520_v56 = vpop.f32.mrf.mxu0 }
 0x23c   : > { %2584 = vmatmul.bf16.gmra.mxu1 %v2448_v8  ;;  %3018 = vmatmul.bf16.gmra.mxu2 %v7397_v35  ;;  %v2449_v8 = vrot.slane %v7690_v7, 1  ;;  %v10114_v35 = vld [vmem:[#allocation5_spill] sm:$0xff]  ;;  %10115 = vst [vmem:[#allocation4_spill] sm:$0xff] %v8532_v11 }
 0x23d   : > { %3652 = vmatmul.bf16.gmra.mxu3 %v3396_v63 }
 0x23e   : > { %3971 = vmatmul.bf16.gmra.mxu0 %v3835_v44  ;;  %v3399_v44 = vor.u32 %v3397_v48, %v3395_v52  ;;  %v8542_v52 = vld [vmem:[%s7793_s27 + $0x48] sm:$0xff] }
 0x23f   : > { %v1278_v1 = vpop.f32.mrf.mxu2  ;;  %v10125_v27 = vrot.slane %v8542_v52, 1 }
 0x240   : > { %v1341_v47 = vadd.f32 %v1278_v1, %v1007_v61  ;;  %v1712_v55 = vpop.f32.mrf.mxu3  ;;  %v7398_v1 = vld [vmem:[%s7793_s27 + $0x38] sm:$0xff]  ;;  %v3404_v7 = vsel %vm432_vm0, %v3399_v44, %v3403_v22  ;;  %v3405_v44 = vshrl.u32 %v7430_v6, 16 }
 0x241   : > { %v1008_v54 = vpop.f32.mrf.mxu1 }
 0x242   : > { %v1775_v12 = vadd.f32 %v1712_v55, %v1341_v47  ;;  %v1009_v63 = vadd.f32 %v1008_v54, %v10114_v35  ;;  %v2450_v47 = vsel %vm1052_vm1, %v2447_v25, %v2449_v8  ;;  %v3837_v54 = vsel %vm1052_vm1, %v3834_v28, %v3836_v43 }
 0x243   : > { %v8528_v3 = vpop.f32.mrf.mxu0  ;;  %v3409_v28 = vshll.u32 %v8542_v52, 16 }
 0x247   : > { %v1280_v32 = vpop.f32.mrf.mxu2 }
 0x248   : > { %v1342_v9 = vadd.f32 %v1280_v32, %v1009_v63  ;;  %v1714_v61 = vpop.f32.mrf.mxu3 }
 0x249   : > { %v1011_v51 = vpop.f32.mrf.mxu1 }
 0x24a   : > { %v1776_v55 = vadd.f32 %v1714_v61, %v1342_v9  ;;  %v1012_v59 = vadd.f32 %v1011_v51, %v10116_v30  ;;  %v8550_v9 = vadd.f32 %v8512_v23, %v1774_v13  ;;  %v7691_v61 = vld [vmem:[%s7793_s27 + $0x3c] sm:$0xff]  ;;  %v10118_v51 = vld [vmem:[#allocation7_spill] sm:$0xff]  ;;  %v10072_v30 = vrot.slane %v8542_v52, 1 }
 0x24b   : > { %v8536_v60 = vpop.f32.mrf.mxu0 }
 0x24c   : > { %2589 = vmatmul.bf16.gmra.mxu1 %v2450_v47  ;;  %3023 = vmatmul.bf16.gmra.mxu2 %v7398_v1  ;;  %10117 = vst [vmem:[#allocation5_spill] sm:$0xff] %v8550_v9  ;;  %v2451_v1 = vrot.slane %v7691_v61, 1  ;;  %v10120_v61 = vld [vmem:[#allocation8_spill] sm:$0xff]  ;;  %v10074_v9 = vmov 0  }
 0x24d   : > { %3657 = vmatmul.bf16.gmra.mxu3 %v3404_v7  ;;  %v3407_v7 = vor.u32 %v3405_v44, %v3403_v22  ;;  %v3839_v22 = vsel %vm1052_vm1, %v3836_v43, %v10072_v30  ;;  %v8568_v44 = vadd.f32 %v8520_v56, %v1775_v12  ;;  %v3413_v56 = vshrl.u32 %v8542_v52, 16 }
 0x24e   : > { %3976 = vmatmul.bf16.gmra.mxu0 %v3837_v54  ;;  %v3411_v54 = vrot.slane %v3409_v28, 1  ;;  %v2452_v6 = vsel %vm1052_vm1, %v2449_v8, %v2451_v1  ;;  %v8571_v8 = vld [vmem:[%s7793_s27 + $0x50] sm:$0xff] }
 0x24f   : > { %v1283_v32 = vpop.f32.mrf.mxu2  ;;  %10119 = vst [vmem:[#allocation6_spill] sm:$0xff] %v8568_v44  ;;  %v3417_v12 = vshll.u32 %v8571_v8, 16  ;;  %v8587_v44 = vld [vmem:[%s7793_s27 + $0x58] sm:$0xff] }
 0x250   : > { %v1343_v48 = vadd.f32 %v1283_v32, %v1012_v59  ;;  %v1717_v24 = vpop.f32.mrf.mxu3  ;;  %v3412_v13 = vsel %vm432_vm0, %v3407_v7, %v3411_v54 }
 0x251   : > { %v1013_v25 = vpop.f32.mrf.mxu1 }
 0x252   : > { %v8544_v35 = vadd.f32 %v1717_v24, %v1343_v48  ;;  %v1014_v47 = vadd.f32 %v1013_v25, %v10118_v51  ;;  %v7399_v24 = vld [vmem:[%s7793_s27 + $0x40] sm:$0xff]  ;;  %v8565_v25 = vshrl.u32 %v4125_v0, 7 }
 0x253   : > { %v8546_v63 = vpop.f32.mrf.mxu0 }
 0x254   : > { %v4177_v28 = vand.u32 65535, %v8565_v25  ;;  %v4178_v7 = vshrl.u32 %v8565_v25, 16 }
 0x256   : > { %v4181_v43 = vmul.u32 43690, %v4177_v28 }
 0x257   : > { %v1285_v59 = vpop.f32.mrf.mxu2 }
 0x258   : > { %v1344_v32 = vadd.f32 %v1285_v59, %v1014_v47  ;;  %v1719_v48 = vpop.f32.mrf.mxu3 }
 0x259   : > { %v1016_v11 = vpop.f32.mrf.mxu1 }
 0x25a   : > { %v8557_v50 = vadd.f32 %v1719_v48, %v1344_v32  ;;  %v1017_v51 = vadd.f32 %v1016_v11, %v10120_v61  ;;  %v7692_v48 = vld [vmem:[%s7793_s27 + $0x44] sm:$0xff]  ;;  %v8584_v61 = vadd.f32 %v8528_v3, %v1776_v55  ;;  %v10122_v55 = vld [vmem:[#allocation9_spill] sm:$0xff] }
 0x25b   : > { %v8559_v23 = vpop.f32.mrf.mxu0 }
 0x25c   : > { %2594 = vmatmul.bf16.gmra.mxu1 %v2452_v6  ;;  %3028 = vmatmul.bf16.gmra.mxu2 %v7399_v24  ;;  %v2453_v24 = vrot.slane %v7692_v48, 1  ;;  %v4180_v6 = vmul.u32 43691, %v4177_v28  ;;  %10121 = vst [vmem:[#allocation7_spill] sm:$0xff] %v8584_v61  ;;  %v8591_v28 = vadd.s32 8, %v8565_v25  ;;  %v3419_v48 = vrot.slane %v3417_v12, 1 }
 0x25d   : > { %3662 = vmatmul.bf16.gmra.mxu3 %v3412_v13  ;;  %v4182_v13 = vmul.u32 43691, %v4178_v7  ;;  %v3425_v12 = vshll.u32 %v8587_v44, 16 }
 0x25e   : > { %3981 = vmatmul.bf16.gmra.mxu0 %v3839_v22  ;;  %v4184_v22 = vshll.u32 %v4181_v43, 16  ;;  %v4206_v20 = vand.u32 65535, %v8591_v28  ;;  %v4207_v36 = vshrl.u32 %v8591_v28, 16 }
 0x25f   : > { %v1288_v47 = vpop.f32.mrf.mxu2  ;;  %v3427_v52 = vrot.slane %v3425_v12, 1 }
 0x260   : > { %v1345_v0 = vadd.f32 %v1288_v47, %v1017_v51  ;;  %v1722_v59 = vpop.f32.mrf.mxu3  ;;  %v4183_v51 = vmul.u32 43690, %v4178_v7  ;;  %v4186_v47 = vshll.u32 %v4182_v13, 16  ;;  %vm4188_vm2 = vc.u32 %v4180_v6, %v4184_v22 }
 0x261   : > { %v1018_v32 = vpop.f32.mrf.mxu1  ;;  %v4189_v18 = vsel %vm4188_vm2, 1, %v10074_v9  ;;  %v4190_v19 = vadd.s32 %v4184_v22, %v4180_v6  ;;  %v3421_v6 = vshrl.u32 %v8571_v8, 16  ;;  %v4185_v22 = vshrl.u32 %v4181_v43, 16 }
 0x262   : > { %v8579_v30 = vadd.f32 %v1722_v59, %v1345_v0  ;;  %v2454_v0 = vsel %vm1052_vm1, %v2451_v1, %v2453_v24  ;;  %v3415_v59 = vor.u32 %v3413_v56, %v3411_v54  ;;  %v4191_v3 = vadd.s32 %v4189_v18, %v4183_v51  ;;  %v7400_v54 = vld [vmem:[%s7793_s27 + $0x48] sm:$0xff] }
 0x263   : > { %v8581_v11 = vpop.f32.mrf.mxu0  ;;  %v1019_v7 = vadd.f32 %v1018_v32, %v10122_v55  ;;  %vm4192_vm3 = vc.u32 %v4190_v19, %v4186_v47  ;;  %v8602_v56 = vld [vmem:[%s7793_s27 + $0x4c] sm:$0xff]  ;;  %v4187_v51 = vshrl.u32 %v4182_v13, 16  ;;  %v4209_v47 = vmul.u32 43691, %v4206_v20 }
 0x264   : > { %v4193_v37 = vsel %vm4192_vm3, 1, %v10074_v9  ;;  %v4210_v55 = vmul.u32 43690, %v4206_v20  ;;  %v4211_v61 = vmul.u32 43691, %v4207_v36  ;;  %v4212_v17 = vmul.u32 43690, %v4207_v36 }
 0x265   : > { %v4195_v19 = vadd.s32 %v4193_v37, %v4191_v3  ;;  %v3423_v13 = vor.u32 %v3421_v6, %v3419_v48 }
 0x266   : > { %v4213_v37 = vshll.u32 %v4210_v55, 16  ;;  %v4215_v20 = vshll.u32 %v4211_v61, 16 }
 0x267   : > { %v1290_v49 = vpop.f32.mrf.mxu2  ;;  %v4196_v40 = vadd.s32 %v4195_v19, %v4185_v22  ;;  %v10128_v22 = vmov 0  }
 0x268   : > { %v1346_v1 = vadd.f32 %v1290_v49, %v1019_v7  ;;  %v1724_v31 = vpop.f32.mrf.mxu3  ;;  %v3420_v49 = vsel %vm432_vm0, %v3415_v59, %v3419_v48  ;;  %v10124_v7 = vrot.slane %v8571_v8, 1  ;;  %v10126_v59 = vrot.slane %v8602_v56, 1 }
 0x269   : > { %v1021_v32 = vpop.f32.mrf.mxu1  ;;  %vm4217_vm4 = vc.u32 %v4209_v47, %v4213_v37  ;;  %v4219_v48 = vadd.s32 %v4213_v37, %v4209_v47  ;;  %v8636_v47 = vld [vmem:[%s7793_s27 + $0x60] sm:$0xff] }
 0x26a   : > { %v8606_v43 = vadd.f32 %v1724_v31, %v1346_v1  ;;  %v3841_v18 = vsel %vm1052_vm1, %v10125_v27, %v10124_v7  ;;  %v8617_v31 = vadd.s32 16, %v8565_v25  ;;  %v8622_v3 = vsel %vm1052_vm1, %v2453_v24, %v10126_v59  ;;  %v10127_v27 = vld [vmem:[#allocation10_spill] sm:$0xff] }
 0x26b   : > { %v8608_v9 = vpop.f32.mrf.mxu0  ;;  %v4197_v1 = vadd.s32 %v4196_v40, %v4187_v51  ;;  %v1022_v36 = vadd.f32 %v1021_v32, %v10127_v27  ;;  %vm4221_vm5 = vc.u32 %v4219_v48, %v4215_v20  ;;  %v8632_v40 = vadd.f32 %v8536_v60, %v8544_v35 }
 0x26c   : > { %10123 = vst [vmem:[#allocation8_spill] sm:$0xff] %v8608_v9  ;;  %2599 = vmatmul.bf16.gmra.mxu1 %v2454_v0  ;;  %3033 = vmatmul.bf16.gmra.mxu2 %v7400_v54  ;;  %v4218_v0 = vsel %vm4217_vm4, 1, %v10128_v22  ;;  %v4235_v6 = vand.u32 65535, %v8617_v31  ;;  %v4236_v7 = vshrl.u32 %v8617_v31, 16  ;;  %v4216_v20 = vshrl.u32 %v4211_v61, 16 }
 0x26d   : > { %3667 = vmatmul.bf16.gmra.mxu3 %v3420_v49  ;;  %v4198_v19 = vshrl.u32 %v4197_v1, 4  ;;  %v4214_v49 = vshrl.u32 %v4210_v55, 16  ;;  %10129 = vst [vmem:[#allocation9_spill] sm:$0xff] %v8632_v40  ;;  %v3429_v60 = vshrl.u32 %v8587_v44, 16  ;;  %v8651_v48 = vadd.s32 24, %v8565_v25 }
 0x26e   : > { %3986 = vmatmul.bf16.gmra.mxu0 %v3841_v18  ;;  %v4220_v18 = vadd.s32 %v4218_v0, %v4212_v17  ;;  %v8628_v12 = vmul.u32 43690, %v4235_v6  ;;  %v4222_v17 = vsel %vm4221_vm5, 1, %v10128_v22  ;;  %v4238_v55 = vmul.u32 43691, %v4235_v6 }
 0x26f   : > { %v1293_v54 = vpop.f32.mrf.mxu2  ;;  %v4199_v37 = vmul.u32 24, %v4198_v19  ;;  %v3428_v6 = vsel %vm432_vm0, %v3423_v13, %v3427_v52  ;;  %v8656_v61 = vadd.f32 %v8546_v63, %v8557_v50  ;;  %v8659_v19 = vld [vmem:[%s7793_s27 + $0x54] sm:$0xff]  ;;  %v10134_v50 = vrot.slane %v8587_v44, 1 }
 0x270   : > { %v1347_v9 = vadd.f32 %v1293_v54, %v1022_v36  ;;  %v1727_v24 = vpop.f32.mrf.mxu3  ;;  %v4224_v27 = vadd.s32 %v4222_v17, %v4220_v18  ;;  %v8643_v36 = vmul.u32 43691, %v4236_v7  ;;  %v4242_v0 = vshll.u32 %v8628_v12, 16  ;;  %v10133_v17 = vld [vmem:[#allocation11_spill] sm:$0xff] }
 0x271   : > { %v1023_v32 = vpop.f32.mrf.mxu1  ;;  %v8647_v35 = vsub.s32 %v8565_v25, %v4199_v37  ;;  %v4241_v54 = vmul.u32 43690, %v4236_v7  ;;  %10132 = vst [vmem:[#allocation32_spill] sm:$0xff] %v8656_v61  ;;  %v10135_v63 = vrot.slane %v8571_v8, 1  ;;  %v3431_v18 = vor.u32 %v3429_v60, %v3427_v52 }
 0x272   : > { %v8639_v59 = vadd.f32 %v1727_v24, %v1347_v9  ;;  %v4225_v9 = vadd.s32 %v4224_v27, %v4214_v49  ;;  %v3433_v24 = vshll.u32 %v8636_v47, 16  ;;  %v4244_v37 = vshll.u32 %v8643_v36, 16 }
 0x273   : > { %v8641_v1 = vpop.f32.mrf.mxu0  ;;  %vm4246_vm6 = vc.u32 %v4238_v55, %v4242_v0  ;;  %v1024_v51 = vadd.f32 %v1023_v32, %v10133_v17  ;;  %v4248_v7 = vadd.s32 %v4242_v0, %v4238_v55  ;;  %vm5566_vm7 = vcmp.ne.s32.totalorder %v8647_v35, 0 }
 0x274   : > { %10130 = vst [vmem:[#allocation10_spill] sm:$0xff] %v8639_v59  ;;  %v4226_v13 = vadd.s32 %v4225_v9, %v4216_v20  ;;  %v4247_v49 = vsel %vm4246_vm6, 1, %v10128_v22  ;;  %v4264_v59 = vand.u32 65535, %v8651_v48  ;;  %vm5614_vm8 = vcmp.lt.s32.totalorder %v8647_v35, 0  ;;  %v8676_v20 = vld [vmem:[%s7793_s27 + $0x68] sm:$0xff] }
 0x275   : > { %10131 = vst [vmem:[#allocation31_spill] sm:$0xff] %v8641_v1  ;;  %v3843_v1 = vsel %vm1052_vm1, %v10135_v63, %v10134_v50  ;;  %v4249_v55 = vadd.s32 %v4247_v49, %v4241_v54  ;;  %v10136_v9 = vrot.slane %v8659_v19, 1  ;;  %v10137_v8 = vrot.slane %v8602_v56, 1  ;;  %vm8697_vm10 = vmand %vm5614_vm8, %vm5566_vm7 }
 0x276   : > { %v4227_v32 = vshrl.u32 %v4226_v13, 4  ;;  %v3435_v60 = vrot.slane %v3433_v24, 1  ;;  %vm4250_vm9 = vc.u32 %v4248_v7, %v4244_v37  ;;  %v8692_v54 = vadd.s32 24, %v8647_v35 }
 0x277   : > { %v1295_v27 = vpop.f32.mrf.mxu2  ;;  %v8683_v52 = vsel %vm1052_vm1, %v10137_v8, %v10136_v9  ;;  %v4243_v49 = vshrl.u32 %v8628_v12, 16  ;;  %v3437_v24 = vshrl.u32 %v8636_v47, 16  ;;  %v4268_v37 = vmul.u32 43690, %v4264_v59  ;;  %v8707_v9 = vld [vmem:[%s7793_s27 + $0x5c] sm:$0xff] }
 0x278   : > { %v1348_v61 = vadd.f32 %v1295_v27, %v1024_v51  ;;  %v1729_v40 = vpop.f32.mrf.mxu3  ;;  %v4265_v51 = vshrl.u32 %v8651_v48, 16  ;;  %v4228_v7 = vmul.u32 24, %v4227_v32  ;;  %v3441_v50 = vshll.u32 %v8676_v20, 16 }
 0x279   : > { %v1026_v0 = vpop.f32.mrf.mxu1  ;;  %v4245_v12 = vshrl.u32 %v8643_v36, 16  ;;  %v10144_v32 = vrot.slane %v8587_v44, 1 }
 0x27a   : > { %v8686_v17 = vadd.f32 %v1729_v40, %v1348_v61  ;;  %v4251_v40 = vsel %vm4250_vm9, 1, %v10128_v22  ;;  %v4267_v61 = vmul.u32 43691, %v4264_v59  ;;  %v4269_v13 = vmul.u32 43691, %v4265_v51 }
 0x27b   : > { %v8688_v27 = vpop.f32.mrf.mxu0  ;;  %v4253_v63 = vadd.s32 %v4251_v40, %v4249_v55  ;;  %v1027_v59 = vadd.f32 %v1026_v0, %v10142_v39  ;;  %v3439_v55 = vor.u32 %v3437_v24, %v3435_v60  ;;  %v8725_v0 = vrot.slane %v3441_v50, 1 }
 0x27c   : > { %10138 = vst [vmem:[#allocation11_spill] sm:$0xff] %v8686_v17  ;;  %2604 = vmatmul.bf16.gmra.mxu1 %v8622_v3  ;;  %3038 = vmatmul.bf16.gmra.mxu2 %v7401_v2  ;;  %v4271_v17 = vshll.u32 %v4268_v37, 16  ;;  %v8712_v3 = vsel %vm432_vm0, %v3431_v18, %v3435_v60  ;;  %v10143_v2 = vrot.slane %v8636_v47, 1  ;;  %v4273_v40 = vshll.u32 %v4269_v13, 16 }
 0x27d   : > { %10139 = vst [vmem:[#allocation33_spill] sm:$0xff] %v8688_v27  ;;  %3672 = vmatmul.bf16.gmra.mxu3 %v3428_v6  ;;  %v4270_v27 = vmul.u32 43690, %v4265_v51  ;;  %v4254_v51 = vadd.s32 %v4253_v63, %v4243_v49 }
 0x27e   : > { %3991 = vmatmul.bf16.gmra.mxu0 %v3843_v1  ;;  %v8719_v36 = vsel %vm1052_vm1, %v10144_v32, %v10143_v2  ;;  %vm4275_vm11 = vc.u32 %v4267_v61, %v4271_v17  ;;  %v4277_v44 = vadd.s32 %v4271_v17, %v4267_v61  ;;  %v8729_v2 = vsub.s32 %v8591_v28, %v4228_v7 }
 0x27f   : > { %v1298_v6 = vpop.f32.mrf.mxu2  ;;  %v4276_v8 = vsel %vm4275_vm11, 1, %v10128_v22  ;;  %v10145_v32 = vrot.slane %v8707_v9, 1  ;;  %v10146_v1 = vrot.slane %v8659_v19, 1  ;;  %v4255_v49 = vadd.s32 %v4254_v51, %v4245_v12  ;;  %v10150_v51 = vld [vmem:[#allocation14_spill] sm:$0xff] }
 0x280   : > { %v1349_v39 = vadd.f32 %v1298_v6, %v1027_v59  ;;  %v1732_v18 = vpop.f32.mrf.mxu3  ;;  %v4278_v24 = vadd.s32 %v4276_v8, %v4270_v27  ;;  %v4272_v59 = vshrl.u32 %v4268_v37, 16  ;;  %vm4279_vm12 = vc.u32 %v4277_v44, %v4273_v40 }
 0x281   : > { %v1028_v4 = vpop.f32.mrf.mxu1  ;;  %v8736_v60 = vsel %vm1052_vm1, %v10146_v1, %v10145_v32  ;;  %v8743_v17 = vadd.s32 32, %v8565_v25  ;;  %v4256_v28 = vshrl.u32 %v4255_v49, 4  ;;  %v4280_v61 = vsel %vm4279_vm12, 1, %v10128_v22 }
 0x282   : > { %v8738_v63 = vadd.f32 %v1732_v18, %v1349_v39  ;;  %v8747_v19 = vadd.s32 40, %v8565_v25  ;;  %v8751_v7 = vadd.f32 %v8559_v23, %v8579_v30  ;;  %v10076_v27 = vrot.slane %v8676_v20, 1  ;;  %v8764_v39 = vld [vmem:[%s7793_s27 + $0x70] sm:$0xff] }
 0x283   : > { %v8740_v50 = vpop.f32.mrf.mxu0  ;;  %v4274_v12 = vshrl.u32 %v4269_v13, 16  ;;  %v4282_v8 = vadd.s32 %v4280_v61, %v4278_v24  ;;  %v4293_v37 = vand.u32 65535, %v8743_v17  ;;  %vm5567_vm13 = vcmp.ne.s32.totalorder %v8729_v2, 0  ;;  %v7402_v61 = vld [vmem:[%s7793_s27 + $0x58] sm:$0xff] }
 0x284   : > { %10147 = vst [vmem:[#allocation12_spill] sm:$0xff] %v8738_v63  ;;  %vm5615_vm14 = vcmp.lt.s32.totalorder %v8729_v2, 0  ;;  %v4257_v1 = vmul.u32 24, %v4256_v28  ;;  %v4294_v6 = vshrl.u32 %v8743_v17, 16  ;;  %v1029_v40 = vadd.f32 %v1028_v4, %v10150_v51 }
 0x285   : > { %10148 = vst [vmem:[#allocation34_spill] sm:$0xff] %v8740_v50  ;;  %v8761_v30 = vsel %vm432_vm0, %v3439_v55, %v8725_v0  ;;  %v4283_v23 = vadd.s32 %v4282_v8, %v4272_v59  ;;  %v8766_v13 = vmul.u32 43690, %v4293_v37  ;;  %v8769_v44 = vadd.s32 24, %v8729_v2  ;;  %vm8780_vm15 = vmand %vm5615_vm14, %vm5567_vm13 }
 0x286   : > { %10149 = vst [vmem:[#allocation35_spill] sm:$0xff] %v8751_v7  ;;  %v8772_v32 = vsub.s32 %v8617_v31, %v4257_v1  ;;  %v4296_v49 = vmul.u32 43691, %v4293_v37  ;;  %v4322_v24 = vand.u32 65535, %v8747_v19  ;;  %v3445_v8 = vshrl.u32 %v8676_v20, 16 }
 0x287   : > { %v1300_v18 = vpop.f32.mrf.mxu2  ;;  %v4284_v59 = vadd.s32 %v4283_v23, %v4274_v12  ;;  %v3449_v31 = vshll.u32 %v8764_v39, 16  ;;  %v8788_v37 = vmul.u32 43691, %v4294_v6  ;;  %v4300_v51 = vshll.u32 %v8766_v13, 16 }
 0x288   : > { %v1350_v4 = vadd.f32 %v1300_v18, %v1029_v40  ;;  %v1734_v28 = vpop.f32.mrf.mxu3  ;;  %vm5568_vm2 = vcmp.ne.s32.totalorder %v8772_v32, 0  ;;  %vm5616_vm3 = vcmp.lt.s32.totalorder %v8772_v32, 0  ;;  %v10154_v12 = vrot.slane %v8636_v47, 1 }
 0x289   : > { %v2570_v1 = vpop.f32.mrf.mxu1  ;;  %v8801_v50 = vadd.s32 24, %v8772_v32  ;;  %v4285_v63 = vshrl.u32 %v4284_v59, 4  ;;  %v5759_v7 = vsel %vm8780_vm15, %v8769_v44, %v8729_v2  ;;  %vm8807_vm4 = vmand %vm5616_vm3, %vm5568_vm2  ;;  %v8812_v47 = vmul.u32 43690, %v4322_v24  ;;  %v8825_v44 = vld [vmem:[%s7793_s27 + $0x64] sm:$0xff] }
 0x28a   : > { %v8791_v40 = vadd.f32 %v1734_v28, %v1350_v4  ;;  %v8798_v23 = vsel %vm1052_vm1, %v10154_v12, %v10076_v27  ;;  %v4299_v28 = vmul.u32 43690, %v4294_v6  ;;  %v10157_v59 = vsel %vm8697_vm10, %v8692_v54, %v8647_v35 }
 0x28b   : > { %v3957_v18 = vpop.f32.mrf.mxu0  ;;  %vm8820_vm5 = vcmp.lt.s32.totalorder %v10157_v59, 16  ;;  %v4286_v2 = vmul.u32 24, %v4285_v63  ;;  %v10077_v6 = vrot.slane %v8825_v44, 1  ;;  %v3447_v12 = vor.u32 %v3445_v8, %v8725_v0 }
 0x28c   : > { %10153 = vst [vmem:[#allocation14_spill] sm:$0xff] %v8791_v40  ;;  %v4323_v40 = vshrl.u32 %v8747_v19, 16  ;;  %2609 = vmatmul.bf16.gmra.mxu1 %v8683_v52  ;;  %3043 = vmatmul.bf16.gmra.mxu2 %v7402_v61  ;;  %v8829_v27 = vrot.slane %v3449_v31, 1  ;;  %v2690_v52 = vadd.f32 %v2570_v1, %v8249_v21  ;;  %v4302_v54 = vshll.u32 %v8788_v37, 16 }
 0x28d   : > { %3677 = vmatmul.bf16.gmra.mxu3 %v8712_v3  ;;  %vm4304_vm6 = vc.u32 %v4296_v49, %v4300_v51  ;;  %v8841_v0 = vsub.s32 %v8651_v48, %v4286_v2  ;;  %v4306_v21 = vadd.s32 %v4300_v51, %v4296_v49  ;;  %v4301_v3 = vshrl.u32 %v8766_v13, 16 }
 0x28e   : > { %3996 = vmatmul.bf16.gmra.mxu0 %v8719_v36  ;;  %v4305_v63 = vsel %vm4304_vm6, 1, %v10128_v22  ;;  %v4325_v8 = vmul.u32 43691, %v4322_v24  ;;  %v8845_v31 = vmul.u32 43691, %v4323_v40  ;;  %v10160_v35 = vrot.slane %v8707_v9, 1 }
 0x28f   : > { %v3004_v61 = vpop.f32.mrf.mxu2  ;;  %v4307_v36 = vadd.s32 %v4305_v63, %v4299_v28  ;;  %v8856_v48 = vsel %vm432_vm0, %v3447_v12, %v8829_v27  ;;  %v4303_v49 = vshrl.u32 %v8788_v37, 16  ;;  %v10161_v24 = vrot.slane %v8764_v39, 1 }
 0x290   : > { %v3124_v1 = vadd.f32 %v3004_v61, %v2690_v52  ;;  %v3638_v59 = vpop.f32.mrf.mxu3  ;;  %v8852_v56 = vsel %vm1052_vm1, %v10160_v35, %v10077_v6  ;;  %v10162_v51 = vrot.slane %v8676_v20, 1  ;;  %vm4308_vm7 = vc.u32 %v4306_v21, %v4302_v54 }
 0x291   : > { %v2572_v13 = vpop.f32.mrf.mxu1  ;;  %v4328_v2 = vmul.u32 43690, %v4323_v40  ;;  %v4329_v9 = vshll.u32 %v8812_v47, 16  ;;  %vm5569_vm8 = vcmp.ne.s32.totalorder %v8841_v0, 0  ;;  %v4309_v12 = vsel %vm4308_vm7, 1, %v10128_v22 }
 0x292   : > { %v8864_v28 = vsel %vm1052_vm1, %v10162_v51, %v10161_v24  ;;  %v3758_v52 = vadd.f32 %v3638_v59, %v3124_v1  ;;  %v4331_v37 = vshll.u32 %v8845_v31, 16  ;;  %vm8870_vm9 = vcmp.lt.s32.totalorder %v5759_v7, 16 }
 0x293   : > { %v3959_v35 = vpop.f32.mrf.mxu0  ;;  %vm5617_vm10 = vcmp.lt.s32.totalorder %v8841_v0, 0  ;;  %v8876_v20 = vadd.s32 24, %v8841_v0  ;;  %v4311_v40 = vadd.s32 %v4309_v12, %v4307_v36  ;;  %vm4333_vm11 = vc.u32 %v4325_v8, %v4329_v9  ;;  %v7403_v12 = vld [vmem:[%s7793_s27 + $0x60] sm:$0xff] }
 0x294   : > { %v8878_v54 = vadd.f32 %v3957_v18, %v3758_v52  ;;  %v4334_v21 = vsel %vm4333_vm11, 1, %v10128_v22  ;;  %v4335_v61 = vadd.s32 %v4329_v9, %v4325_v8  ;;  %v8882_v1 = vadd.s32 48, %v8565_v25  ;;  %vm8892_vm12 = vmand %vm5617_vm10, %vm5569_vm8  ;;  %v8897_v8 = vld [vmem:[%s7793_s27 + $0x78] sm:$0xff] }
 0x295   : > { %v4312_v7 = vadd.s32 %v4311_v40, %v4301_v3  ;;  %v4330_v59 = vshrl.u32 %v8812_v47, 16  ;;  %v4336_v24 = vadd.s32 %v4334_v21, %v4328_v2  ;;  %v8887_v51 = vadd.f32 %v8581_v11, %v8606_v43 }
 0x296   : > { %v2691_v36 = vadd.f32 %v2572_v13, %v8257_v53  ;;  %vm4337_vm13 = vc.u32 %v4335_v61, %v4331_v37  ;;  %v4351_v47 = vand.u32 65535, %v8882_v1  ;;  %v8901_v3 = vadd.s32 56, %v8565_v25 }
 0x297   : > { %10165 = vst [vmem:[#allocation36_spill] sm:$0xff] %v8887_v51  ;;  %v5950_v11 = vsel %vm8820_vm5, %v8878_v54, 0.0  ;;  %v3006_v53 = vpop.f32.mrf.mxu2  ;;  %v4313_v43 = vadd.s32 %v4312_v7, %v4303_v49  ;;  %v4338_v13 = vsel %vm4337_vm13, 1, %v10128_v22  ;;  %v4352_v2 = vshrl.u32 %v8882_v1, 16 }
 0x298   : > { %v3125_v9 = vadd.f32 %v3006_v53, %v2691_v36  ;;  %v3640_v52 = vpop.f32.mrf.mxu3  ;;  %v4332_v37 = vshrl.u32 %v8845_v31, 16  ;;  %v4340_v40 = vadd.s32 %v4338_v13, %v4336_v24  ;;  %v3453_v21 = vshrl.u32 %v8764_v39, 16 }
 0x299   : > { %v2575_v61 = vpop.f32.mrf.mxu1  ;;  %v5761_v55 = vsel %vm8892_vm12, %v8876_v20, %v8841_v0  ;;  %v4314_v49 = vshrl.u32 %v4313_v43, 4  ;;  %v3457_v7 = vshll.u32 %v8897_v8, 16  ;;  %v8917_v6 = vmul.u32 43690, %v4351_v47 }
 0x29a   : > { %v6051_v36 = vmul.f32 %v5950_v11, %v5950_v11  ;;  %v3759_v53 = vadd.f32 %v3640_v52, %v3125_v9  ;;  %v4341_v31 = vadd.s32 %v4340_v40, %v4330_v59  ;;  %v4380_v24 = vand.u32 65535, %v8901_v3  ;;  %v8934_v52 = vld [vmem:[%s7793_s27 + $0x6c] sm:$0xff] }
 0x29b   : > { %v3962_v51 = vpop.f32.mrf.mxu0  ;;  %v2692_v13 = vadd.f32 %v2575_v61, %v8261_v38  ;;  %v10168_v18 = vsel %vm8807_vm4, %v8801_v50, %v8772_v32  ;;  %v4315_v20 = vmul.u32 24, %v4314_v49  ;;  %v4354_v43 = vmul.u32 43691, %v4351_v47 }
 0x29c   : > { %vm8926_vm14 = vcmp.lt.s32.totalorder %v10168_v18, 16  ;;  %v8930_v5 = vmul.u32 43691, %v4352_v2  ;;  %v4078_v9 = vadd.f32 %v3959_v35, %v3759_v53  ;;  %2614 = vmatmul.bf16.gmra.mxu1 %v8736_v60  ;;  %3048 = vmatmul.bf16.gmra.mxu2 %v7403_v12  ;;  %v4342_v59 = vadd.s32 %v4341_v31, %v4332_v37 }
 0x29d   : > { %v2463_v38 = vrot.slane %v8934_v52, 1  ;;  %v3455_v4 = vor.u32 %v3453_v21, %v8829_v27  ;;  %3682 = vmatmul.bf16.gmra.mxu3 %v8761_v30  ;;  %v8946_v60 = vsub.s32 %v8743_v17, %v4315_v20  ;;  %v8948_v50 = vrot.slane %v3457_v7, 1  ;;  %v9010_v7 = vld [vmem:[%s7793_s27 + $0x80] sm:$0xff] }
 0x29e   : > { %4001 = vmatmul.bf16.gmra.mxu0 %v8798_v23  ;;  %v4357_v32 = vmul.u32 43690, %v4352_v2  ;;  %v4358_v35 = vshll.u32 %v8917_v6, 16  ;;  %v5951_v27 = vsel %vm8870_vm9, %v4078_v9, 0.0  ;;  %v7476_v47 = vpack.c.bf16 %v4078_v9, %v8878_v54 }
 0x29f   : > { %v4343_v12 = vshrl.u32 %v4342_v59, 4  ;;  %v3850_v37 = vrot.slane %v8897_v8, 1  ;;  %v5998_v40 = vadd.f32 %v5951_v27, %v5950_v11  ;;  %v6052_v30 = vmul.f32 %v5951_v27, %v5951_v27  ;;  %v3009_v21 = vpop.f32.mrf.mxu2 }
 0x2a0   : > { %vm5570_vm15 = vcmp.ne.s32.totalorder %v8946_v60, 0  ;;  %vm5618_vm2 = vcmp.lt.s32.totalorder %v8946_v60, 0  ;;  %7477 = vst [vmem:[%s8941_s8] sm:$0xff] %v7476_v47   ;;  %v3126_v17 = vadd.f32 %v3009_v21, %v2692_v13  ;;  %v3643_v23 = vpop.f32.mrf.mxu3  ;;  %v5714_v2 = vadd.s32 24, %v8946_v60 }
 0x2a1   : > { %v4344_v61 = vmul.u32 24, %v4343_v12  ;;  %v4360_v63 = vshll.u32 %v8930_v5, 16  ;;  %v6099_v49 = vadd.f32 %v6052_v30, %v6051_v36  ;;  %v2577_v54 = vpop.f32.mrf.mxu1  ;;  %vm8960_vm3 = vmand %vm5618_vm2, %vm5570_vm15  ;;  %v10173_v11 = vrot.slane %v8825_v44, 1 }
 0x2a2   : > { %vm4362_vm4 = vc.u32 %v4354_v43, %v4358_v35  ;;  %v4364_v31 = vadd.s32 %v4358_v35, %v4354_v43  ;;  %v3760_v13 = vadd.f32 %v3643_v23, %v3126_v17  ;;  %v8976_v36 = vsel %vm432_vm0, %v3455_v4, %v8948_v50 }
 0x2a3   : > { %v8969_v53 = vsel %vm1052_vm1, %v10173_v11, %v2463_v38  ;;  %v3964_v18 = vpop.f32.mrf.mxu0  ;;  %v8972_v20 = vsub.s32 %v8747_v19, %v4344_v61  ;;  %v4359_v9 = vshrl.u32 %v8917_v6, 16  ;;  %vm8979_vm5 = vcmp.lt.s32.totalorder %v5761_v55, 16  ;;  %v7404_v61 = vld [vmem:[%s7793_s27 + $0x68] sm:$0xff] }
 0x2a4   : > { %v10176_v44 = vrot.slane %v8764_v39, 1  ;;  %v4363_v19 = vsel %vm4362_vm4, 1, %v10128_v22  ;;  %vm4366_vm6 = vc.u32 %v4364_v31, %v4360_v63  ;;  %v4381_v35 = vshrl.u32 %v8901_v3, 16 }
 0x2a5   : > { %v4079_v4 = vadd.f32 %v3962_v51, %v3760_v13  ;;  %v2693_v27 = vadd.f32 %v2577_v54, %v8269_v57  ;;  %v5762_v6 = vsel %vm8960_vm3, %v5714_v2, %v8946_v60  ;;  %v4361_v55 = vshrl.u32 %v8930_v5, 16 }
 0x2a6   : > { %v8988_v43 = vsel %vm1052_vm1, %v10176_v44, %v3850_v37  ;;  %vm5571_vm7 = vcmp.ne.s32.totalorder %v8972_v20, 0  ;;  %v4365_v39 = vadd.s32 %v4363_v19, %v4357_v32  ;;  %v4367_v47 = vsel %vm4366_vm6, 1, %v10128_v22 }
 0x2a7   : > { %v4384_v12 = vmul.u32 43690, %v4380_v24  ;;  %v5952_v30 = vsel %vm8926_vm14, %v4079_v4, 0.0  ;;  %vm5619_vm8 = vcmp.lt.s32.totalorder %v8972_v20, 0  ;;  %v4383_v57 = vmul.u32 43691, %v4380_v24  ;;  %v3011_v17 = vpop.f32.mrf.mxu2 }
 0x2a8   : > { %v9002_v51 = vmul.u32 43691, %v4381_v35  ;;  %v5999_v21 = vadd.f32 %v5998_v40, %v5952_v30  ;;  %v6053_v60 = vmul.f32 %v5952_v30, %v5952_v30  ;;  %v9005_v5 = vadd.s32 24, %v8972_v20  ;;  %v3645_v2 = vpop.f32.mrf.mxu3  ;;  %vm9029_vm11 = vmand %vm5619_vm8, %vm5571_vm7 }
 0x2a9   : > { %v4369_v23 = vadd.s32 %v4367_v47, %v4365_v39  ;;  %v3127_v32 = vadd.f32 %v3011_v17, %v2693_v27  ;;  %v4386_v63 = vmul.u32 43690, %v4381_v35  ;;  %v4387_v54 = vshll.u32 %v4384_v12, 16  ;;  %v2580_v11 = vpop.f32.mrf.mxu1 }
 0x2aa   : > { %v4389_v0 = vshll.u32 %v9002_v51, 16  ;;  %v6100_v24 = vadd.f32 %v6099_v49, %v6053_v60  ;;  %v4388_v40 = vshrl.u32 %v4384_v12, 16  ;;  %v3461_v13 = vshrl.u32 %v8897_v8, 16  ;;  %v9021_v60 = vld [vmem:[%s7793_s27 + $0x74] sm:$0xff] }
 0x2ab   : > { %v4370_v31 = vadd.s32 %v4369_v23, %v4359_v9  ;;  %v3761_v44 = vadd.f32 %v3645_v2, %v3127_v32  ;;  %v3967_v19 = vpop.f32.mrf.mxu0  ;;  %v4390_v39 = vshrl.u32 %v9002_v51, 16  ;;  %vm4391_vm9 = vc.u32 %v4383_v57, %v4387_v54 }
 0x2ac   : > { %v4393_v27 = vadd.s32 %v4387_v54, %v4383_v57  ;;  %v2694_v35 = vadd.f32 %v2580_v11, %v8285_v41  ;;  %vm9015_vm10 = vcmp.lt.s32.totalorder %v5762_v6, 16  ;;  %v4392_v49 = vsel %vm4391_vm9, 1, %v10128_v22  ;;  %2619 = vmatmul.bf16.gmra.mxu1 %v8852_v56  ;;  %3053 = vmatmul.bf16.gmra.mxu2 %v7404_v61 }
 0x2ad   : > { %v4371_v30 = vadd.s32 %v4370_v31, %v4361_v55  ;;  %v2465_v9 = vrot.slane %v9021_v60, 1  ;;  %v4080_v12 = vadd.f32 %v3964_v18, %v3761_v44  ;;  %v4394_v6 = vadd.s32 %v4392_v49, %v4386_v63  ;;  %3687 = vmatmul.bf16.gmra.mxu3 %v8856_v48 }
 0x2ae   : > { %vm4395_vm12 = vc.u32 %v4393_v27, %v4389_v0  ;;  %v3465_v55 = vshll.u32 %v9010_v7, 16  ;;  %4006 = vmatmul.bf16.gmra.mxu0 %v8864_v28  ;;  %v3463_v57 = vor.u32 %v3461_v13, %v8948_v50  ;;  %v3852_v51 = vrot.slane %v9010_v7, 1 }
 0x2af   : > { %v4372_v18 = vshrl.u32 %v4371_v30, 4  ;;  %v4396_v56 = vsel %vm4395_vm12, 1, %v10128_v22  ;;  %v5953_v17 = vsel %vm8979_vm5, %v4080_v12, 0.0  ;;  %v7481_v23 = vpack.c.bf16 %v4080_v12, %v4079_v4  ;;  %v3014_v54 = vpop.f32.mrf.mxu2 }
 0x2b0   : > { %v4398_v32 = vadd.s32 %v4396_v56, %v4394_v6  ;;  %v9041_v2 = vrot.slane %v3465_v55, 1  ;;  %v6000_v61 = vadd.f32 %v5999_v21, %v5953_v17  ;;  %v6054_v63 = vmul.f32 %v5953_v17, %v5953_v17  ;;  %v3648_v0 = vpop.f32.mrf.mxu3 }
 0x2b1   : > { %v5763_v48 = vsel %vm9029_vm11, %v9005_v5, %v8972_v20  ;;  %v4373_v28 = vmul.u32 24, %v4372_v18  ;;  %7600 = vst [vmem:[%s8941_s8 + $0x8] sm:$0xff] %v7481_v23   ;;  %v3128_v50 = vadd.f32 %v3014_v54, %v2694_v35  ;;  %v9053_v59 = vsel %vm1052_vm1, %v2463_v38, %v2465_v9  ;;  %v2582_v31 = vpop.f32.mrf.mxu1 }
 0x2b2   : > { %v4399_v11 = vadd.s32 %v4398_v32, %v4388_v40  ;;  %v9056_v4 = vadd.s32 64, %v8565_v25  ;;  %v6101_v21 = vadd.f32 %v6100_v24, %v6054_v63  ;;  %v9061_v20 = vsel %vm432_vm0, %v3463_v57, %v9041_v2 }
 0x2b3   : > { %v4374_v13 = vsub.s32 %v8882_v1, %v4373_v28  ;;  %v9068_v52 = vsel %vm1052_vm1, %v3850_v37, %v3852_v51  ;;  %v3762_v38 = vadd.f32 %v3648_v0, %v3128_v50  ;;  %v3969_v5 = vpop.f32.mrf.mxu0  ;;  %v9072_v24 = vadd.s32 72, %v8565_v25  ;;  %v7405_v28 = vld [vmem:[%s7793_s27 + $0x70] sm:$0xff] }
 0x2b4   : > { %v4400_v40 = vadd.s32 %v4399_v11, %v4390_v39  ;;  %v4409_v44 = vand.u32 65535, %v9056_v4  ;;  %vm9074_vm13 = vcmp.lt.s32.totalorder %v5763_v48, 16  ;;  %v4410_v8 = vshrl.u32 %v9056_v4, 16 }
 0x2b5   : > { %vm5572_vm14 = vcmp.ne.s32.totalorder %v4374_v13, 0  ;;  %vm5620_vm15 = vcmp.lt.s32.totalorder %v4374_v13, 0  ;;  %v5716_v27 = vadd.s32 24, %v4374_v13  ;;  %v9079_v35 = vadd.f32 %v3967_v19, %v3762_v38 }
 0x2b6   : > { %vm9081_vm2 = vmand %vm5620_vm15, %vm5572_vm14  ;;  %v4401_v39 = vshrl.u32 %v4400_v40, 4  ;;  %v4412_v30 = vmul.u32 43691, %v4409_v44  ;;  %v4413_v49 = vmul.u32 43690, %v4409_v44  ;;  %v2695_v12 = vadd.f32 %v2582_v31, %v8293_v16 }
 0x2b7   : > { %v5764_v41 = vsel %vm9081_vm2, %v5716_v27, %v4374_v13  ;;  %v9088_v6 = vmul.u32 43691, %v4410_v8  ;;  %v9091_v55 = vadd.s32 80, %v8565_v25  ;;  %v5954_v19 = vsel %vm9015_vm10, %v9079_v35, 0.0  ;;  %v3016_v32 = vpop.f32.mrf.mxu2  ;;  %v7406_v27 = vld [vmem:[%s7793_s27 + $0x78] sm:$0xff] }
 0x2b8   : > { %v4402_v18 = vmul.u32 24, %v4401_v39  ;;  %v4415_v56 = vmul.u32 43690, %v4410_v8  ;;  %v4416_v57 = vshll.u32 %v4413_v49, 16  ;;  %v6001_v17 = vadd.f32 %v6000_v61, %v5954_v19  ;;  %v3650_v48 = vpop.f32.mrf.mxu3 }
 0x2b9   : > { %v6055_v23 = vmul.f32 %v5954_v19, %v5954_v19  ;;  %v4418_v16 = vshll.u32 %v9088_v6, 16  ;;  %v4438_v63 = vand.u32 65535, %v9072_v24  ;;  %v3129_v54 = vadd.f32 %v3016_v32, %v2695_v12  ;;  %v2585_v47 = vpop.f32.mrf.mxu1 }
 0x2ba   : > { %v4403_v50 = vsub.s32 %v8901_v3, %v4402_v18  ;;  %v4417_v0 = vshrl.u32 %v4413_v49, 16  ;;  %vm4420_vm3 = vc.u32 %v4412_v30, %v4416_v57  ;;  %v4422_v13 = vadd.s32 %v4416_v57, %v4412_v30  ;;  %v9124_v57 = vld [vmem:[%s7793_s27 + $0x7c] sm:$0xff] }
 0x2bb   : > { %v6102_v11 = vadd.f32 %v6101_v21, %v6055_v23  ;;  %v4421_v31 = vsel %vm4420_vm3, 1, %v10128_v22  ;;  %v4439_v61 = vshrl.u32 %v9072_v24, 16  ;;  %v3763_v38 = vadd.f32 %v3650_v48, %v3129_v54  ;;  %v3972_v40 = vpop.f32.mrf.mxu0 }
 0x2bc   : > { %vm5573_vm4 = vcmp.ne.s32.totalorder %v4403_v50, 0  ;;  %vm5621_vm5 = vcmp.lt.s32.totalorder %v4403_v50, 0  ;;  %v4419_v44 = vshrl.u32 %v9088_v6, 16  ;;  %vm9103_vm6 = vcmp.lt.s32.totalorder %v5764_v41, 16  ;;  %2624 = vmatmul.bf16.gmra.mxu1 %v8969_v53  ;;  %3058 = vmatmul.bf16.gmra.mxu2 %v7405_v28 }
 0x2bd   : > { %vm9107_vm7 = vmand %vm5621_vm5, %vm5573_vm4  ;;  %v5717_v21 = vadd.s32 24, %v4403_v50  ;;  %v4423_v8 = vadd.s32 %v4421_v31, %v4415_v56  ;;  %vm4424_vm8 = vc.u32 %v4422_v13, %v4418_v16  ;;  %v4441_v37 = vmul.u32 43691, %v4438_v63  ;;  %3692 = vmatmul.bf16.gmra.mxu3 %v8976_v36 }
 0x2be   : > { %v4082_v39 = vadd.f32 %v3969_v5, %v3763_v38  ;;  %v4425_v30 = vsel %vm4424_vm8, 1, %v10128_v22  ;;  %v4442_v49 = vmul.u32 43690, %v4438_v63  ;;  %v9113_v12 = vmul.u32 43691, %v4439_v61  ;;  %4011 = vmatmul.bf16.gmra.mxu0 %v8988_v43  ;;  %v9128_v63 = vld [vmem:[%s7793_s27 + $0x88] sm:$0xff] }
 0x2bf   : > { %v2696_v41 = vadd.f32 %v2585_v47, %v8297_v14  ;;  %v5765_v6 = vsel %vm9107_vm7, %v5717_v21, %v4403_v50  ;;  %v4427_v5 = vadd.s32 %v4425_v30, %v4423_v8  ;;  %v4444_v19 = vmul.u32 43690, %v4439_v61  ;;  %v3019_v32 = vpop.f32.mrf.mxu2 }
 0x2c0   : > { %v5955_v53 = vsel %vm9074_vm13, %v4082_v39, 0.0  ;;  %v7486_v18 = vpack.c.bf16 %v4082_v39, %v9079_v35  ;;  %v4445_v56 = vshll.u32 %v4442_v49, 16  ;;  %v2467_v14 = vrot.slane %v9124_v57, 1  ;;  %v3653_v48 = vpop.f32.mrf.mxu3 }
 0x2c1   : > { %v6002_v23 = vadd.f32 %v6001_v17, %v5955_v53  ;;  %v6056_v36 = vmul.f32 %v5955_v53, %v5955_v53  ;;  %v4428_v16 = vadd.s32 %v4427_v5, %v4417_v0  ;;  %v4446_v43 = vshrl.u32 %v4442_v49, 16  ;;  %v2587_v50 = vpop.f32.mrf.mxu1 }
 0x2c2   : > { %7601 = vst [vmem:[%s8941_s8 + $0x10] sm:$0xff] %v7486_v18   ;;  %v3130_v54 = vadd.f32 %v3019_v32, %v2696_v41  ;;  %v4447_v1 = vshll.u32 %v9113_v12, 16  ;;  %v4448_v28 = vshrl.u32 %v9113_v12, 16  ;;  %vm4449_vm9 = vc.u32 %v4441_v37, %v4445_v56 }
 0x2c3   : > { %v6103_v35 = vadd.f32 %v6102_v11, %v6056_v36  ;;  %v4429_v47 = vadd.s32 %v4428_v16, %v4419_v44  ;;  %v4450_v31 = vsel %vm4449_vm9, 1, %v10128_v22  ;;  %v4451_v17 = vadd.s32 %v4445_v56, %v4441_v37  ;;  %v3974_v61 = vpop.f32.mrf.mxu0 }
 0x2c4   : > { %v3764_v13 = vadd.f32 %v3653_v48, %v3130_v54  ;;  %v2697_v0 = vadd.f32 %v2587_v50, %v8304_v10  ;;  %v4452_v38 = vadd.s32 %v4450_v31, %v4444_v19  ;;  %v9140_v3 = vsel %vm1052_vm1, %v2465_v9, %v2467_v14 }
 0x2c5   : > { %vm9142_vm10 = vcmp.lt.s32.totalorder %v5765_v6, 16  ;;  %v4430_v11 = vshrl.u32 %v4429_v47, 4  ;;  %vm4453_vm11 = vc.u32 %v4451_v17, %v4447_v1  ;;  %v3469_v44 = vshrl.u32 %v9010_v7, 16 }
 0x2c6   : > { %v3473_v8 = vshll.u32 %v9128_v63, 16  ;;  %v4083_v10 = vadd.f32 %v3972_v40, %v3764_v13  ;;  %v4454_v37 = vsel %vm4453_vm11, 1, %v10128_v22  ;;  %v3854_v39 = vrot.slane %v9128_v63, 1 }
 0x2c7   : > { %v4467_v60 = vand.u32 65535, %v9091_v55  ;;  %v4431_v9 = vmul.u32 24, %v4430_v11  ;;  %v4456_v30 = vadd.s32 %v4454_v37, %v4452_v38  ;;  %v3471_v49 = vor.u32 %v3469_v44, %v9041_v2  ;;  %v3021_v18 = vpop.f32.mrf.mxu2 }
 0x2c8   : > { %v9152_v12 = vrot.slane %v3473_v8, 1  ;;  %v5956_v41 = vsel %vm9103_vm6, %v4083_v10, 0.0  ;;  %v9161_v40 = vsel %vm1052_vm1, %v3852_v51, %v3854_v39  ;;  %v4468_v6 = vshrl.u32 %v9091_v55, 16  ;;  %v3655_v32 = vpop.f32.mrf.mxu3 }
 0x2c9   : > { %v4470_v5 = vmul.u32 43691, %v4467_v60  ;;  %v6003_v19 = vadd.f32 %v6002_v23, %v5956_v41  ;;  %v6057_v53 = vmul.f32 %v5956_v41, %v5956_v41  ;;  %v4432_v2 = vsub.s32 %v9056_v4, %v4431_v9  ;;  %v2590_v48 = vpop.f32.mrf.mxu1 }
 0x2ca   : > { %v4457_v56 = vadd.s32 %v4456_v30, %v4446_v43  ;;  %v3131_v36 = vadd.f32 %v3021_v18, %v2697_v0  ;;  %v9168_v16 = vsel %vm432_vm0, %v3471_v49, %v9152_v12  ;;  %v4471_v7 = vmul.u32 43690, %v4467_v60 }
 0x2cb   : > { %v9170_v54 = vmul.u32 43691, %v4468_v6  ;;  %v6104_v51 = vadd.f32 %v6103_v35, %v6057_v53  ;;  %vm5574_vm12 = vcmp.ne.s32.totalorder %v4432_v2, 0  ;;  %vm5622_vm13 = vcmp.lt.s32.totalorder %v4432_v2, 0  ;;  %v3977_v4 = vpop.f32.mrf.mxu0 }
 0x2cc   : > { %v5718_v23 = vadd.s32 24, %v4432_v2  ;;  %v3765_v1 = vadd.f32 %v3655_v32, %v3131_v36  ;;  %v2698_v50 = vadd.f32 %v2590_v48, %v8308_v45  ;;  %vm5670_vm14 = vmand %vm5622_vm13, %vm5574_vm12  ;;  %v4458_v43 = vadd.s32 %v4457_v56, %v4448_v28  ;;  %2629 = vmatmul.bf16.gmra.mxu1 %v9053_v59  ;;  %3063 = vmatmul.bf16.gmra.mxu2 %v7406_v27 }
 0x2cd   : > { %v4473_v47 = vmul.u32 43690, %v4468_v6  ;;  %v4474_v17 = vshll.u32 %v4471_v7, 16  ;;  %v4475_v13 = vshrl.u32 %v4471_v7, 16  ;;  %v4476_v0 = vshll.u32 %v9170_v54, 16  ;;  %3697 = vmatmul.bf16.gmra.mxu3 %v9061_v20 }
 0x2ce   : > { %v5766_v31 = vsel %vm5670_vm14, %v5718_v23, %v4432_v2  ;;  %v4084_v38 = vadd.f32 %v3974_v61, %v3765_v1  ;;  %v4459_v11 = vshrl.u32 %v4458_v43, 4  ;;  %v4477_v45 = vshrl.u32 %v9170_v54, 16  ;;  %4016 = vmatmul.bf16.gmra.mxu0 %v9068_v52  ;;  %v9186_v61 = vld [vmem:[%s7793_s27 + $0x84] sm:$0xff] }
 0x2cf   : > { %vm9175_vm15 = vcmp.lt.s32.totalorder %v5766_v31, 16  ;;  %vm4478_vm2 = vc.u32 %v4470_v5, %v4474_v17  ;;  %v4480_v28 = vadd.s32 %v4474_v17, %v4470_v5  ;;  %v9183_v44 = vadd.s32 88, %v8565_v25  ;;  %v3024_v49 = vpop.f32.mrf.mxu2 }
 0x2d0   : > { %v2469_v59 = vrot.slane %v9186_v61, 1  ;;  %v5957_v8 = vsel %vm9142_vm10, %v4084_v38, 0.0  ;;  %v7491_v37 = vpack.c.bf16 %v4084_v38, %v4083_v10  ;;  %v4460_v60 = vmul.u32 24, %v4459_v11  ;;  %v3658_v6 = vpop.f32.mrf.mxu3 }
 0x2d1   : > { %v4479_v9 = vsel %vm4478_vm2, 1, %v10128_v22  ;;  %v6004_v20 = vadd.f32 %v6003_v19, %v5957_v8  ;;  %v6058_v30 = vmul.f32 %v5957_v8, %v5957_v8  ;;  %vm4482_vm3 = vc.u32 %v4480_v28, %v4476_v0  ;;  %v2592_v2 = vpop.f32.mrf.mxu1 }
 0x2d2   : > { %v4481_v52 = vadd.s32 %v4479_v9, %v4473_v47  ;;  %7602 = vst [vmem:[%s8941_s8 + $0x18] sm:$0xff] %v7491_v37   ;;  %v3132_v41 = vadd.f32 %v3024_v49, %v2698_v50  ;;  %v4461_v5 = vsub.s32 %v9072_v24, %v4460_v60  ;;  %v4483_v53 = vsel %vm4482_vm3, 1, %v10128_v22  ;;  %v9209_v47 = vld [vmem:[%s7793_s27 + $0x90] sm:$0xff]  ;;  %v7407_v37 = vld [vmem:[%s7793_s27 + $0x80] sm:$0xff] }
 0x2d3   : > { %v4496_v18 = vand.u32 65535, %v9183_v44  ;;  %v6105_v21 = vadd.f32 %v6104_v51, %v6058_v30  ;;  %v4497_v56 = vshrl.u32 %v9183_v44, 16  ;;  %v9202_v19 = vsel %vm1052_vm1, %v2467_v14, %v2469_v59  ;;  %v3979_v24 = vpop.f32.mrf.mxu0 }
 0x2d4   : > { %v4485_v10 = vadd.s32 %v4483_v53, %v4481_v52  ;;  %v3766_v36 = vadd.f32 %v3658_v6, %v3132_v41  ;;  %v2699_v32 = vadd.f32 %v2592_v2, %v8315_v15  ;;  %vm5575_vm4 = vcmp.ne.s32.totalorder %v4461_v5, 0 }
 0x2d5   : > { %vm5623_vm5 = vcmp.lt.s32.totalorder %v4461_v5, 0  ;;  %v5719_v27 = vadd.s32 24, %v4461_v5  ;;  %v4499_v54 = vmul.u32 43691, %v4496_v18  ;;  %v4500_v51 = vmul.u32 43690, %v4496_v18 }
 0x2d6   : > { %vm5671_vm6 = vmand %vm5623_vm5, %vm5575_vm4  ;;  %v4486_v7 = vadd.s32 %v4485_v10, %v4475_v13  ;;  %v4085_v48 = vadd.f32 %v3977_v4, %v3766_v36  ;;  %v9205_v23 = vmul.u32 43691, %v4497_v56  ;;  %v4502_v1 = vmul.u32 43690, %v4497_v56 }
 0x2d7   : > { %v3477_v57 = vshrl.u32 %v9128_v63, 16  ;;  %v5767_v14 = vsel %vm5671_vm6, %v5719_v27, %v4461_v5  ;;  %v4503_v43 = vshll.u32 %v4500_v51, 16  ;;  %v4504_v15 = vshrl.u32 %v4500_v51, 16  ;;  %v3026_v11 = vpop.f32.mrf.mxu2 }
 0x2d8   : > { %v4487_v50 = vadd.s32 %v4486_v7, %v4477_v45  ;;  %v5958_v31 = vsel %vm9175_vm15, %v4085_v48, 0.0  ;;  %vm9213_vm7 = vcmp.lt.s32.totalorder %v5767_v14, 16  ;;  %v4505_v4 = vshll.u32 %v9205_v23, 16  ;;  %v3660_v8 = vpop.f32.mrf.mxu3 }
 0x2d9   : > { %v4506_v13 = vshrl.u32 %v9205_v23, 16  ;;  %v6005_v0 = vadd.f32 %v6004_v20, %v5958_v31  ;;  %v6059_v38 = vmul.f32 %v5958_v31, %v5958_v31  ;;  %vm4507_vm8 = vc.u32 %v4499_v54, %v4503_v43  ;;  %v2595_v49 = vpop.f32.mrf.mxu1 }
 0x2da   : > { %v4488_v28 = vshrl.u32 %v4487_v50, 4  ;;  %v3133_v45 = vadd.f32 %v3026_v11, %v2699_v32  ;;  %v4508_v60 = vsel %vm4507_vm8, 1, %v10128_v22  ;;  %v4509_v35 = vadd.s32 %v4503_v43, %v4499_v54 }
 0x2db   : > { %v3479_v9 = vor.u32 %v3477_v57, %v9152_v12  ;;  %v6106_v30 = vadd.f32 %v6105_v21, %v6059_v38  ;;  %v4510_v41 = vadd.s32 %v4508_v60, %v4502_v1  ;;  %v3481_v6 = vshll.u32 %v9209_v47, 16  ;;  %v3982_v53 = vpop.f32.mrf.mxu0 }
 0x2dc   : > { %v4489_v52 = vmul.u32 24, %v4488_v28  ;;  %v3767_v5 = vadd.f32 %v3660_v8, %v3133_v45  ;;  %v2700_v20 = vadd.f32 %v2595_v49, %v8331_v58  ;;  %vm4511_vm9 = vc.u32 %v4509_v35, %v4505_v4  ;;  %2634 = vmatmul.bf16.gmra.mxu1 %v9140_v3  ;;  %3068 = vmatmul.bf16.gmra.mxu2 %v7407_v37 }
 0x2dd   : > { %v3856_v18 = vrot.slane %v9209_v47, 1  ;;  %v4512_v10 = vsel %vm4511_vm9, 1, %v10128_v22  ;;  %v9227_v56 = vrot.slane %v3481_v6, 1  ;;  %v9230_v12 = vadd.s32 96, %v8565_v25  ;;  %3702 = vmatmul.bf16.gmra.mxu3 %v9168_v16 }
 0x2de   : > { %v4490_v2 = vsub.s32 %v9091_v55, %v4489_v52  ;;  %v4086_v21 = vadd.f32 %v3979_v24, %v3767_v5  ;;  %v4514_v36 = vadd.s32 %v4512_v10, %v4510_v41  ;;  %v9241_v55 = vadd.s32 104, %v8565_v25  ;;  %4021 = vmatmul.bf16.gmra.mxu0 %v9161_v40 }
 0x2df   : > { %v9238_v58 = vsel %vm1052_vm1, %v3854_v39, %v3856_v18  ;;  %v9247_v32 = vsel %vm432_vm0, %v3479_v9, %v9227_v56  ;;  %v4525_v27 = vand.u32 65535, %v9230_v12  ;;  %v3029_v54 = vpop.f32.mrf.mxu2  ;;  %v4526_v40 = vshrl.u32 %v9230_v12, 16 }
 0x2e0   : > { %vm5576_vm10 = vcmp.ne.s32.totalorder %v4490_v2, 0  ;;  %vm5624_vm11 = vcmp.lt.s32.totalorder %v4490_v2, 0  ;;  %v5720_v3 = vadd.s32 24, %v4490_v2  ;;  %v5959_v63 = vsel %vm9213_vm7, %v4086_v21, 0.0  ;;  %v3663_v1 = vpop.f32.mrf.mxu3 }
 0x2e1   : > { %v7496_v39 = vpack.c.bf16 %v4086_v21, %v4085_v48  ;;  %vm5672_vm12 = vmand %vm5624_vm11, %vm5576_vm10  ;;  %v4515_v24 = vadd.s32 %v4514_v36, %v4504_v15  ;;  %v6006_v7 = vadd.f32 %v6005_v0, %v5959_v63  ;;  %v6060_v16 = vmul.f32 %v5959_v63, %v5959_v63  ;;  %v2597_v43 = vpop.f32.mrf.mxu1 }
 0x2e2   : > { %v5768_v51 = vsel %vm5672_vm12, %v5720_v3, %v4490_v2  ;;  %v3134_v23 = vadd.f32 %v3029_v54, %v2700_v20  ;;  %v4528_v50 = vmul.u32 43691, %v4525_v27  ;;  %v4529_v15 = vmul.u32 43690, %v4525_v27 }
 0x2e3   : > { %7603 = vst [vmem:[%s8941_s8 + $0x20] sm:$0xff] %v7496_v39   ;;  %vm9254_vm13 = vcmp.lt.s32.totalorder %v5768_v51, 16  ;;  %v4516_v14 = vadd.s32 %v4515_v24, %v4506_v13  ;;  %v6107_v48 = vadd.f32 %v6106_v30, %v6060_v16  ;;  %v9258_v31 = vmul.u32 43691, %v4526_v40  ;;  %v3984_v38 = vpop.f32.mrf.mxu0  ;;  %v7408_v24 = vld [vmem:[%s7793_s27 + $0x88] sm:$0xff] }
 0x2e4   : > { %v4531_v17 = vmul.u32 43690, %v4526_v40  ;;  %v3768_v4 = vadd.f32 %v3663_v1, %v3134_v23  ;;  %v2701_v0 = vadd.f32 %v2597_v43, %v8338_v26  ;;  %v4554_v28 = vand.u32 65535, %v9241_v55  ;;  %v9268_v26 = vld [vmem:[%s7793_s27 + $0x8c] sm:$0xff] }
 0x2e5   : > { %v4517_v11 = vshrl.u32 %v4516_v14, 4  ;;  %v4532_v45 = vshll.u32 %v4529_v15, 16  ;;  %v4533_v8 = vshrl.u32 %v4529_v15, 16  ;;  %v4534_v37 = vshll.u32 %v9258_v31, 16 }
 0x2e6   : > { %v4535_v13 = vshrl.u32 %v9258_v31, 16  ;;  %v4087_v60 = vadd.f32 %v3982_v53, %v3768_v4  ;;  %v4555_v9 = vshrl.u32 %v9241_v55, 16  ;;  %v4557_v30 = vmul.u32 43691, %v4554_v28 }
 0x2e7   : > { %v4518_v35 = vmul.u32 24, %v4517_v11  ;;  %vm4536_vm14 = vc.u32 %v4528_v50, %v4532_v45  ;;  %v4538_v49 = vadd.s32 %v4532_v45, %v4528_v50  ;;  %v9265_v52 = vmul.u32 43690, %v4554_v28  ;;  %v3031_v21 = vpop.f32.mrf.mxu2 }
 0x2e8   : > { %v2471_v41 = vrot.slane %v9268_v26, 1  ;;  %v5960_v6 = vsel %vm9254_vm13, %v4087_v60, 0.0  ;;  %v4537_v20 = vsel %vm4536_vm14, 1, %v10128_v22  ;;  %v9275_v53 = vmul.u32 43691, %v4555_v9  ;;  %v3665_v63 = vpop.f32.mrf.mxu3 }
 0x2e9   : > { %v4519_v5 = vsub.s32 %v9183_v44, %v4518_v35  ;;  %v6007_v2 = vadd.f32 %v6006_v7, %v5960_v6  ;;  %v6061_v10 = vmul.f32 %v5960_v6, %v5960_v6  ;;  %v4539_v36 = vadd.s32 %v4537_v20, %v4531_v17  ;;  %v2600_v16 = vpop.f32.mrf.mxu1  ;;  %v9281_v7 = vld [vmem:[%s7793_s27 + $0x98] sm:$0xff] }
 0x2ea   : > { %vm4540_vm15 = vc.u32 %v4538_v49, %v4534_v37  ;;  %v3135_v3 = vadd.f32 %v3031_v21, %v2701_v0  ;;  %v4560_v54 = vmul.u32 43690, %v4555_v9  ;;  %v4561_v51 = vshll.u32 %v9265_v52, 16 }
 0x2eb   : > { %vm5577_vm2 = vcmp.ne.s32.totalorder %v4519_v5, 0  ;;  %vm5625_vm3 = vcmp.lt.s32.totalorder %v4519_v5, 0  ;;  %v5721_v39 = vadd.s32 24, %v4519_v5  ;;  %v6108_v27 = vadd.f32 %v6107_v48, %v6061_v10  ;;  %v3987_v57 = vpop.f32.mrf.mxu0 }
 0x2ec   : > { %vm5673_vm4 = vmand %vm5625_vm3, %vm5577_vm2  ;;  %v4541_v44 = vsel %vm4540_vm15, 1, %v10128_v22  ;;  %v3769_v40 = vadd.f32 %v3665_v63, %v3135_v3  ;;  %v2702_v1 = vadd.f32 %v2600_v16, %v8342_v62  ;;  %v4562_v48 = vshrl.u32 %v9265_v52, 16  ;;  %2639 = vmatmul.bf16.gmra.mxu1 %v9202_v19  ;;  %3073 = vmatmul.bf16.gmra.mxu2 %v7408_v24 }
 0x2ed   : > { %v5769_v23 = vsel %vm5673_vm4, %v5721_v39, %v4519_v5  ;;  %v4543_v14 = vadd.s32 %v4541_v44, %v4539_v36  ;;  %v4563_v43 = vshll.u32 %v9275_v53, 16  ;;  %v4564_v15 = vshrl.u32 %v9275_v53, 16  ;;  %3707 = vmatmul.bf16.gmra.mxu3 %v9247_v32 }
 0x2ee   : > { %vm9284_vm5 = vcmp.lt.s32.totalorder %v5769_v23, 16  ;;  %v4088_v31 = vadd.f32 %v3984_v38, %v3769_v40  ;;  %vm4565_vm6 = vc.u32 %v4557_v30, %v4561_v51  ;;  %v3485_v62 = vshrl.u32 %v9209_v47, 16  ;;  %4026 = vmatmul.bf16.gmra.mxu0 %v9238_v58 }
 0x2ef   : > { %v4544_v17 = vadd.s32 %v4543_v14, %v4533_v8  ;;  %v4566_v4 = vsel %vm4565_vm6, 1, %v10128_v22  ;;  %v4567_v0 = vadd.s32 %v4561_v51, %v4557_v30  ;;  %v9301_v38 = vsel %vm1052_vm1, %v2469_v59, %v2471_v41  ;;  %v3034_v37 = vpop.f32.mrf.mxu2 }
 0x2f0   : > { %v3489_v19 = vshll.u32 %v9281_v7, 16  ;;  %v5961_v11 = vsel %vm9284_vm5, %v4088_v31, 0.0  ;;  %v7501_v28 = vpack.c.bf16 %v4088_v31, %v4087_v60  ;;  %v4568_v32 = vadd.s32 %v4566_v4, %v4560_v54  ;;  %v3668_v61 = vpop.f32.mrf.mxu3 }
 0x2f1   : > { %v4545_v45 = vadd.s32 %v4544_v17, %v4535_v13  ;;  %v6008_v8 = vadd.f32 %v6007_v2, %v5961_v11  ;;  %v6062_v58 = vmul.f32 %v5961_v11, %v5961_v11  ;;  %vm4569_vm7 = vc.u32 %v4567_v0, %v4563_v43  ;;  %v2602_v6 = vpop.f32.mrf.mxu1 }
 0x2f2   : > { %v3487_v35 = vor.u32 %v3485_v62, %v9227_v56  ;;  %7604 = vst [vmem:[%s8941_s8 + $0x28] sm:$0xff] %v7501_v28   ;;  %v3136_v9 = vadd.f32 %v3034_v37, %v2702_v1  ;;  %v4570_v59 = vsel %vm4569_vm7, 1, %v10128_v22  ;;  %v9309_v49 = vrot.slane %v3489_v19, 1 }
 0x2f3   : > { %v4546_v30 = vshrl.u32 %v4545_v45, 4  ;;  %v6109_v52 = vadd.f32 %v6108_v27, %v6062_v58  ;;  %v4572_v60 = vadd.s32 %v4570_v59, %v4568_v32  ;;  %v3858_v13 = vrot.slane %v9281_v7, 1  ;;  %v3989_v2 = vpop.f32.mrf.mxu0  ;;  %v9330_v27 = vld [vmem:[%s7793_s27 + $0x94] sm:$0xff] }
 0x2f4   : > { %v9313_v5 = vadd.s32 112, %v8565_v25  ;;  %v3770_v20 = vadd.f32 %v3668_v61, %v3136_v9  ;;  %v2703_v56 = vadd.f32 %v2602_v6, %v8349_v46  ;;  %v3492_v10 = vsel %vm432_vm0, %v3487_v35, %v9309_v49 }
 0x2f5   : > { %v4547_v53 = vmul.u32 24, %v4546_v30  ;;  %v4573_v21 = vadd.s32 %v4572_v60, %v4562_v48  ;;  %v3859_v36 = vsel %vm1052_vm1, %v3856_v18, %v3858_v13  ;;  %v9327_v46 = vadd.s32 120, %v8565_v25 }
 0x2f6   : > { %v4583_v3 = vand.u32 65535, %v9313_v5  ;;  %v4584_v63 = vshrl.u32 %v9313_v5, 16  ;;  %v4089_v39 = vadd.f32 %v3987_v57, %v3770_v20  ;;  %v2473_v16 = vrot.slane %v9330_v27, 1 }
 0x2f7   : > { %v4548_v24 = vsub.s32 %v9230_v12, %v4547_v53  ;;  %v4574_v44 = vadd.s32 %v4573_v21, %v4564_v15  ;;  %v3036_v12 = vpop.f32.mrf.mxu2  ;;  %v7409_v15 = vld [vmem:[%s7793_s27 + $0x90] sm:$0xff]  ;;  %v4612_v17 = vand.u32 65535, %v9327_v46  ;;  %v4613_v30 = vshrl.u32 %v9327_v46, 16 }
 0x2f8   : > { %v4586_v54 = vmul.u32 43691, %v4583_v3  ;;  %v9333_v47 = vmul.u32 43690, %v4583_v3  ;;  %v9335_v18 = vmul.u32 43691, %v4584_v63  ;;  %v4589_v40 = vmul.u32 43690, %v4584_v63  ;;  %v3670_v43 = vpop.f32.mrf.mxu3  ;;  %v9358_v63 = vld [vmem:[%s7793_s27 + $0xa0] sm:$0xff] }
 0x2f9   : > { %vm5578_vm8 = vcmp.ne.s32.totalorder %v4548_v24, 0  ;;  %vm5626_vm9 = vcmp.lt.s32.totalorder %v4548_v24, 0  ;;  %v5722_v51 = vadd.s32 24, %v4548_v24  ;;  %v4575_v23 = vshrl.u32 %v4574_v44, 4  ;;  %v2605_v4 = vpop.f32.mrf.mxu1 }
 0x2fa   : > { %vm5674_vm10 = vmand %vm5626_vm9, %vm5578_vm8  ;;  %v4590_v1 = vshll.u32 %v9333_v47, 16  ;;  %v4591_v57 = vshrl.u32 %v9333_v47, 16  ;;  %v4592_v14 = vshll.u32 %v9335_v18, 16  ;;  %v3137_v48 = vadd.f32 %v3036_v12, %v2703_v56 }
 0x2fb   : > { %v5770_v50 = vsel %vm5674_vm10, %v5722_v51, %v4548_v24  ;;  %v4593_v31 = vshrl.u32 %v9335_v18, 16  ;;  %v4576_v62 = vmul.u32 24, %v4575_v23  ;;  %v2704_v28 = vadd.f32 %v2605_v4, %v8353_v29  ;;  %v3992_v45 = vpop.f32.mrf.mxu0 }
 0x2fc   : > { %vm5818_vm11 = vcmp.lt.s32.totalorder %v5770_v50, 16  ;;  %vm4594_vm12 = vc.u32 %v4586_v54, %v4590_v1  ;;  %v4596_v0 = vadd.s32 %v4590_v1, %v4586_v54  ;;  %v3771_v11 = vadd.f32 %v3670_v43, %v3137_v48  ;;  %2644 = vmatmul.bf16.gmra.mxu1 %v9301_v38  ;;  %3078 = vmatmul.bf16.gmra.mxu2 %v7409_v15 }
 0x2fd   : > { %v5962_v19 = vsel %vm5818_vm11, %v4089_v39, 0.0  ;;  %v4595_v32 = vsel %vm4594_vm12, 1, %v10128_v22  ;;  %v4577_v35 = vsub.s32 %v9241_v55, %v4576_v62  ;;  %v4615_v59 = vmul.u32 43691, %v4612_v17  ;;  %3712 = vmatmul.bf16.gmra.mxu3 %v3492_v10 }
 0x2fe   : > { %v6009_v58 = vadd.f32 %v6008_v8, %v5962_v19  ;;  %v6063_v37 = vmul.f32 %v5962_v19, %v5962_v19  ;;  %v4597_v9 = vadd.s32 %v4595_v32, %v4589_v40  ;;  %v4090_v61 = vadd.f32 %v3989_v2, %v3771_v11  ;;  %4031 = vmatmul.bf16.gmra.mxu0 %v3859_v36 }
 0x2ff   : > { %vm4598_vm13 = vc.u32 %v4596_v0, %v4592_v14  ;;  %vm5579_vm14 = vcmp.ne.s32.totalorder %v4577_v35, 0  ;;  %vm5627_vm15 = vcmp.lt.s32.totalorder %v4577_v35, 0  ;;  %v5723_v29 = vadd.s32 24, %v4577_v35  ;;  %v3039_v53 = vpop.f32.mrf.mxu2 }
 0x300   : > { %v6110_v6 = vadd.f32 %v6109_v52, %v6063_v37  ;;  %vm5675_vm2 = vmand %vm5627_vm15, %vm5579_vm14  ;;  %v7506_v8 = vpack.c.bf16 %v4090_v61, %v4089_v39  ;;  %v4599_v55 = vsel %vm4598_vm13, 1, %v10128_v22  ;;  %v4616_v60 = vmul.u32 43690, %v4612_v17  ;;  %v3673_v21 = vpop.f32.mrf.mxu3 }
 0x301   : > { %v9349_v20 = vmul.u32 43691, %v4613_v30  ;;  %v5771_v38 = vsel %vm5675_vm2, %v5723_v29, %v4577_v35  ;;  %v4601_v56 = vadd.s32 %v4599_v55, %v4597_v9  ;;  %v4618_v2 = vmul.u32 43690, %v4613_v30  ;;  %v2607_v44 = vpop.f32.mrf.mxu1 }
 0x302   : > { %v2474_v52 = vsel %vm1052_vm1, %v2471_v41, %v2473_v16  ;;  %vm5819_vm3 = vcmp.lt.s32.totalorder %v5771_v38, 16  ;;  %7605 = vst [vmem:[%s8941_s8 + $0x30] sm:$0xff] %v7506_v8   ;;  %v3138_v10 = vadd.f32 %v3039_v53, %v2704_v28  ;;  %v4619_v36 = vshll.u32 %v4616_v60, 16 }
 0x303   : > { %v4620_v3 = vshrl.u32 %v4616_v60, 16  ;;  %v5963_v39 = vsel %vm5819_vm3, %v4090_v61, 0.0  ;;  %v4602_v24 = vadd.s32 %v4601_v56, %v4591_v57  ;;  %v4621_v54 = vshll.u32 %v9349_v20, 16  ;;  %v3994_v40 = vpop.f32.mrf.mxu0 }
 0x304   : > { %v4622_v47 = vshrl.u32 %v9349_v20, 16  ;;  %v9362_v18 = vadd.f32 %v6009_v58, %v5963_v39  ;;  %v6064_v26 = vmul.f32 %v5963_v39, %v5963_v39  ;;  %v3772_v51 = vadd.f32 %v3673_v21, %v3138_v10 }
 0x305   : > { %v2705_v41 = vadd.f32 %v2607_v44, %v8361_v34  ;;  %v4603_v12 = vadd.s32 %v4602_v24, %v4593_v31  ;;  %vm4623_vm4 = vc.u32 %v4615_v59, %v4619_v36  ;;  %v4625_v23 = vadd.s32 %v4619_v36, %v4615_v59 }
 0x306   : > { %v3493_v1 = vshrl.u32 %v9281_v7, 16  ;;  %v9366_v14 = vadd.f32 %v6110_v6, %v6064_v26  ;;  %v4091_v57 = vadd.f32 %v3992_v45, %v3772_v51  ;;  %v4624_v50 = vsel %vm4623_vm4, 1, %v10128_v22 }
 0x307   : > { %v3497_v48 = vshll.u32 %v9358_v63, 16  ;;  %v4604_v43 = vshrl.u32 %v4603_v12, 4  ;;  %v4626_v15 = vadd.s32 %v4624_v50, %v4618_v2  ;;  %vm4627_vm5 = vc.u32 %v4625_v23, %v4621_v54  ;;  %v3041_v19 = vpop.f32.mrf.mxu2 }
 0x308   : > { %v3495_v17 = vor.u32 %v3493_v1, %v9309_v49  ;;  %v4628_v34 = vsel %vm4627_vm5, 1, %v10128_v22  ;;  %v3860_v62 = vrot.slane %v9358_v63, 1  ;;  %v9376_v4 = vadd.s32 128, %v8565_v25  ;;  %v3675_v58 = vpop.f32.mrf.mxu3  ;;  %v7410_v49 = vld [vmem:[%s7793_s27 + $0x98] sm:$0xff] }
 0x309   : > { %v9372_v31 = vrot.slane %v3497_v48, 1  ;;  %v4605_v0 = vmul.u32 24, %v4604_v43  ;;  %v4630_v11 = vadd.s32 %v4628_v34, %v4626_v15  ;;  %v9379_v28 = vadd.s32 136, %v8565_v25  ;;  %v2610_v59 = vpop.f32.mrf.mxu1 }
 0x30a   : > { %v3501_v45 = vshrl.u32 %v9358_v63, 16  ;;  %v3139_v32 = vadd.f32 %v3041_v19, %v2705_v41  ;;  %v3861_v35 = vsel %vm1052_vm1, %v3858_v13, %v3860_v62  ;;  %v4641_v9 = vand.u32 65535, %v9376_v4 }
 0x30b   : > { %v3500_v37 = vsel %vm432_vm0, %v3495_v17, %v9372_v31  ;;  %v4606_v61 = vsub.s32 %v9313_v5, %v4605_v0  ;;  %v4631_v30 = vadd.s32 %v4630_v11, %v4620_v3  ;;  %v4642_v6 = vshrl.u32 %v9376_v4, 16  ;;  %v3997_v60 = vpop.f32.mrf.mxu0 }
 0x30c   : > { %v4670_v29 = vand.u32 65535, %v9379_v28  ;;  %v3773_v8 = vadd.f32 %v3675_v58, %v3139_v32  ;;  %v2706_v55 = vadd.f32 %v2610_v59, %v8377_v42  ;;  %v4644_v20 = vmul.u32 43691, %v4641_v9  ;;  %2649 = vmatmul.bf16.gmra.mxu1 %v2474_v52  ;;  %3083 = vmatmul.bf16.gmra.mxu2 %v7410_v49  ;;  %v9408_v49 = vld [vmem:[%s7793_s27 + $0x9c] sm:$0xff] }
 0x30d   : > { %v4645_v38 = vmul.u32 43690, %v4641_v9  ;;  %vm5580_vm6 = vcmp.ne.s32.totalorder %v4606_v61, 0  ;;  %vm5628_vm7 = vcmp.lt.s32.totalorder %v4606_v61, 0  ;;  %v5724_v7 = vadd.s32 24, %v4606_v61  ;;  %3717 = vmatmul.bf16.gmra.mxu3 %v3500_v37 }
 0x30e   : > { %v4632_v13 = vadd.s32 %v4631_v30, %v4622_v47  ;;  %vm5676_vm8 = vmand %vm5628_vm7, %vm5580_vm6  ;;  %v4092_v53 = vadd.f32 %v3994_v40, %v3773_v8  ;;  %v4646_v5 = vmul.u32 43691, %v4642_v6  ;;  %v4647_v56 = vmul.u32 43690, %v4642_v6  ;;  %4036 = vmatmul.bf16.gmra.mxu0 %v3861_v35  ;;  %v9412_v35 = vld [vmem:[%s7793_s27 + $0xa8] sm:$0xff] }
 0x30f   : > { %v4648_v2 = vshll.u32 %v4645_v38, 16  ;;  %v5772_v10 = vsel %vm5676_vm8, %v5724_v7, %v4606_v61  ;;  %v4649_v42 = vshrl.u32 %v4645_v38, 16  ;;  %v4671_v36 = vshrl.u32 %v9379_v28, 16  ;;  %v3044_v47 = vpop.f32.mrf.mxu2 }
 0x310   : > { %v4633_v21 = vshrl.u32 %v4632_v13, 4  ;;  %vm5820_vm9 = vcmp.lt.s32.totalorder %v5772_v10, 16  ;;  %v7511_v3 = vpack.c.bf16 %v4092_v53, %v4091_v57  ;;  %v4650_v39 = vshll.u32 %v4646_v5, 16  ;;  %v3678_v40 = vpop.f32.mrf.mxu3 }
 0x311   : > { %v4651_v24 = vshrl.u32 %v4646_v5, 16  ;;  %v5964_v44 = vsel %vm5820_vm9, %v4091_v57, 0.0  ;;  %vm4652_vm10 = vc.u32 %v4644_v20, %v4648_v2  ;;  %v4654_v52 = vadd.s32 %v4648_v2, %v4644_v20  ;;  %v2612_v50 = vpop.f32.mrf.mxu1 }
 0x312   : > { %v4634_v54 = vmul.u32 24, %v4633_v21  ;;  %v6011_v26 = vadd.f32 %v9362_v18, %v5964_v44  ;;  %v6065_v51 = vmul.f32 %v5964_v44, %v5964_v44  ;;  %7606 = vst [vmem:[%s8941_s8 + $0x38] sm:$0xff] %v7511_v3   ;;  %v3140_v41 = vadd.f32 %v3044_v47, %v2706_v55 }
 0x313   : > { %v4653_v12 = vsel %vm4652_vm10, 1, %v10128_v22  ;;  %vm4656_vm11 = vc.u32 %v4654_v52, %v4650_v39  ;;  %v4673_v48 = vmul.u32 43691, %v4670_v29  ;;  %v2707_v18 = vadd.f32 %v2612_v50, %v8385_v33  ;;  %v3999_v17 = vpop.f32.mrf.mxu0 }
 0x314   : > { %v4635_v23 = vsub.s32 %v9327_v46, %v4634_v54  ;;  %v4655_v1 = vadd.s32 %v4653_v12, %v4647_v56  ;;  %v6112_v57 = vadd.f32 %v9366_v14, %v6065_v51  ;;  %v3774_v43 = vadd.f32 %v3678_v40, %v3140_v41 }
 0x315   : > { %v4657_v15 = vsel %vm4656_vm11, 1, %v10128_v22  ;;  %v4674_v19 = vmul.u32 43690, %v4670_v29  ;;  %v9405_v11 = vmul.u32 43691, %v4671_v36  ;;  %v4676_v32 = vmul.u32 43690, %v4671_v36 }
 0x316   : > { %vm5581_vm12 = vcmp.ne.s32.totalorder %v4635_v23, 0  ;;  %vm5629_vm13 = vcmp.lt.s32.totalorder %v4635_v23, 0  ;;  %v5725_v34 = vadd.s32 24, %v4635_v23  ;;  %v4659_v0 = vadd.s32 %v4657_v15, %v4655_v1 }
 0x317   : > { %vm5677_vm14 = vmand %vm5629_vm13, %vm5581_vm12  ;;  %v9403_v46 = vadd.f32 %v3997_v60, %v3774_v43  ;;  %v2475_v37 = vrot.slane %v9408_v49, 1  ;;  %v3503_v33 = vor.u32 %v3501_v45, %v9372_v31  ;;  %v4677_v9 = vshll.u32 %v4674_v19, 16  ;;  %v3046_v29 = vpop.f32.mrf.mxu2  ;;  %v7411_v45 = vld [vmem:[%s7793_s27 + $0xa0] sm:$0xff] }
 0x318   : > { %v5773_v14 = vsel %vm5677_vm14, %v5725_v34, %v4635_v23  ;;  %v4660_v58 = vadd.s32 %v4659_v0, %v4649_v42  ;;  %v4678_v61 = vshrl.u32 %v4674_v19, 16  ;;  %v4679_v30 = vshll.u32 %v9405_v11, 16  ;;  %v3680_v31 = vpop.f32.mrf.mxu3  ;;  %v10199_v42 = vld [vmem:[#allocation15_spill] sm:$0xff] }
 0x319   : > { %vm5821_vm15 = vcmp.lt.s32.totalorder %v5773_v14, 16  ;;  %v4680_v8 = vshrl.u32 %v9405_v11, 16  ;;  %v2476_v55 = vsel %vm1052_vm1, %v2473_v16, %v2475_v37  ;;  %v3141_v38 = vadd.f32 %v3046_v29, %v2707_v18  ;;  %v2615_v5 = vpop.f32.mrf.mxu1 }
 0x31a   : > { %v5965_v59 = vsel %vm5821_vm15, %v4092_v53, 0.0  ;;  %v4661_v6 = vadd.s32 %v4660_v58, %v4651_v24  ;;  %vm4681_vm2 = vc.u32 %v4673_v48, %v4677_v9  ;;  %v4683_v53 = vadd.s32 %v4677_v9, %v4673_v48 }
 0x31b   : > { %v6012_v60 = vadd.f32 %v6011_v26, %v5965_v59  ;;  %v6066_v20 = vmul.f32 %v5965_v59, %v5965_v59  ;;  %v4682_v13 = vsel %vm4681_vm2, 1, %v10128_v22  ;;  %v3505_v56 = vshll.u32 %v9412_v35, 16  ;;  %v4002_v36 = vpop.f32.mrf.mxu0 }
 0x31c   : > { %v4662_v7 = vshrl.u32 %v4661_v6, 4  ;;  %v3775_v10 = vadd.f32 %v3680_v31, %v3141_v38  ;;  %v4684_v21 = vadd.s32 %v4682_v13, %v4676_v32  ;;  %v2708_v27 = vadd.f32 %v2615_v5, %v10199_v42  ;;  %2654 = vmatmul.bf16.gmra.mxu1 %v2476_v55  ;;  %3088 = vmatmul.bf16.gmra.mxu2 %v7411_v45  ;;  %v10200_v38 = vld [vmem:[#allocation16_spill] sm:$0xff] }
 0x31d   : > { %v6113_v2 = vadd.f32 %v6112_v57, %v6066_v20  ;;  %vm4685_vm3 = vc.u32 %v4683_v53, %v4679_v30  ;;  %v9428_v3 = vrot.slane %v3505_v56, 1  ;;  %v3862_v39 = vrot.slane %v9412_v35, 1 }
 0x31e   : > { %v4663_v16 = vmul.u32 24, %v4662_v7  ;;  %v9431_v24 = vadd.f32 %v3999_v17, %v3775_v10  ;;  %v4686_v44 = vsel %vm4685_vm3, 1, %v10128_v22  ;;  %v9435_v54 = vadd.s32 144, %v8565_v25 }
 0x31f   : > { %v9438_v47 = vadd.s32 152, %v8565_v25  ;;  %v4688_v26 = vadd.s32 %v4686_v44, %v4684_v21  ;;  %v3508_v51 = vsel %vm432_vm0, %v3503_v33, %v9428_v3  ;;  %v3863_v41 = vsel %vm1052_vm1, %v3860_v62, %v3862_v39  ;;  %v3049_v48 = vpop.f32.mrf.mxu2 }
 0x320   : > { %v4664_v52 = vsub.s32 %v9376_v4, %v4663_v16  ;;  %v7516_v40 = vpack.c.bf16 %v9431_v24, %v9403_v46  ;;  %3722 = vmatmul.bf16.gmra.mxu3 %v3508_v51  ;;  %4041 = vmatmul.bf16.gmra.mxu0 %v3863_v41  ;;  %v4699_v12 = vand.u32 65535, %v9435_v54  ;;  %v4700_v4 = vshrl.u32 %v9435_v54, 16  ;;  %v3683_v62 = vpop.f32.mrf.mxu3  ;;  %v7412_v16 = vld [vmem:[%s7793_s27 + $0xa8] sm:$0xff] }
 0x321   : > { %v4728_v23 = vand.u32 65535, %v9438_v47  ;;  %v4689_v50 = vadd.s32 %v4688_v26, %v4678_v61  ;;  %v3142_v63 = vadd.f32 %v3049_v48, %v2708_v27  ;;  %v2617_v0 = vpop.f32.mrf.mxu1  ;;  %v4729_v19 = vshrl.u32 %v9438_v47, 16  ;;  %v10201_v48 = vld [vmem:[#allocation17_spill] sm:$0xff] }
 0x322   : > { %vm5582_vm4 = vcmp.ne.s32.totalorder %v4664_v52, 0  ;;  %vm5630_vm5 = vcmp.lt.s32.totalorder %v4664_v52, 0  ;;  %v5726_v1 = vadd.s32 24, %v4664_v52  ;;  %7607 = vst [vmem:[%s8941_s8 + $0x40] sm:$0xff] %v7516_v40   ;;  %v4702_v57 = vmul.u32 43691, %v4699_v12 }
 0x323   : > { %vm5678_vm6 = vmand %vm5630_vm5, %vm5582_vm4  ;;  %v4703_v43 = vmul.u32 43690, %v4699_v12  ;;  %v4704_v15 = vmul.u32 43691, %v4700_v4  ;;  %v4690_v17 = vadd.s32 %v4689_v50, %v4680_v8  ;;  %v4705_v34 = vmul.u32 43690, %v4700_v4  ;;  %v4004_v58 = vpop.f32.mrf.mxu0 }
 0x324   : > { %v5774_v18 = vsel %vm5678_vm6, %v5726_v1, %v4664_v52  ;;  %v3776_v11 = vadd.f32 %v3683_v62, %v3142_v63  ;;  %v2709_v31 = vadd.f32 %v2617_v0, %v10200_v38  ;;  %v4731_v13 = vmul.u32 43691, %v4728_v23  ;;  %v9468_v62 = vld [vmem:[%s7793_s27 + $0xb0] sm:$0xff] }
 0x325   : > { %vm5822_vm7 = vcmp.lt.s32.totalorder %v5774_v18, 16  ;;  %v4706_v32 = vshll.u32 %v4703_v43, 16  ;;  %v4707_v14 = vshrl.u32 %v4703_v43, 16  ;;  %v4691_v9 = vshrl.u32 %v4690_v17, 4 }
 0x326   : > { %v5966_v33 = vsel %vm5822_vm7, %v9403_v46, 0.0  ;;  %v4708_v61 = vshll.u32 %v4704_v15, 16  ;;  %v4709_v30 = vshrl.u32 %v4704_v15, 16  ;;  %v9456_v29 = vadd.f32 %v4002_v36, %v3776_v11  ;;  %v9472_v15 = vld [vmem:[%s7793_s27 + $0xa4] sm:$0xff] }
 0x327   : > { %v6013_v59 = vadd.f32 %v6012_v60, %v5966_v33  ;;  %v6067_v6 = vmul.f32 %v5966_v33, %v5966_v33  ;;  %vm4710_vm8 = vc.u32 %v4702_v57, %v4706_v32  ;;  %v4692_v8 = vmul.u32 24, %v4691_v9  ;;  %v3051_v5 = vpop.f32.mrf.mxu2 }
 0x328   : > { %v4711_v55 = vsel %vm4710_vm8, 1, %v10128_v22  ;;  %v4712_v20 = vadd.s32 %v4706_v32, %v4702_v57  ;;  %v4732_v53 = vmul.u32 43690, %v4728_v23  ;;  %v4733_v60 = vmul.u32 43691, %v4729_v19  ;;  %v3685_v42 = vpop.f32.mrf.mxu3 }
 0x329   : > { %v6114_v45 = vadd.f32 %v6113_v2, %v6067_v6  ;;  %v4713_v7 = vadd.s32 %v4711_v55, %v4705_v34  ;;  %v4693_v46 = vsub.s32 %v9379_v28, %v4692_v8  ;;  %v4734_v56 = vmul.u32 43690, %v4729_v19  ;;  %v2620_v52 = vpop.f32.mrf.mxu1 }
 0x32a   : > { %vm4714_vm9 = vc.u32 %v4712_v20, %v4708_v61  ;;  %v3143_v21 = vadd.f32 %v3051_v5, %v2709_v31  ;;  %v4735_v27 = vshll.u32 %v4732_v53, 16  ;;  %v4736_v36 = vshrl.u32 %v4732_v53, 16 }
 0x32b   : > { %v4715_v10 = vsel %vm4714_vm9, 1, %v10128_v22  ;;  %vm5583_vm10 = vcmp.ne.s32.totalorder %v4693_v46, 0  ;;  %vm5631_vm11 = vcmp.lt.s32.totalorder %v4693_v46, 0  ;;  %v5727_v44 = vadd.s32 24, %v4693_v46  ;;  %v4007_v41 = vpop.f32.mrf.mxu0 }
 0x32c   : > { %v4717_v2 = vadd.s32 %v4715_v10, %v4713_v7  ;;  %vm5679_vm12 = vmand %vm5631_vm11, %vm5583_vm10  ;;  %v3777_v26 = vadd.f32 %v3685_v42, %v3143_v21  ;;  %v4737_v28 = vshll.u32 %v4733_v60, 16  ;;  %v4738_v51 = vshrl.u32 %v4733_v60, 16  ;;  %3093 = vmatmul.bf16.gmra.mxu2 %v7412_v16 }
 0x32d   : > { %vm4739_vm13 = vc.u32 %v4731_v13, %v4735_v27  ;;  %v5775_v40 = vsel %vm5679_vm12, %v5727_v44, %v4693_v46  ;;  %v4741_v23 = vadd.s32 %v4735_v27, %v4731_v13  ;;  %v2710_v63 = vadd.f32 %v2620_v52, %v10201_v48 }
 0x32e   : > { %v4718_v12 = vadd.s32 %v4717_v2, %v4707_v14  ;;  %v4740_v4 = vsel %vm4739_vm13, 1, %v10128_v22  ;;  %vm5823_vm14 = vcmp.lt.s32.totalorder %v5775_v40, 16  ;;  %v9464_v1 = vadd.f32 %v4004_v58, %v3777_v26 }
 0x32f   : > { %v4742_v50 = vadd.s32 %v4740_v4, %v4734_v56  ;;  %v5967_v57 = vsel %vm5823_vm14, %v9431_v24, 0.0  ;;  %vm4743_vm15 = vc.u32 %v4741_v23, %v4737_v28  ;;  %v2477_v18 = vrot.slane %v9472_v15, 1  ;;  %v3054_v58 = vpop.f32.mrf.mxu2  ;;  %v7413_v4 = vld [vmem:[%s7793_s27 + $0xb0] sm:$0xff] }
 0x330   : > { %v4719_v43 = vadd.s32 %v4718_v12, %v4709_v30  ;;  %v6014_v17 = vadd.f32 %v6013_v59, %v5967_v57  ;;  %v6068_v34 = vmul.f32 %v5967_v57, %v5967_v57  ;;  %v4744_v0 = vsel %vm4743_vm15, 1, %v10128_v22  ;;  %v3688_v59 = vpop.f32.mrf.mxu3 }
 0x331   : > { %v7521_v19 = vpack.c.bf16 %v9464_v1, %v9456_v29  ;;  %v4746_v32 = vadd.s32 %v4744_v0, %v4742_v50  ;;  %v2478_v24 = vsel %vm1052_vm1, %v2475_v37, %v2477_v18  ;;  %v3509_v14 = vshrl.u32 %v9412_v35, 16  ;;  %v2622_v37 = vpop.f32.mrf.mxu1 }
 0x332   : > { %v4720_v11 = vshrl.u32 %v4719_v43, 4  ;;  %v6115_v33 = vadd.f32 %v6114_v45, %v6068_v34  ;;  %2659 = vmatmul.bf16.gmra.mxu1 %v2478_v24  ;;  %v3513_v9 = vshll.u32 %v9468_v62, 16  ;;  %v3864_v61 = vrot.slane %v9468_v62, 1  ;;  %v10202_v45 = vld [vmem:[#allocation18_spill] sm:$0xff] }
 0x333   : > { %7608 = vst [vmem:[%s8941_s8 + $0x48] sm:$0xff] %v7521_v19   ;;  %v3144_v30 = vadd.f32 %v3054_v58, %v2710_v63  ;;  %v4747_v8 = vadd.s32 %v4746_v32, %v4736_v36  ;;  %v3511_v55 = vor.u32 %v3509_v14, %v9428_v3  ;;  %v9489_v49 = vadd.s32 160, %v8565_v25  ;;  %v4009_v13 = vpop.f32.mrf.mxu0 }
 0x334   : > { %v4721_v6 = vmul.u32 24, %v4720_v11  ;;  %v9491_v20 = vrot.slane %v3513_v9, 1  ;;  %v3865_v38 = vsel %vm1052_vm1, %v3862_v39, %v3864_v61  ;;  %v2711_v7 = vadd.f32 %v2622_v37, %v10202_v45  ;;  %v9510_v39 = vld [vmem:[%s7793_s27 + $0xac] sm:$0xff] }
 0x335   : > { %v3778_v31 = vadd.f32 %v3688_v59, %v3144_v30  ;;  %v4748_v3 = vadd.s32 %v4747_v8, %v4738_v51  ;;  %4046 = vmatmul.bf16.gmra.mxu0 %v3865_v38  ;;  %v4757_v46 = vand.u32 65535, %v9489_v49  ;;  %v4758_v5 = vshrl.u32 %v9489_v49, 16 }
 0x336   : > { %v4722_v53 = vsub.s32 %v9435_v54, %v4721_v6  ;;  %v3516_v60 = vsel %vm432_vm0, %v3511_v55, %v9491_v20  ;;  %v9507_v35 = vadd.s32 168, %v8565_v25  ;;  %v2479_v10 = vrot.slane %v9510_v39, 1 }
 0x337   : > { %v9504_v56 = vadd.f32 %v4007_v41, %v3778_v31  ;;  %v4749_v21 = vshrl.u32 %v4748_v3, 4  ;;  %3727 = vmatmul.bf16.gmra.mxu3 %v3516_v60  ;;  %v4760_v42 = vmul.u32 43691, %v4757_v46  ;;  %v4761_v27 = vmul.u32 43690, %v4757_v46  ;;  %v3056_v52 = vpop.f32.mrf.mxu2  ;;  %v9528_v3 = vld [vmem:[%s7793_s27 + $0xb8] sm:$0xff] }
 0x338   : > { %vm5584_vm2 = vcmp.ne.s32.totalorder %v4722_v53, 0  ;;  %vm5632_vm3 = vcmp.lt.s32.totalorder %v4722_v53, 0  ;;  %v5728_v54 = vadd.s32 24, %v4722_v53  ;;  %v4762_v36 = vmul.u32 43691, %v4758_v5  ;;  %v3690_v12 = vpop.f32.mrf.mxu3 }
 0x339   : > { %vm5680_vm4 = vmand %vm5632_vm3, %vm5584_vm2  ;;  %v4763_v16 = vmul.u32 43690, %v4758_v5  ;;  %v4750_v2 = vmul.u32 24, %v4749_v21  ;;  %v4786_v26 = vand.u32 65535, %v9507_v35  ;;  %v4787_v28 = vshrl.u32 %v9507_v35, 16  ;;  %v2625_v57 = vpop.f32.mrf.mxu1 }
 0x33a   : > { %v5776_v44 = vsel %vm5680_vm4, %v5728_v54, %v4722_v53  ;;  %v4764_v51 = vshll.u32 %v4761_v27, 16  ;;  %v4765_v41 = vshrl.u32 %v4761_v27, 16  ;;  %v4766_v40 = vshll.u32 %v4762_v36, 16  ;;  %v10203_v27 = vld [vmem:[#allocation19_spill] sm:$0xff] }
 0x33b   : > { %vm5824_vm5 = vcmp.lt.s32.totalorder %v5776_v44, 16  ;;  %v4751_v50 = vsub.s32 %v9438_v47, %v4750_v2  ;;  %v4767_v48 = vshrl.u32 %v4762_v36, 16  ;;  %v3145_v63 = vadd.f32 %v3056_v52, %v2711_v7  ;;  %v9519_v32 = vpop.f32.mrf.mxu0 }
 0x33c   : > { %v5968_v23 = vsel %vm5824_vm5, %v9456_v29, 0.0  ;;  %vm4768_vm6 = vc.u32 %v4760_v42, %v4764_v51  ;;  %v4770_v0 = vadd.s32 %v4764_v51, %v4760_v42  ;;  %3098 = vmatmul.bf16.gmra.mxu2 %v7413_v4  ;;  %v4790_v9 = vmul.u32 43690, %v4786_v26 }
 0x33d   : > { %v6015_v43 = vadd.f32 %v6014_v17, %v5968_v23  ;;  %v6069_v34 = vmul.f32 %v5968_v23, %v5968_v23  ;;  %vm5585_vm7 = vcmp.ne.s32.totalorder %v4751_v50, 0  ;;  %vm5633_vm8 = vcmp.lt.s32.totalorder %v4751_v50, 0 }
 0x33e   : > { %v5729_v19 = vadd.s32 24, %v4751_v50  ;;  %v4769_v11 = vsel %vm4768_vm6, 1, %v10128_v22  ;;  %vm5681_vm9 = vmand %vm5633_vm8, %vm5585_vm7  ;;  %vm4772_vm10 = vc.u32 %v4770_v0, %v4766_v40  ;;  %v3779_v29 = vadd.f32 %v3690_v12, %v3145_v63 }
 0x33f   : > { %v6116_v24 = vadd.f32 %v6115_v33, %v6069_v34  ;;  %v4771_v14 = vadd.s32 %v4769_v11, %v4763_v16  ;;  %v4773_v58 = vsel %vm4772_vm10, 1, %v10128_v22  ;;  %v4789_v17 = vmul.u32 43691, %v4786_v26  ;;  %v3059_v38 = vpop.f32.mrf.mxu2 }
 0x340   : > { %v5777_v47 = vsel %vm5681_vm9, %v5729_v19, %v4751_v50  ;;  %v9522_v59 = vadd.f32 %v4009_v13, %v3779_v29  ;;  %v4791_v6 = vmul.u32 43691, %v4787_v28  ;;  %v4792_v55 = vmul.u32 43690, %v4787_v28  ;;  %v3693_v46 = vpop.f32.mrf.mxu3 }
 0x341   : > { %vm5825_vm11 = vcmp.lt.s32.totalorder %v5777_v47, 16  ;;  %v4775_v30 = vadd.s32 %v4773_v58, %v4771_v14  ;;  %v4793_v33 = vshll.u32 %v4790_v9, 16  ;;  %v4794_v37 = vshrl.u32 %v4790_v9, 16 }
 0x342   : > { %v5969_v8 = vsel %vm5825_vm11, %v9464_v1, 0.0  ;;  %v4795_v53 = vshll.u32 %v4791_v6, 16  ;;  %v4796_v5 = vshrl.u32 %v4791_v6, 16  ;;  %v7526_v60 = vpack.c.bf16 %v9522_v59, %v9504_v56  ;;  %v2627_v1 = vpop.f32.mrf.mxu1 }
 0x343   : > { %v9525_v31 = vadd.f32 %v6015_v43, %v5969_v8  ;;  %v6070_v45 = vmul.f32 %v5969_v8, %v5969_v8  ;;  %v4776_v7 = vadd.s32 %v4775_v30, %v4765_v41  ;;  %vm4797_vm12 = vc.u32 %v4789_v17, %v4793_v33  ;;  %v4014_v15 = vpop.f32.mrf.mxu0 }
 0x344   : > { %v4799_v13 = vadd.s32 %v4793_v33, %v4789_v17  ;;  %v4798_v42 = vsel %vm4797_vm12, 1, %v10128_v22  ;;  %v2712_v36 = vadd.f32 %v2625_v57, %v10203_v27  ;;  %7609 = vst [vmem:[%s8941_s8 + $0x50] sm:$0xff] %v7526_v60   ;;  %v2480_v44 = vsel %vm1052_vm1, %v2477_v18, %v2479_v10 }
 0x345   : > { %v9532_v54 = vadd.f32 %v6116_v24, %v6070_v45  ;;  %v4777_v21 = vadd.s32 %v4776_v7, %v4767_v48  ;;  %v4800_v16 = vadd.s32 %v4798_v42, %v4792_v55  ;;  %v3517_v2 = vshrl.u32 %v9468_v62, 16  ;;  %2664 = vmatmul.bf16.gmra.mxu1 %v2480_v44  ;;  %v10204_v48 = vld [vmem:[#allocation20_spill] sm:$0xff] }
 0x346   : > { %vm4801_vm13 = vc.u32 %v4799_v13, %v4795_v53  ;;  %v3521_v28 = vshll.u32 %v9528_v3, 16  ;;  %v3866_v51 = vrot.slane %v9528_v3, 1  ;;  %v3146_v12 = vadd.f32 %v3059_v38, %v2712_v36 }
 0x347   : > { %v4778_v52 = vshrl.u32 %v4777_v21, 4  ;;  %v4802_v26 = vsel %vm4801_vm13, 1, %v10128_v22  ;;  %v3519_v40 = vor.u32 %v3517_v2, %v9491_v20  ;;  %v9548_v4 = vadd.s32 176, %v8565_v25  ;;  %v3061_v0 = vpop.f32.mrf.mxu2 }
 0x348   : > { %v4804_v41 = vadd.s32 %v4802_v26, %v4800_v16  ;;  %v9550_v23 = vrot.slane %v3521_v28, 1  ;;  %v3867_v50 = vsel %vm1052_vm1, %v3864_v61, %v3866_v51  ;;  %v2713_v63 = vadd.f32 %v2627_v1, %v10204_v48  ;;  %v3695_v14 = vpop.f32.mrf.mxu3  ;;  %v7414_v61 = vld [vmem:[%s7793_s27 + $0xb8] sm:$0xff] }
 0x349   : > { %v4779_v18 = vmul.u32 24, %v4778_v52  ;;  %4051 = vmatmul.bf16.gmra.mxu0 %v3867_v50  ;;  %v3780_v20 = vadd.f32 %v3693_v46, %v3146_v12  ;;  %v4815_v43 = vand.u32 65535, %v9548_v4  ;;  %v4816_v34 = vshrl.u32 %v9548_v4, 16 }
 0x34a   : > { %v4805_v57 = vadd.s32 %v4804_v41, %v4794_v37  ;;  %v3524_v11 = vsel %vm432_vm0, %v3519_v40, %v9550_v23  ;;  %v3147_v24 = vadd.f32 %v3061_v0, %v2713_v63  ;;  %v9564_v62 = vadd.s32 184, %v8565_v25  ;;  %v2630_v30 = vpop.f32.mrf.mxu1  ;;  %v9585_v63 = vld [vmem:[%s7793_s27 + $0xc0] sm:$0xff] }
 0x34b   : > { %v4780_v19 = vsub.s32 %v9489_v49, %v4779_v18  ;;  %3732 = vmatmul.bf16.gmra.mxu3 %v3524_v11  ;;  %v9568_v47 = vadd.f32 %v9519_v32, %v3780_v20  ;;  %v4818_v58 = vmul.u32 43691, %v4815_v43  ;;  %v4819_v17 = vmul.u32 43690, %v4815_v43  ;;  %v9577_v36 = vpop.f32.mrf.mxu0 }
 0x34c   : > { %v4806_v29 = vadd.s32 %v4805_v57, %v4796_v5  ;;  %v4820_v49 = vmul.u32 43691, %v4816_v34  ;;  %v4821_v8 = vmul.u32 43690, %v4816_v34  ;;  %v3781_v7 = vadd.f32 %v3695_v14, %v3147_v24  ;;  %3103 = vmatmul.bf16.gmra.mxu2 %v7414_v61  ;;  %v10205_v14 = vld [vmem:[#allocation21_spill] sm:$0xff] }
 0x34d   : > { %vm5586_vm14 = vcmp.ne.s32.totalorder %v4780_v19, 0  ;;  %vm5634_vm15 = vcmp.lt.s32.totalorder %v4780_v19, 0  ;;  %v5730_v9 = vadd.s32 24, %v4780_v19  ;;  %v4822_v55 = vshll.u32 %v4819_v17, 16 }
 0x34e   : > { %vm5682_vm2 = vmand %vm5634_vm15, %vm5586_vm14  ;;  %v4807_v6 = vshrl.u32 %v4806_v29, 4  ;;  %v4823_v33 = vshrl.u32 %v4819_v17, 16  ;;  %v4824_v38 = vshll.u32 %v4820_v49, 16  ;;  %v4825_v45 = vshrl.u32 %v4820_v49, 16 }
 0x34f   : > { %v5778_v37 = vsel %vm5682_vm2, %v5730_v9, %v4780_v19  ;;  %vm4826_vm4 = vc.u32 %v4818_v58, %v4822_v55  ;;  %v4828_v53 = vadd.s32 %v4822_v55, %v4818_v58  ;;  %v9572_v13 = vadd.f32 %v4014_v15, %v3781_v7  ;;  %v9594_v58 = vld [vmem:[%s7793_s27 + $0xb4] sm:$0xff] }
 0x350   : > { %vm5826_vm3 = vcmp.lt.s32.totalorder %v5778_v37, 16  ;;  %v4808_v32 = vmul.u32 24, %v4807_v6  ;;  %v4827_v5 = vsel %vm4826_vm4, 1, %v10128_v22  ;;  %v4844_v60 = vand.u32 65535, %v9564_v62  ;;  %v3698_v52 = vpop.f32.mrf.mxu3 }
 0x351   : > { %v5970_v46 = vsel %vm5826_vm3, %v9504_v56, 0.0  ;;  %v4829_v27 = vadd.s32 %v4827_v5, %v4821_v8  ;;  %vm4830_vm5 = vc.u32 %v4828_v53, %v4824_v38  ;;  %v4845_v16 = vshrl.u32 %v9564_v62, 16  ;;  %v3064_v56 = vpop.f32.mrf.mxu2 }
 0x352   : > { %v6017_v1 = vadd.f32 %v9525_v31, %v5970_v46  ;;  %v6071_v21 = vmul.f32 %v5970_v46, %v5970_v46  ;;  %v4809_v42 = vsub.s32 %v9507_v35, %v4808_v32  ;;  %v4847_v44 = vmul.u32 43691, %v4844_v60  ;;  %v2632_v57 = vpop.f32.mrf.mxu1 }
 0x353   : > { %v4848_v2 = vmul.u32 43690, %v4844_v60  ;;  %v4831_v31 = vsel %vm4830_vm5, 1, %v10128_v22  ;;  %v4849_v35 = vmul.u32 43691, %v4845_v16  ;;  %v4850_v41 = vmul.u32 43690, %v4845_v16  ;;  %v4019_v38 = vpop.f32.mrf.mxu0 }
 0x354   : > { %v6118_v26 = vadd.f32 %v9532_v54, %v6071_v21  ;;  %vm5587_vm6 = vcmp.ne.s32.totalorder %v4809_v42, 0  ;;  %vm5635_vm7 = vcmp.lt.s32.totalorder %v4809_v42, 0  ;;  %v5731_v28 = vadd.s32 24, %v4809_v42  ;;  %v7415_v21 = vld [vmem:[%s7793_s27 + $0xc0] sm:$0xff] }
 0x355   : > { %vm5683_vm8 = vmand %vm5635_vm7, %vm5587_vm6  ;;  %v4851_v40 = vshll.u32 %v4848_v2, 16  ;;  %v4833_v15 = vadd.s32 %v4831_v31, %v4829_v27  ;;  %v4852_v18 = vshrl.u32 %v4848_v2, 16  ;;  %v7531_v50 = vpack.c.bf16 %v9572_v13, %v9568_v47 }
 0x356   : > { %v5779_v12 = vsel %vm5683_vm8, %v5731_v28, %v4809_v42  ;;  %v4853_v48 = vshll.u32 %v4849_v35, 16  ;;  %v4854_v54 = vshrl.u32 %v4849_v35, 16  ;;  %v2714_v61 = vadd.f32 %v2630_v30, %v10205_v14 }
 0x357   : > { %vm5827_vm9 = vcmp.lt.s32.totalorder %v5779_v12, 16  ;;  %vm4855_vm10 = vc.u32 %v4847_v44, %v4851_v40  ;;  %v4834_v43 = vadd.s32 %v4833_v15, %v4823_v33  ;;  %v4857_v0 = vadd.s32 %v4851_v40, %v4847_v44  ;;  %7610 = vst [vmem:[%s8941_s8 + $0x58] sm:$0xff] %v7531_v50  }
 0x358   : > { %v5971_v20 = vsel %vm5827_vm9, %v9522_v59, 0.0  ;;  %v4856_v34 = vsel %vm4855_vm10, 1, %v10128_v22  ;;  %v2481_v17 = vrot.slane %v9594_v58, 1  ;;  %v3525_v9 = vshrl.u32 %v9528_v3, 16  ;;  %v3700_v46 = vpop.f32.mrf.mxu3 }
 0x359   : > { %v9590_v19 = vadd.f32 %v6017_v1, %v5971_v20  ;;  %v6072_v11 = vmul.f32 %v5971_v20, %v5971_v20  ;;  %v4858_v24 = vadd.s32 %v4856_v34, %v4850_v41  ;;  %v4835_v29 = vadd.s32 %v4834_v43, %v4825_v45  ;;  %v3066_v39 = vpop.f32.mrf.mxu2 }
 0x35a   : > { %vm4859_vm11 = vc.u32 %v4857_v0, %v4853_v48  ;;  %v3529_v6 = vshll.u32 %v9585_v63, 16  ;;  %v3868_v8 = vrot.slane %v9585_v63, 1  ;;  %v2482_v30 = vsel %vm1052_vm1, %v2479_v10, %v2481_v17  ;;  %v2635_v41 = vpop.f32.mrf.mxu1 }
 0x35b   : > { %v9598_v59 = vadd.f32 %v6118_v26, %v6072_v11  ;;  %v4860_v49 = vsel %vm4859_vm11, 1, %v10128_v22  ;;  %v4836_v55 = vshrl.u32 %v4835_v29, 4  ;;  %v3527_v37 = vor.u32 %v3525_v9, %v9550_v23  ;;  %2669 = vmatmul.bf16.gmra.mxu1 %v2482_v30  ;;  %v10206_v23 = vld [vmem:[#allocation22_spill] sm:$0xff] }
 0x35c   : > { %v4862_v33 = vadd.s32 %v4860_v49, %v4858_v24  ;;  %v9609_v45 = vrot.slane %v3529_v6, 1  ;;  %v3869_v7 = vsel %vm1052_vm1, %v3866_v51, %v3868_v8  ;;  %v3148_v32 = vadd.f32 %v3064_v56, %v2714_v61  ;;  %3108 = vmatmul.bf16.gmra.mxu2 %v7415_v21  ;;  %v9639_v24 = vpop.f32.mrf.mxu0  ;;  %v10207_v21 = vld [vmem:[#allocation23_spill] sm:$0xff] }
 0x35d   : > { %v9617_v53 = vadd.s32 192, %v8565_v25  ;;  %v4837_v5 = vmul.u32 24, %v4836_v55  ;;  %4056 = vmatmul.bf16.gmra.mxu0 %v3869_v7  ;;  %v2715_v60 = vadd.f32 %v2632_v57, %v10206_v23  ;;  %v9621_v1 = vadd.s32 200, %v8565_v25 }
 0x35e   : > { %v4863_v10 = vadd.s32 %v4862_v33, %v4852_v18  ;;  %v3532_v3 = vsel %vm432_vm0, %v3527_v37, %v9609_v45  ;;  %v3782_v42 = vadd.f32 %v3698_v52, %v3148_v32 }
 0x35f   : > { %v4873_v51 = vand.u32 65535, %v9617_v53  ;;  %v4874_v27 = vshrl.u32 %v9617_v53, 16  ;;  %v4838_v16 = vsub.s32 %v9548_v4, %v4837_v5  ;;  %3737 = vmatmul.bf16.gmra.mxu3 %v3532_v3  ;;  %v3149_v2 = vadd.f32 %v3066_v39, %v2715_v60  ;;  %v9647_v5 = vld [vmem:[%s7793_s27 + $0xc8] sm:$0xff] }
 0x360   : > { %v4864_v44 = vadd.s32 %v4863_v10, %v4854_v54  ;;  %v4902_v56 = vand.u32 65535, %v9621_v1  ;;  %v9631_v26 = vadd.f32 %v9577_v36, %v3782_v42  ;;  %v4903_v20 = vshrl.u32 %v9621_v1, 16  ;;  %v3703_v49 = vpop.f32.mrf.mxu3 }
 0x361   : > { %v4876_v28 = vmul.u32 43691, %v4873_v51  ;;  %v4877_v31 = vmul.u32 43690, %v4873_v51  ;;  %v4878_v35 = vmul.u32 43691, %v4874_v27  ;;  %vm5588_vm12 = vcmp.ne.s32.totalorder %v4838_v16, 0  ;;  %v3069_v9 = vpop.f32.mrf.mxu2 }
 0x362   : > { %vm5636_vm13 = vcmp.lt.s32.totalorder %v4838_v16, 0  ;;  %v5732_v52 = vadd.s32 24, %v4838_v16  ;;  %v4865_v40 = vshrl.u32 %v4864_v44, 4  ;;  %v4879_v12 = vmul.u32 43690, %v4874_v27  ;;  %v2637_v10 = vpop.f32.mrf.mxu1 }
 0x363   : > { %vm5684_vm14 = vmand %vm5636_vm13, %vm5588_vm12  ;;  %v4880_v4 = vshll.u32 %v4877_v31, 16  ;;  %v4881_v15 = vshrl.u32 %v4877_v31, 16  ;;  %v4882_v18 = vshll.u32 %v4878_v35, 16  ;;  %v4883_v54 = vshrl.u32 %v4878_v35, 16 }
 0x364   : > { %v5780_v50 = vsel %vm5684_vm14, %v5732_v52, %v4838_v16  ;;  %v4866_v48 = vmul.u32 24, %v4865_v40  ;;  %v3783_v57 = vadd.f32 %v3700_v46, %v3149_v2  ;;  %v4905_v33 = vmul.u32 43691, %v4902_v56  ;;  %v9656_v2 = vld [vmem:[%s7793_s27 + $0xbc] sm:$0xff] }
 0x365   : > { %vm5828_vm15 = vcmp.lt.s32.totalorder %v5780_v50, 16  ;;  %vm4884_vm2 = vc.u32 %v4876_v28, %v4880_v4  ;;  %v4886_v36 = vadd.s32 %v4880_v4, %v4876_v28  ;;  %v4906_v30 = vmul.u32 43690, %v4902_v56  ;;  %v4024_v4 = vpop.f32.mrf.mxu0 }
 0x366   : > { %v5972_v43 = vsel %vm5828_vm15, %v9568_v47, 0.0  ;;  %v4867_v34 = vsub.s32 %v9564_v62, %v4866_v48  ;;  %v4885_v0 = vsel %vm4884_vm2, 1, %v10128_v22  ;;  %v9637_v11 = vadd.f32 %v4019_v38, %v3783_v57 }
 0x367   : > { %v6019_v14 = vadd.f32 %v9590_v19, %v5972_v43  ;;  %v6073_v61 = vmul.f32 %v5972_v43, %v5972_v43  ;;  %v4887_v29 = vadd.s32 %v4885_v0, %v4879_v12  ;;  %vm4888_vm3 = vc.u32 %v4886_v36, %v4882_v18 }
 0x368   : > { %vm5589_vm4 = vcmp.ne.s32.totalorder %v4867_v34, 0  ;;  %vm5637_vm5 = vcmp.lt.s32.totalorder %v4867_v34, 0  ;;  %v5733_v6 = vadd.s32 24, %v4867_v34  ;;  %v4889_v47 = vsel %vm4888_vm3, 1, %v10128_v22  ;;  %v3705_v57 = vpop.f32.mrf.mxu3 }
 0x369   : > { %v6120_v62 = vadd.f32 %v9598_v59, %v6073_v61  ;;  %vm5685_vm6 = vmand %vm5637_vm5, %vm5589_vm4  ;;  %v4891_v55 = vadd.s32 %v4889_v47, %v4887_v29  ;;  %v4907_v19 = vmul.u32 43691, %v4903_v20  ;;  %v4908_v38 = vmul.u32 43690, %v4903_v20  ;;  %v7416_v61 = vld [vmem:[%s7793_s27 + $0xc8] sm:$0xff] }
 0x36a   : > { %v5781_v37 = vsel %vm5685_vm6, %v5733_v6, %v4867_v34  ;;  %v7536_v7 = vpack.c.bf16 %v9637_v11, %v9631_v26  ;;  %v4909_v39 = vshll.u32 %v4906_v30, 16  ;;  %v4910_v46 = vshrl.u32 %v4906_v30, 16  ;;  %v2640_v47 = vpop.f32.mrf.mxu1 }
 0x36b   : > { %vm5829_vm7 = vcmp.lt.s32.totalorder %v5781_v37, 16  ;;  %v4892_v32 = vadd.s32 %v4891_v55, %v4881_v15  ;;  %v4911_v23 = vshll.u32 %v4907_v19, 16  ;;  %v4912_v60 = vshrl.u32 %v4907_v19, 16 }
 0x36c   : > { %v5973_v59 = vsel %vm5829_vm7, %v9572_v13, 0.0  ;;  %7611 = vst [vmem:[%s8941_s8 + $0x60] sm:$0xff] %v7536_v7   ;;  %v2716_v3 = vadd.f32 %v2635_v41, %v10207_v21  ;;  %vm4913_vm8 = vc.u32 %v4905_v33, %v4909_v39  ;;  %v4915_v44 = vadd.s32 %v4909_v39, %v4905_v33  ;;  %3113 = vmatmul.bf16.gmra.mxu2 %v7416_v61 }
 0x36d   : > { %v9652_v42 = vadd.f32 %v6019_v14, %v5973_v59  ;;  %v6074_v51 = vmul.f32 %v5973_v59, %v5973_v59  ;;  %v4893_v27 = vadd.s32 %v4892_v32, %v4883_v54  ;;  %v4914_v16 = vsel %vm4913_vm8, 1, %v10128_v22  ;;  %v3071_v54 = vpop.f32.mrf.mxu2 }
 0x36e   : > { %v2483_v56 = vrot.slane %v9656_v2, 1  ;;  %v3533_v28 = vshrl.u32 %v9585_v63, 16  ;;  %v4916_v35 = vadd.s32 %v4914_v16, %v4908_v38  ;;  %v3537_v41 = vshll.u32 %v9647_v5, 16 }
 0x36f   : > { %v9660_v13 = vadd.f32 %v6120_v62, %v6074_v51  ;;  %v4894_v31 = vshrl.u32 %v4893_v27, 4  ;;  %vm4917_vm9 = vc.u32 %v4915_v44, %v4911_v23  ;;  %v3870_v12 = vrot.slane %v9647_v5, 1 }
 0x370   : > { %v2484_v52 = vsel %vm1052_vm1, %v2481_v17, %v2483_v56  ;;  %v3535_v40 = vor.u32 %v3533_v28, %v9609_v45  ;;  %v4918_v18 = vsel %vm4917_vm9, 1, %v10128_v22  ;;  %v9671_v50 = vrot.slane %v3537_v41, 1  ;;  %v10208_v45 = vld [vmem:[#allocation25_spill] sm:$0xff] }
 0x371   : > { %v4895_v15 = vmul.u32 24, %v4894_v31  ;;  %2674 = vmatmul.bf16.gmra.mxu1 %v2484_v52  ;;  %v3150_v48 = vadd.f32 %v3069_v9, %v2716_v3  ;;  %v4920_v36 = vadd.s32 %v4918_v18, %v4916_v35  ;;  %v3871_v58 = vsel %vm1052_vm1, %v3868_v8, %v3870_v12  ;;  %v9699_v3 = vpop.f32.mrf.mxu0  ;;  %v3708_v31 = vpop.f32.mrf.mxu3 }
 0x372   : > { %v9679_v17 = vadd.s32 208, %v8565_v25  ;;  %v2717_v20 = vadd.f32 %v2637_v10, %v10208_v45  ;;  %v3540_v34 = vsel %vm432_vm0, %v3535_v40, %v9671_v50  ;;  %4061 = vmatmul.bf16.gmra.mxu0 %v3871_v58  ;;  %v9686_v14 = vadd.s32 216, %v8565_v25  ;;  %v10209_v45 = vld [vmem:[#allocation26_spill] sm:$0xff] }
 0x373   : > { %v4896_v43 = vsub.s32 %v9617_v53, %v4895_v15  ;;  %v3784_v0 = vadd.f32 %v3703_v49, %v3150_v48  ;;  %v4921_v29 = vadd.s32 %v4920_v36, %v4910_v46  ;;  %3742 = vmatmul.bf16.gmra.mxu3 %v3540_v34 }
 0x374   : > { %v4931_v63 = vand.u32 65535, %v9679_v17  ;;  %v4932_v8 = vshrl.u32 %v9679_v17, 16  ;;  %v3151_v9 = vadd.f32 %v3071_v54, %v2717_v20  ;;  %v4960_v38 = vand.u32 65535, %v9686_v14 }
 0x375   : > { %vm5590_vm10 = vcmp.ne.s32.totalorder %v4896_v43, 0  ;;  %vm5638_vm11 = vcmp.lt.s32.totalorder %v4896_v43, 0  ;;  %v5734_v6 = vadd.s32 24, %v4896_v43  ;;  %v9692_v53 = vadd.f32 %v9639_v24, %v3784_v0  ;;  %v3074_v28 = vpop.f32.mrf.mxu2  ;;  %v9719_v0 = vld [vmem:[%s7793_s27 + $0xd0] sm:$0xff] }
 0x376   : > { %vm5686_vm12 = vmand %vm5638_vm11, %vm5590_vm10  ;;  %v4922_v49 = vadd.s32 %v4921_v29, %v4912_v60  ;;  %v4934_v62 = vmul.u32 43691, %v4931_v63  ;;  %v4935_v55 = vmul.u32 43690, %v4931_v63  ;;  %v4936_v33 = vmul.u32 43691, %v4932_v8 }
 0x377   : > { %v5782_v30 = vsel %vm5686_vm12, %v5734_v6, %v4896_v43  ;;  %v4937_v37 = vmul.u32 43690, %v4932_v8  ;;  %v3785_v19 = vadd.f32 %v3705_v57, %v3151_v9  ;;  %v4961_v16 = vshrl.u32 %v9686_v14, 16  ;;  %v2642_v57 = vpop.f32.mrf.mxu1  ;;  %v9715_v43 = vld [vmem:[%s7793_s27 + $0xc4] sm:$0xff] }
 0x378   : > { %vm5830_vm13 = vcmp.lt.s32.totalorder %v5782_v30, 16  ;;  %v4923_v7 = vshrl.u32 %v4922_v49, 4  ;;  %v4938_v32 = vshll.u32 %v4935_v55, 16  ;;  %v4939_v39 = vshrl.u32 %v4935_v55, 16 }
 0x379   : > { %v5974_v46 = vsel %vm5830_vm13, %v9631_v26, 0.0  ;;  %v4940_v24 = vshll.u32 %v4936_v33, 16  ;;  %v4941_v10 = vshrl.u32 %v4936_v33, 16  ;;  %v9696_v59 = vadd.f32 %v4024_v4, %v3785_v19 }
 0x37a   : > { %v6021_v23 = vadd.f32 %v9652_v42, %v5974_v46  ;;  %v6075_v60 = vmul.f32 %v5974_v46, %v5974_v46  ;;  %v4924_v21 = vmul.u32 24, %v4923_v7  ;;  %vm4942_vm14 = vc.u32 %v4934_v62, %v4938_v32 }
 0x37b   : > { %v4943_v51 = vsel %vm4942_vm14, 1, %v10128_v22  ;;  %v4944_v27 = vadd.s32 %v4938_v32, %v4934_v62  ;;  %v4963_v44 = vmul.u32 43691, %v4960_v38  ;;  %v4964_v42 = vmul.u32 43690, %v4960_v38  ;;  %v3710_v32 = vpop.f32.mrf.mxu3 }
 0x37c   : > { %v6122_v26 = vadd.f32 %v9660_v13, %v6075_v60  ;;  %v4925_v35 = vsub.s32 %v9621_v1, %v4924_v21  ;;  %v4945_v41 = vadd.s32 %v4943_v51, %v4937_v37  ;;  %v9705_v52 = vmul.u32 43691, %v4961_v16  ;;  %v4029_v37 = vpop.f32.mrf.mxu0  ;;  %v10210_v60 = vld [vmem:[#allocation27_spill] sm:$0xff] }
 0x37d   : > { %vm4946_vm15 = vc.u32 %v4944_v27, %v4940_v24  ;;  %v4966_v40 = vmul.u32 43690, %v4961_v16  ;;  %v7541_v4 = vpack.c.bf16 %v9696_v59, %v9692_v53  ;;  %v4967_v1 = vshll.u32 %v4964_v42, 16  ;;  %v3076_v7 = vpop.f32.mrf.mxu2 }
 0x37e   : > { %vm5591_vm2 = vcmp.ne.s32.totalorder %v4925_v35, 0  ;;  %vm5639_vm3 = vcmp.lt.s32.totalorder %v4925_v35, 0  ;;  %v5735_v15 = vadd.s32 24, %v4925_v35  ;;  %v4947_v18 = vsel %vm4946_vm15, 1, %v10128_v22 }
 0x37f   : > { %vm5687_vm4 = vmand %vm5639_vm3, %vm5591_vm2  ;;  %v4949_v13 = vadd.s32 %v4947_v18, %v4945_v41  ;;  %v4968_v48 = vshrl.u32 %v4964_v42, 16  ;;  %v4969_v54 = vshll.u32 %v9705_v52, 16  ;;  %7612 = vst [vmem:[%s8941_s8 + $0x68] sm:$0xff] %v7541_v4   ;;  %v4970_v58 = vshrl.u32 %v9705_v52, 16  ;;  %v2645_v41 = vpop.f32.mrf.mxu1 }
 0x380   : > { %v5783_v36 = vsel %vm5687_vm4, %v5735_v15, %v4925_v35  ;;  %v2718_v20 = vadd.f32 %v2640_v47, %v10209_v45  ;;  %v2485_v34 = vrot.slane %v9715_v43, 1  ;;  %vm4971_vm6 = vc.u32 %v4963_v44, %v4967_v1 }
 0x381   : > { %vm5831_vm5 = vcmp.lt.s32.totalorder %v5783_v36, 16  ;;  %v4950_v61 = vadd.s32 %v4949_v13, %v4939_v39  ;;  %v4973_v29 = vadd.s32 %v4967_v1, %v4963_v44  ;;  %v4972_v8 = vsel %vm4971_vm6, 1, %v10128_v22 }
 0x382   : > { %v5975_v63 = vsel %vm5831_vm5, %v9637_v11, 0.0  ;;  %v2486_v9 = vsel %vm1052_vm1, %v2483_v56, %v2485_v34  ;;  %v3541_v6 = vshrl.u32 %v9647_v5, 16  ;;  %v4974_v55 = vadd.s32 %v4972_v8, %v4966_v40 }
 0x383   : > { %v9729_v47 = vadd.f32 %v6021_v23, %v5975_v63  ;;  %v6076_v49 = vmul.f32 %v5975_v63, %v5975_v63  ;;  %v4951_v62 = vadd.s32 %v4950_v61, %v4941_v10  ;;  %2679 = vmatmul.bf16.gmra.mxu1 %v2486_v9  ;;  %vm4975_vm7 = vc.u32 %v4973_v29, %v4969_v54 }
 0x384   : > { %v3543_v33 = vor.u32 %v3541_v6, %v9671_v50  ;;  %v3545_v11 = vshll.u32 %v9719_v0, 16  ;;  %v3872_v30 = vrot.slane %v9719_v0, 1  ;;  %v4976_v56 = vsel %vm4975_vm7, 1, %v10128_v22  ;;  %v3713_v6 = vpop.f32.mrf.mxu3 }
 0x385   : > { %v9734_v19 = vadd.f32 %v6122_v26, %v6076_v49  ;;  %v4952_v2 = vshrl.u32 %v4951_v62, 4  ;;  %v3152_v38 = vadd.f32 %v3074_v28, %v2718_v20  ;;  %v4978_v39 = vadd.s32 %v4976_v56, %v4974_v55  ;;  %v9766_v20 = vpop.f32.mrf.mxu0  ;;  %v3079_v9 = vpop.f32.mrf.mxu2 }
 0x386   : > { %v9737_v46 = vrot.slane %v3545_v11, 1  ;;  %v3873_v50 = vsel %vm1052_vm1, %v3870_v12, %v3872_v30  ;;  %v9745_v24 = vadd.s32 224, %v8565_v25  ;;  %v2719_v21 = vadd.f32 %v2642_v57, %v10210_v60  ;;  %v7417_v12 = vld [vmem:[%s7793_s27 + $0xd0] sm:$0xff] }
 0x387   : > { %v4953_v10 = vmul.u32 24, %v4952_v2  ;;  %4066 = vmatmul.bf16.gmra.mxu0 %v3873_v50  ;;  %v3786_v23 = vadd.f32 %v3708_v31, %v3152_v38  ;;  %v9749_v51 = vadd.s32 232, %v8565_v25  ;;  %v4979_v27 = vadd.s32 %v4978_v39, %v4968_v48  ;;  %3118 = vmatmul.bf16.gmra.mxu2 %v7417_v12  ;;  %v2647_v39 = vpop.f32.mrf.mxu1  ;;  %v10211_v60 = vld [vmem:[#allocation28_spill] sm:$0xff] }
 0x388   : > { %v3548_v16 = vsel %vm432_vm0, %v3543_v33, %v9737_v46  ;;  %v4989_v44 = vand.u32 65535, %v9745_v24  ;;  %v4990_v5 = vshrl.u32 %v9745_v24, 16  ;;  %v3153_v31 = vadd.f32 %v3076_v7, %v2719_v21  ;;  %v10212_v12 = vld [vmem:[#allocation24_spill] sm:$0xff] }
 0x389   : > { %v4954_v28 = vsub.s32 %v9679_v17, %v4953_v10  ;;  %3747 = vmatmul.bf16.gmra.mxu3 %v3548_v16  ;;  %v9758_v26 = vadd.f32 %v9699_v3, %v3786_v23  ;;  %v5018_v35 = vand.u32 65535, %v9749_v51  ;;  %v4980_v42 = vadd.s32 %v4979_v27, %v4970_v58  ;;  %v3220_v27 = vld [vmem:[%s7793_s27 + $0xd8] sm:$0x1]  ;;  %s6389_s27 = sshll.u32 %s10239_s12, 1 }
 0x38a   : > { %v4992_v52 = vmul.u32 43691, %v4989_v44  ;;  %v4993_v40 = vmul.u32 43690, %v4989_v44  ;;  %v9761_v4 = vmul.u32 43691, %v4990_v5  ;;  %v4995_v18 = vmul.u32 43690, %v4990_v5  ;;  %s226_s11 = scalar_lea.vmem %s10071_s3, %s6389_s27 }
 0x38b   : > { %vm5592_vm8 = vcmp.ne.s32.totalorder %v4954_v28, 0  ;;  %vm5640_vm9 = vcmp.lt.s32.totalorder %v4954_v28, 0  ;;  %v5736_v15 = vadd.s32 24, %v4954_v28  ;;  %v4981_v17 = vshrl.u32 %v4980_v42, 4 }
 0x38c   : > { %vm5688_vm10 = vmand %vm5640_vm9, %vm5592_vm8  ;;  %v4996_v13 = vshll.u32 %v4993_v40, 16  ;;  %v4997_v1 = vshrl.u32 %v4993_v40, 16  ;;  %v4998_v3 = vshll.u32 %v9761_v4, 16  ;;  %v4999_v54 = vshrl.u32 %v9761_v4, 16 }
 0x38d   : > { %v5784_v48 = vsel %vm5688_vm10, %v5736_v15, %v4954_v28  ;;  %v3787_v57 = vadd.f32 %v3710_v32, %v3153_v31  ;;  %v5019_v36 = vshrl.u32 %v9749_v51, 16  ;;  %v4982_v58 = vmul.u32 24, %v4981_v17 }
 0x38e   : > { %vm5832_vm11 = vcmp.lt.s32.totalorder %v5784_v48, 16  ;;  %vm5000_vm12 = vc.u32 %v4992_v52, %v4996_v13  ;;  %v5002_v45 = vadd.s32 %v4996_v13, %v4992_v52  ;;  %v5021_v8 = vmul.u32 43691, %v5018_v35 }
 0x38f   : > { %v5976_v61 = vsel %vm5832_vm11, %v9692_v53, 0.0  ;;  %v5001_v29 = vsel %vm5000_vm12, 1, %v10128_v22  ;;  %v9770_v63 = vadd.f32 %v4029_v37, %v3787_v57  ;;  %v4983_v55 = vsub.s32 %v9686_v14, %v4982_v58 }
 0x390   : > { %v6023_v49 = vadd.f32 %v9729_v47, %v5976_v61  ;;  %v6077_v62 = vmul.f32 %v5976_v61, %v5976_v61  ;;  %v5003_v33 = vadd.s32 %v5001_v29, %v4995_v18  ;;  %vm5004_vm13 = vc.u32 %v5002_v45, %v4998_v3  ;;  %v3715_v3 = vpop.f32.mrf.mxu3  ;;  %v9801_v29 = vpop.f32.mrf.mxu1 }
 0x391   : > { %v5022_v11 = vmul.u32 43690, %v5018_v35  ;;  %v5023_v2 = vmul.u32 43691, %v5019_v36  ;;  %v5024_v56 = vmul.u32 43690, %v5019_v36  ;;  %vm5593_vm14 = vcmp.ne.s32.totalorder %v4983_v55, 0  ;;  %v10213_v36 = vld [vmem:[#allocation29_spill] sm:$0xff] }
 0x392   : > { %v6124_v38 = vadd.f32 %v9734_v19, %v6077_v62  ;;  %vm5641_vm15 = vcmp.lt.s32.totalorder %v4983_v55, 0  ;;  %v5737_v53 = vadd.s32 24, %v4983_v55  ;;  %v5005_v37 = vsel %vm5004_vm13, 1, %v10128_v22 }
 0x393   : > { %vm5689_vm2 = vmand %vm5641_vm15, %vm5593_vm14  ;;  %v5025_v7 = vshll.u32 %v5022_v11, 16  ;;  %v5026_v47 = vshrl.u32 %v5022_v11, 16  ;;  %v5027_v32 = vshll.u32 %v5023_v2, 16  ;;  %v5007_v50 = vadd.s32 %v5005_v37, %v5003_v33 }
 0x394   : > { %v5785_v14 = vsel %vm5689_vm2, %v5737_v53, %v4983_v55  ;;  %v5028_v10 = vshrl.u32 %v5023_v2, 16  ;;  %v7546_v23 = vpack.c.bf16 %v9770_v63, %v9758_v26  ;;  %v2720_v21 = vadd.f32 %v2645_v41, %v10211_v60 }
 0x395   : > { %vm5833_vm3 = vcmp.lt.s32.totalorder %v5785_v14, 16  ;;  %vm5029_vm4 = vc.u32 %v5021_v8, %v5025_v7  ;;  %v5031_v19 = vadd.s32 %v5025_v7, %v5021_v8  ;;  %v5008_v44 = vadd.s32 %v5007_v50, %v4997_v1  ;;  %v3081_v1 = vpop.f32.mrf.mxu2 }
 0x396   : > { %v5977_v16 = vsel %vm5833_vm3, %v9696_v59, 0.0  ;;  %v5030_v5 = vsel %vm5029_vm4, 1, %v10128_v22  ;;  %7613 = vst [vmem:[%s8941_s8 + $0x70] sm:$0xff] %v7546_v23   ;;  %v2487_v28 = vrot.slane %v10212_v12, 1  ;;  %v3335_v4 = vunpack.c.l.b16 %v3220_v27  ;;  %v4034_v59 = vpop.f32.mrf.mxu0 }
 0x397   : > { %v9784_v31 = vadd.f32 %v6023_v49, %v5977_v16  ;;  %v6078_v35 = vmul.f32 %v5977_v16, %v5977_v16  ;;  %v5032_v42 = vadd.s32 %v5030_v5, %v5024_v56  ;;  %vm5033_vm5 = vc.u32 %v5031_v19, %v5027_v32 }
 0x398   : > { %v5009_v52 = vadd.s32 %v5008_v44, %v4999_v54  ;;  %v5034_v40 = vsel %vm5033_vm5, 1, %v10128_v22  ;;  %v2488_v41 = vsel %vm1052_vm1, %v2485_v34, %v2487_v28  ;;  %v3549_v17 = vshrl.u32 %v9719_v0, 16 }
 0x399   : > { %v9790_v15 = vadd.f32 %v6124_v38, %v6078_v35  ;;  %v5036_v18 = vadd.s32 %v5034_v40, %v5032_v42  ;;  %2684 = vmatmul.bf16.gmra.mxu1 %v2488_v41  ;;  %v3154_v13 = vadd.f32 %v3079_v9, %v2720_v21  ;;  %v3360_v57 = vpack.c.b16 %v3335_v4, %v3335_v4 }
 0x39a   : > { %v5010_v48 = vshrl.u32 %v5009_v52, 4  ;;  %v9794_v54 = vadd.s32 240, %v8565_v25  ;;  %v2721_v43 = vadd.f32 %v2647_v39, %v10213_v36  ;;  %v3551_v34 = vor.u32 %v3549_v17, %v9737_v46  ;;  %v2652_v52 = vpop.f32.mrf.mxu1 }
 0x39b   : > { %v5037_v58 = vadd.s32 %v5036_v18, %v5026_v47  ;;  %v3788_v45 = vadd.f32 %v3713_v6, %v3154_v13  ;;  %v9799_v61 = vadd.s32 248, %v8565_v25  ;;  %v3553_v9 = vshll.u32 %v3360_v57, 16 }
 0x39c   : > { %v5011_v8 = vmul.u32 24, %v5010_v48  ;;  %v3874_v49 = vrot.slane %v3360_v57, 1  ;;  %v5047_v62 = vand.u32 65535, %v9794_v54  ;;  %v5048_v11 = vshrl.u32 %v9794_v54, 16 }
 0x39d   : > { %v5038_v55 = vadd.s32 %v5037_v58, %v5028_v10  ;;  %v9805_v33 = vadd.f32 %v9766_v20, %v3788_v45  ;;  %v3155_v2 = vadd.f32 %v3081_v1, %v2721_v43  ;;  %v3555_v6 = vrot.slane %v3553_v9, 1  ;;  %v3084_v0 = vpop.f32.mrf.mxu2  ;;  %v3718_v10 = vpop.f32.mrf.mxu3 }
 0x39e   : > { %v5012_v46 = vsub.s32 %v9745_v24, %v5011_v8  ;;  %v3875_v56 = vsel %vm1052_vm1, %v3872_v30, %v3874_v49  ;;  %v5050_v38 = vmul.u32 43691, %v5047_v62  ;;  %v5051_v37 = vmul.u32 43690, %v5047_v62  ;;  %v4037_v16 = vpop.f32.mrf.mxu0 }
 0x39f   : > { %v5039_v53 = vshrl.u32 %v5038_v55, 4  ;;  %4071 = vmatmul.bf16.gmra.mxu0 %v3875_v56  ;;  %v5052_v7 = vmul.u32 43691, %v5048_v11  ;;  %v5053_v47 = vmul.u32 43690, %v5048_v11  ;;  %v3556_v32 = vsel %vm432_vm0, %v3551_v34, %v3555_v6  ;;  %v10215_v56 = vld [vmem:[#allocation13_spill] sm:$0xff] }
 0x3a0   : > { %vm5594_vm6 = vcmp.ne.s32.totalorder %v5012_v46, 0  ;;  %vm5642_vm7 = vcmp.lt.s32.totalorder %v5012_v46, 0  ;;  %v5738_v20 = vadd.s32 24, %v5012_v46  ;;  %3752 = vmatmul.bf16.gmra.mxu3 %v3556_v32  ;;  %v5054_v24 = vshll.u32 %v5051_v37, 16 }
 0x3a1   : > { %vm5690_vm8 = vmand %vm5642_vm7, %vm5594_vm6  ;;  %v5040_v39 = vmul.u32 24, %v5039_v53  ;;  %v5055_v14 = vshrl.u32 %v5051_v37, 16  ;;  %v5056_v50 = vshll.u32 %v5052_v7, 16  ;;  %v5057_v23 = vshrl.u32 %v5052_v7, 16 }
 0x3a2   : > { %v5786_v30 = vsel %vm5690_vm8, %v5738_v20, %v5012_v46  ;;  %v3789_v19 = vadd.f32 %v3715_v3, %v3155_v2  ;;  %v5076_v60 = vand.u32 65535, %v9799_v61  ;;  %vm5058_vm9 = vc.u32 %v5050_v38, %v5054_v24  ;;  %v9838_v53 = vpop.f32.mrf.mxu1 }
 0x3a3   : > { %vm5834_vm1 = vcmp.lt.s32.totalorder %v5786_v30, 16  ;;  %v5041_v21 = vsub.s32 %v9749_v51, %v5040_v39  ;;  %v5060_v27 = vadd.s32 %v5054_v24, %v5050_v38  ;;  %v5059_v5 = vsel %vm5058_vm9, 1, %v10128_v22 }
 0x3a4   : > { %v5978_v44 = vsel %vm5834_vm1, %v9758_v26, 0.0  ;;  %v9817_v12 = vadd.f32 %v4034_v59, %v3789_v19  ;;  %v5077_v28 = vshrl.u32 %v9799_v61, 16  ;;  %v5061_v51 = vadd.s32 %v5059_v5, %v5053_v47 }
 0x3a5   : > { %v6025_v35 = vadd.f32 %v9784_v31, %v5978_v44  ;;  %v6079_v42 = vmul.f32 %v5978_v44, %v5978_v44  ;;  %vm5595_vm0 = vcmp.ne.s32.totalorder %v5041_v21, 0  ;;  %vm5643_vm10 = vcmp.lt.s32.totalorder %v5041_v21, 0  ;;  %v3086_v49 = vpop.f32.mrf.mxu2  ;;  %v3720_v62 = vpop.f32.mrf.mxu3 }
 0x3a6   : > { %vm5691_vm11 = vmand %vm5643_vm10, %vm5595_vm0  ;;  %v5739_v40 = vadd.s32 24, %v5041_v21  ;;  %vm5062_vm12 = vc.u32 %v5060_v27, %v5056_v50  ;;  %v5079_v41 = vmul.u32 43691, %v5076_v60  ;;  %v5080_v59 = vmul.u32 43690, %v5076_v60  ;;  %v4039_v38 = vpop.f32.mrf.mxu0 }
 0x3a7   : > { %v6126_v26 = vadd.f32 %v9790_v15, %v6079_v42  ;;  %v5063_v4 = vsel %vm5062_vm12, 1, %v10128_v22  ;;  %v5081_v18 = vmul.u32 43691, %v5077_v28  ;;  %v5082_v1 = vmul.u32 43690, %v5077_v28  ;;  %v10214_v15 = vld [vmem:[#allocation30_spill] sm:$0xff] }
 0x3a8   : > { %v5787_v17 = vsel %vm5691_vm11, %v5739_v40, %v5041_v21  ;;  %v5065_v13 = vadd.s32 %v5063_v4, %v5061_v51  ;;  %v7551_v31 = vpack.c.bf16 %v9817_v12, %v9805_v33  ;;  %v5083_v3 = vshll.u32 %v5080_v59, 16 }
 0x3a9   : > { %vm5835_vm13 = vcmp.lt.s32.totalorder %v5787_v17, 16  ;;  %v5084_v48 = vshrl.u32 %v5080_v59, 16  ;;  %v5085_v57 = vshll.u32 %v5081_v18, 16  ;;  %v5086_v58 = vshrl.u32 %v5081_v18, 16 }
 0x3aa   : > { %v5979_v36 = vsel %vm5835_vm13, %v9770_v63, 0.0  ;;  %v5066_v43 = vadd.s32 %v5065_v13, %v5055_v14  ;;  %7614 = vst [vmem:[%s8941_s8 + $0x78] sm:$0xff] %v7551_v31   ;;  %v2722_v34 = vadd.f32 %v9801_v29, %v10214_v15  ;;  %vm5087_vm14 = vc.u32 %v5079_v41, %v5083_v3  ;;  %v2657_v31 = vpop.f32.mrf.mxu1 }
 0x3ab   : > { %v9829_v45 = vadd.f32 %v6025_v35, %v5979_v36  ;;  %v6080_v8 = vmul.f32 %v5979_v36, %v5979_v36  ;;  %v5089_v9 = vadd.s32 %v5083_v3, %v5079_v41  ;;  %v5088_v11 = vsel %vm5087_vm14, 1, %v10128_v22 }
 0x3ac   : > { %v5067_v55 = vadd.s32 %v5066_v43, %v5057_v23  ;;  %v3156_v2 = vadd.f32 %v3084_v0, %v2722_v34  ;;  %v9833_v46 = vadd.s32 256, %v8565_v25  ;;  %v5090_v6 = vadd.s32 %v5088_v11, %v5082_v1 }
 0x3ad   : > { %v9835_v63 = vadd.f32 %v6126_v26, %v6080_v8  ;;  %vm5091_vm15 = vc.u32 %v5089_v9, %v5085_v57  ;;  %v2723_v29 = vadd.f32 %v2652_v52, %v10215_v56  ;;  %v9844_v14 = vadd.s32 264, %v8565_v25  ;;  %v3089_v51 = vpop.f32.mrf.mxu2  ;;  %v3723_v59 = vpop.f32.mrf.mxu3 }
 0x3ae   : > { %v5068_v37 = vshrl.u32 %v5067_v55, 4  ;;  %v5092_v7 = vsel %vm5091_vm15, 1, %v10128_v22  ;;  %v3790_v47 = vadd.f32 %v3718_v10, %v3156_v2  ;;  %v5105_v20 = vand.u32 65535, %v9833_v46  ;;  %v4042_v57 = vpop.f32.mrf.mxu0 }
 0x3af   : > { %v5094_v32 = vadd.s32 %v5092_v7, %v5090_v6  ;;  %v5106_v39 = vshrl.u32 %v9833_v46, 16  ;;  %v3157_v24 = vadd.f32 %v3086_v49, %v2723_v29  ;;  %v5134_v28 = vand.u32 65535, %v9844_v14  ;;  %v10216_v7 = vld [vmem:[#allocation2_spill] sm:$0xff] }
 0x3b0   : > { %v5069_v50 = vmul.u32 24, %v5068_v37  ;;  %v9846_v0 = vadd.f32 %v4037_v16, %v3790_v47  ;;  %v5108_v30 = vmul.u32 43691, %v5105_v20  ;;  %v5109_v23 = vmul.u32 43690, %v5105_v20 }
 0x3b1   : > { %v5095_v19 = vadd.s32 %v5094_v32, %v5084_v48  ;;  %v5110_v60 = vmul.u32 43691, %v5106_v39  ;;  %v5111_v21 = vmul.u32 43690, %v5106_v39  ;;  %v3791_v27 = vadd.f32 %v3720_v62, %v3157_v24  ;;  %v10217_v32 = vld [vmem:[#allocation3_spill] sm:$0xff] }
 0x3b2   : > { %v5070_v10 = vsub.s32 %v9794_v54, %v5069_v50  ;;  %v5112_v44 = vshll.u32 %v5109_v23, 16  ;;  %v5113_v5 = vshrl.u32 %v5109_v23, 16  ;;  %v5135_v54 = vshrl.u32 %v9844_v14, 16 }
 0x3b3   : > { %v5096_v35 = vadd.s32 %v5095_v19, %v5086_v58  ;;  %v5114_v42 = vshll.u32 %v5110_v60, 16  ;;  %v5115_v52 = vshrl.u32 %v5110_v60, 16  ;;  %v9850_v40 = vadd.f32 %v4039_v38, %v3791_v27 }
 0x3b4   : > { %vm5596_vm2 = vcmp.ne.s32.totalorder %v5070_v10, 0  ;;  %vm5644_vm3 = vcmp.lt.s32.totalorder %v5070_v10, 0  ;;  %v5740_v16 = vadd.s32 24, %v5070_v10  ;;  %vm5116_vm4 = vc.u32 %v5108_v30, %v5112_v44 }
 0x3b5   : > { %vm5692_vm5 = vmand %vm5644_vm3, %vm5596_vm2  ;;  %v5097_v41 = vshrl.u32 %v5096_v35, 4  ;;  %v5117_v26 = vsel %vm5116_vm4, 1, %v10128_v22  ;;  %v5118_v4 = vadd.s32 %v5112_v44, %v5108_v30  ;;  %v5137_v13 = vmul.u32 43691, %v5134_v28  ;;  %v3725_v19 = vpop.f32.mrf.mxu3 }
 0x3b6   : > { %v5788_v18 = vsel %vm5692_vm5, %v5740_v16, %v5070_v10  ;;  %v5119_v17 = vadd.s32 %v5117_v26, %v5111_v21  ;;  %v5138_v1 = vmul.u32 43690, %v5134_v28  ;;  %v5139_v48 = vmul.u32 43691, %v5135_v54  ;;  %v2660_v10 = vpop.f32.mrf.mxu1 }
 0x3b7   : > { %vm5836_vm6 = vcmp.lt.s32.totalorder %v5788_v18, 16  ;;  %v5098_v3 = vmul.u32 24, %v5097_v41  ;;  %vm5120_vm7 = vc.u32 %v5118_v4, %v5114_v42  ;;  %v5140_v58 = vmul.u32 43690, %v5135_v54  ;;  %v4044_v42 = vpop.f32.mrf.mxu0 }
 0x3b8   : > { %v5980_v36 = vsel %vm5836_vm6, %v9805_v33, 0.0  ;;  %v5121_v43 = vsel %vm5120_vm7, 1, %v10128_v22  ;;  %v5141_v15 = vshll.u32 %v5138_v1, 16  ;;  %v5142_v62 = vshrl.u32 %v5138_v1, 16 }
 0x3b9   : > { %v6027_v34 = vadd.f32 %v9829_v45, %v5980_v36  ;;  %v6081_v8 = vmul.f32 %v5980_v36, %v5980_v36  ;;  %v5099_v9 = vsub.s32 %v9799_v61, %v5098_v3  ;;  %v5123_v49 = vadd.s32 %v5121_v43, %v5119_v17  ;;  %v3091_v61 = vpop.f32.mrf.mxu2 }
 0x3ba   : > { %v5143_v55 = vshll.u32 %v5139_v48, 16  ;;  %v5144_v11 = vshrl.u32 %v5139_v48, 16  ;;  %vm5145_vm8 = vc.u32 %v5137_v13, %v5141_v15  ;;  %v5147_v29 = vadd.s32 %v5141_v15, %v5137_v13 }
 0x3bb   : > { %v6128_v2 = vadd.f32 %v9835_v63, %v6081_v8  ;;  %vm5597_vm1 = vcmp.ne.s32.totalorder %v5099_v9, 0  ;;  %vm5645_vm9 = vcmp.lt.s32.totalorder %v5099_v9, 0  ;;  %v5741_v33 = vadd.s32 24, %v5099_v9 }
 0x3bc   : > { %vm5693_vm0 = vmand %vm5645_vm9, %vm5597_vm1  ;;  %v5124_v6 = vadd.s32 %v5123_v49, %v5113_v5  ;;  %v5146_v56 = vsel %vm5145_vm8, 1, %v10128_v22  ;;  %v7556_v45 = vpack.c.bf16 %v9850_v40, %v9846_v0  ;;  %v2724_v47 = vadd.f32 %v9838_v53, %v10216_v7 }
 0x3bd   : > { %v5789_v38 = vsel %vm5693_vm0, %v5741_v33, %v5099_v9  ;;  %v5148_v37 = vadd.s32 %v5146_v56, %v5140_v58  ;;  %v9865_v63 = vadd.s32 272, %v8565_v25  ;;  %vm5149_vm11 = vc.u32 %v5147_v29, %v5143_v55  ;;  %v10218_v56 = vld [vmem:[#allocation4_spill] sm:$0xff] }
 0x3be   : > { %vm5837_vm10 = vcmp.lt.s32.totalorder %v5789_v38, 16  ;;  %v5125_v20 = vadd.s32 %v5124_v6, %v5115_v52  ;;  %7615 = vst [vmem:[%s8941_s8 + $0x80] sm:$0xff] %v7556_v45   ;;  %v2725_v39 = vadd.f32 %v2657_v31, %v10217_v32  ;;  %v5150_v50 = vsel %vm5149_vm11, 1, %v10128_v22  ;;  %v2662_v45 = vpop.f32.mrf.mxu1 }
 0x3bf   : > { %v5981_v24 = vsel %vm5837_vm10, %v9817_v12, 0.0  ;;  %v3158_v30 = vadd.f32 %v3089_v51, %v2724_v47  ;;  %v5163_v23 = vand.u32 65535, %v9865_v63  ;;  %v5152_v27 = vadd.s32 %v5150_v50, %v5148_v37  ;;  %v4047_v47 = vpop.f32.mrf.mxu0 }
 0x3c0   : > { %v6028_v60 = vadd.f32 %v6027_v34, %v5981_v24  ;;  %v6082_v21 = vmul.f32 %v5981_v24, %v5981_v24  ;;  %v5126_v53 = vshrl.u32 %v5125_v20, 4  ;;  %v5164_v5 = vshrl.u32 %v9865_v63, 16 }
 0x3c1   : > { %v3792_v44 = vadd.f32 %v3723_v59, %v3158_v30  ;;  %v5166_v28 = vmul.u32 43691, %v5163_v23  ;;  %v5167_v35 = vmul.u32 43690, %v5163_v23  ;;  %v5153_v12 = vadd.s32 %v5152_v27, %v5142_v62  ;;  %v3094_v43 = vpop.f32.mrf.mxu2 }
 0x3c2   : > { %v6129_v52 = vadd.f32 %v6128_v2, %v6082_v21  ;;  %v5127_v16 = vmul.u32 24, %v5126_v53  ;;  %v3159_v41 = vadd.f32 %v3091_v61, %v2725_v39  ;;  %v5168_v51 = vmul.u32 43691, %v5164_v5 }
 0x3c3   : > { %v9873_v26 = vadd.f32 %v4042_v57, %v3792_v44  ;;  %v5169_v4 = vmul.u32 43690, %v5164_v5  ;;  %v5170_v54 = vshll.u32 %v5167_v35, 16  ;;  %v5154_v17 = vadd.s32 %v5153_v12, %v5144_v11  ;;  %v3728_v11 = vpop.f32.mrf.mxu3 }
 0x3c4   : > { %v5128_v18 = vsub.s32 %v9833_v46, %v5127_v16  ;;  %v5171_v13 = vshrl.u32 %v5167_v35, 16  ;;  %v3793_v1 = vadd.f32 %v3725_v19, %v3159_v41  ;;  %v5172_v59 = vshll.u32 %v5168_v51, 16  ;;  %v10219_v41 = vld [vmem:[#allocation5_spill] sm:$0xff] }
 0x3c5   : > { %v5173_v31 = vshrl.u32 %v5168_v51, 16  ;;  %vm5174_vm12 = vc.u32 %v5166_v28, %v5170_v54  ;;  %v5176_v3 = vadd.s32 %v5170_v54, %v5166_v28  ;;  %v5155_v36 = vshrl.u32 %v5154_v17, 4 }
 0x3c6   : > { %vm5598_vm13 = vcmp.ne.s32.totalorder %v5128_v18, 0  ;;  %vm5646_vm14 = vcmp.lt.s32.totalorder %v5128_v18, 0  ;;  %v5742_v48 = vadd.s32 24, %v5128_v18  ;;  %v5175_v57 = vsel %vm5174_vm12, 1, %v10128_v22 }
 0x3c7   : > { %vm5694_vm15 = vmand %vm5646_vm14, %vm5598_vm13  ;;  %vm5178_vm2 = vc.u32 %v5176_v3, %v5172_v59  ;;  %v9877_v58 = vadd.f32 %v4044_v42, %v3793_v1  ;;  %v9880_v46 = vadd.s32 280, %v8565_v25  ;;  %v5156_v34 = vmul.u32 24, %v5155_v36 }
 0x3c8   : > { %v5790_v15 = vsel %vm5694_vm15, %v5742_v48, %v5128_v18  ;;  %v5177_v8 = vadd.s32 %v5175_v57, %v5169_v4  ;;  %v5179_v9 = vsel %vm5178_vm2, 1, %v10128_v22  ;;  %v2726_v29 = vadd.f32 %v2660_v10, %v10218_v56  ;;  %v2665_v4 = vpop.f32.mrf.mxu1  ;;  %v4049_v48 = vpop.f32.mrf.mxu0 }
 0x3c9   : > { %vm5838_vm3 = vcmp.lt.s32.totalorder %v5790_v15, 16  ;;  %v5192_v49 = vand.u32 65535, %v9880_v46  ;;  %v5193_v62 = vshrl.u32 %v9880_v46, 16  ;;  %v7561_v55 = vpack.c.bf16 %v9877_v58, %v9873_v26  ;;  %v3096_v5 = vpop.f32.mrf.mxu2  ;;  %v10220_v15 = vld [vmem:[#allocation6_spill] sm:$0xff] }
 0x3ca   : > { %v5982_v2 = vsel %vm5838_vm3, %v9846_v0, 0.0  ;;  %v5157_v33 = vsub.s32 %v9844_v14, %v5156_v34  ;;  %v5181_v6 = vadd.s32 %v5179_v9, %v5177_v8  ;;  %v3160_v19 = vadd.f32 %v3094_v43, %v2726_v29 }
 0x3cb   : > { %v6029_v61 = vadd.f32 %v6028_v60, %v5982_v2  ;;  %v6083_v38 = vmul.f32 %v5982_v2, %v5982_v2  ;;  %v5195_v37 = vmul.u32 43691, %v5192_v49  ;;  %v5196_v7 = vmul.u32 43690, %v5192_v49  ;;  %7616 = vst [vmem:[%s8941_s8 + $0x88] sm:$0xff] %v7561_v55   ;;  %v3730_v17 = vpop.f32.mrf.mxu3 }
 0x3cc   : > { %vm5599_vm4 = vcmp.ne.s32.totalorder %v5157_v33, 0  ;;  %vm5647_vm5 = vcmp.lt.s32.totalorder %v5157_v33, 0  ;;  %v5743_v20 = vadd.s32 24, %v5157_v33  ;;  %v5182_v32 = vadd.s32 %v5181_v6, %v5171_v13 }
 0x3cd   : > { %v6130_v39 = vadd.f32 %v6129_v52, %v6083_v38  ;;  %vm5695_vm6 = vmand %vm5647_vm5, %vm5599_vm4  ;;  %v5197_v24 = vmul.u32 43691, %v5193_v62  ;;  %v5198_v0 = vmul.u32 43690, %v5193_v62  ;;  %v5199_v50 = vshll.u32 %v5196_v7, 16 }
 0x3ce   : > { %v5791_v14 = vsel %vm5695_vm6, %v5743_v20, %v5157_v33  ;;  %v5183_v30 = vadd.s32 %v5182_v32, %v5173_v31  ;;  %v5200_v23 = vshrl.u32 %v5196_v7, 16  ;;  %v3794_v52 = vadd.f32 %v3728_v11, %v3160_v19 }
 0x3cf   : > { %vm5839_vm7 = vcmp.lt.s32.totalorder %v5791_v14, 16  ;;  %v5201_v60 = vshll.u32 %v5197_v24, 16  ;;  %v5202_v21 = vshrl.u32 %v5197_v24, 16  ;;  %vm5203_vm8 = vc.u32 %v5195_v37, %v5199_v50 }
 0x3d0   : > { %v5983_v53 = vsel %vm5839_vm7, %v9850_v40, 0.0  ;;  %v5184_v27 = vshrl.u32 %v5183_v30, 4  ;;  %v5204_v10 = vsel %vm5203_vm8, 1, %v10128_v22  ;;  %v5205_v44 = vadd.s32 %v5199_v50, %v5195_v37 }
 0x3d1   : > { %v6030_v28 = vadd.f32 %v6029_v61, %v5983_v53  ;;  %v6084_v35 = vmul.f32 %v5983_v53, %v5983_v53  ;;  %v5206_v42 = vadd.s32 %v5204_v10, %v5198_v0  ;;  %v9894_v12 = vadd.s32 288, %v8565_v25  ;;  %v3099_v61 = vpop.f32.mrf.mxu2 }
 0x3d2   : > { %v5185_v16 = vmul.u32 24, %v5184_v27  ;;  %vm5207_vm1 = vc.u32 %v5205_v44, %v5201_v60  ;;  %v2727_v51 = vadd.f32 %v2662_v45, %v10219_v41  ;;  %v9898_v18 = vadd.f32 %v4047_v47, %v3794_v52 }
 0x3d3   : > { %v6131_v54 = vadd.f32 %v6130_v39, %v6084_v35  ;;  %v5208_v40 = vsel %vm5207_vm1, 1, %v10128_v22  ;;  %v9901_v13 = vadd.s32 296, %v8565_v25  ;;  %v5221_v31 = vand.u32 65535, %v9894_v12  ;;  %v3733_v60 = vpop.f32.mrf.mxu3 }
 0x3d4   : > { %v5186_v1 = vsub.s32 %v9865_v63, %v5185_v16  ;;  %v5210_v59 = vadd.s32 %v5208_v40, %v5206_v42  ;;  %v5222_v3 = vshrl.u32 %v9894_v12, 16  ;;  %v3161_v36 = vadd.f32 %v3096_v5, %v2727_v51  ;;  %v4052_v42 = vpop.f32.mrf.mxu0 }
 0x3d5   : > { %v5250_v43 = vand.u32 65535, %v9901_v13  ;;  %v5251_v57 = vshrl.u32 %v9901_v13, 16  ;;  %v2728_v34 = vadd.f32 %v2665_v4, %v10220_v15  ;;  %v5224_v49 = vmul.u32 43691, %v5221_v31 }
 0x3d6   : > { %vm5600_vm9 = vcmp.ne.s32.totalorder %v5186_v1, 0  ;;  %vm5648_vm0 = vcmp.lt.s32.totalorder %v5186_v1, 0  ;;  %v5744_v8 = vadd.s32 24, %v5186_v1  ;;  %v5211_v9 = vadd.s32 %v5210_v59, %v5200_v23 }
 0x3d7   : > { %vm5696_vm10 = vmand %vm5648_vm0, %vm5600_vm9  ;;  %v5225_v63 = vmul.u32 43690, %v5221_v31  ;;  %v5226_v62 = vmul.u32 43691, %v5222_v3  ;;  %v5227_v55 = vmul.u32 43690, %v5222_v3  ;;  %v3795_v33 = vadd.f32 %v3730_v17, %v3161_v36  ;;  %v10221_v17 = vld [vmem:[#allocation7_spill] sm:$0xff] }
 0x3d8   : > { %v5792_v11 = vsel %vm5696_vm10, %v5744_v8, %v5186_v1  ;;  %v5212_v2 = vadd.s32 %v5211_v9, %v5202_v21  ;;  %v5253_v6 = vmul.u32 43691, %v5250_v43  ;;  %v5254_v50 = vmul.u32 43690, %v5250_v43  ;;  %v2667_v21 = vpop.f32.mrf.mxu1 }
 0x3d9   : > { %vm5840_vm11 = vcmp.lt.s32.totalorder %v5792_v11, 16  ;;  %v5228_v56 = vshll.u32 %v5225_v63, 16  ;;  %v5229_v29 = vshrl.u32 %v5225_v63, 16  ;;  %v5230_v45 = vshll.u32 %v5226_v62, 16  ;;  %v3101_v3 = vpop.f32.mrf.mxu2 }
 0x3da   : > { %v5984_v38 = vsel %vm5840_vm11, %v9873_v26, 0.0  ;;  %v5213_v37 = vshrl.u32 %v5212_v2, 4  ;;  %v5231_v7 = vshrl.u32 %v5226_v62, 16  ;;  %v9910_v47 = vadd.f32 %v4049_v48, %v3795_v33 }
 0x3db   : > { %v6031_v20 = vadd.f32 %v6030_v28, %v5984_v38  ;;  %v6085_v32 = vmul.f32 %v5984_v38, %v5984_v38  ;;  %vm5232_vm12 = vc.u32 %v5224_v49, %v5228_v56  ;;  %v5234_v39 = vadd.s32 %v5228_v56, %v5224_v49 }
 0x3dc   : > { %v5214_v24 = vmul.u32 24, %v5213_v37  ;;  %v5233_v0 = vsel %vm5232_vm12, 1, %v10128_v22  ;;  %v5255_v14 = vmul.u32 43691, %v5251_v57  ;;  %v5256_v19 = vmul.u32 43690, %v5251_v57 }
 0x3dd   : > { %v6132_v30 = vadd.f32 %v6131_v54, %v6085_v32  ;;  %v5235_v23 = vadd.s32 %v5233_v0, %v5227_v55  ;;  %vm5236_vm13 = vc.u32 %v5234_v39, %v5230_v45  ;;  %v5257_v27 = vshll.u32 %v5254_v50, 16  ;;  %v10222_v0 = vld [vmem:[#allocation9_spill] sm:$0xff] }
 0x3de   : > { %v5215_v26 = vsub.s32 %v9880_v46, %v5214_v24  ;;  %v5237_v53 = vsel %vm5236_vm13, 1, %v10128_v22  ;;  %v5258_v10 = vshrl.u32 %v5254_v50, 16  ;;  %v5259_v5 = vshll.u32 %v5255_v14, 16 }
 0x3df   : > { %v5239_v44 = vadd.s32 %v5237_v53, %v5235_v23  ;;  %v5260_v28 = vshrl.u32 %v5255_v14, 16  ;;  %v7566_v35 = vpack.c.bf16 %v9910_v47, %v9898_v18  ;;  %vm5261_vm2 = vc.u32 %v5253_v6, %v5257_v27 }
 0x3e0   : > { %vm5601_vm14 = vcmp.ne.s32.totalorder %v5215_v26, 0  ;;  %vm5649_vm15 = vcmp.lt.s32.totalorder %v5215_v26, 0  ;;  %v5745_v52 = vadd.s32 24, %v5215_v26  ;;  %v5262_v46 = vsel %vm5261_vm2, 1, %v10128_v22  ;;  %v2670_v56 = vpop.f32.mrf.mxu1 }
 0x3e1   : > { %vm5697_vm3 = vmand %vm5649_vm15, %vm5601_vm14  ;;  %v5240_v16 = vadd.s32 %v5239_v44, %v5229_v29  ;;  %v5263_v41 = vadd.s32 %v5257_v27, %v5253_v6  ;;  %7617 = vst [vmem:[%s8941_s8 + $0x90] sm:$0xff] %v7566_v35   ;;  %v3162_v51 = vadd.f32 %v3099_v61, %v2728_v34  ;;  %v5264_v54 = vadd.s32 %v5262_v46, %v5256_v19 }
 0x3e2   : > { %v5793_v4 = vsel %vm5697_vm3, %v5745_v52, %v5215_v26  ;;  %v9920_v40 = vadd.s32 304, %v8565_v25  ;;  %v2729_v1 = vadd.f32 %v2667_v21, %v10221_v17  ;;  %v9931_v39 = vadd.s32 312, %v8565_v25 }
 0x3e3   : > { %vm5841_vm4 = vcmp.lt.s32.totalorder %v5793_v4, 16  ;;  %v5241_v59 = vadd.s32 %v5240_v16, %v5231_v7  ;;  %vm5265_vm5 = vc.u32 %v5263_v41, %v5259_v5  ;;  %v3796_v31 = vadd.f32 %v3733_v60, %v3162_v51 }
 0x3e4   : > { %v5985_v48 = vsel %vm5841_vm4, %v9877_v58, 0.0  ;;  %v5266_v36 = vsel %vm5265_vm5, 1, %v10128_v22  ;;  %v5279_v43 = vand.u32 65535, %v9920_v40  ;;  %v5280_v57 = vshrl.u32 %v9920_v40, 16  ;;  %v3735_v58 = vpop.f32.mrf.mxu3 }
 0x3e5   : > { %v6032_v15 = vadd.f32 %v6031_v20, %v5985_v48  ;;  %v6086_v34 = vmul.f32 %v5985_v48, %v5985_v48  ;;  %v5242_v8 = vshrl.u32 %v5241_v59, 4  ;;  %v5268_v9 = vadd.s32 %v5266_v36, %v5264_v54  ;;  %v4054_v20 = vpop.f32.mrf.mxu0 }
 0x3e6   : > { %v9927_v49 = vadd.f32 %v4052_v42, %v3796_v31  ;;  %v5282_v63 = vmul.u32 43691, %v5279_v43  ;;  %v5283_v62 = vmul.u32 43690, %v5279_v43  ;;  %v5284_v55 = vmul.u32 43691, %v5280_v57 }
 0x3e7   : > { %v6133_v11 = vadd.f32 %v6132_v30, %v6086_v34  ;;  %v5243_v2 = vmul.u32 24, %v5242_v8  ;;  %v5269_v33 = vadd.s32 %v5268_v9, %v5258_v10  ;;  %v5285_v6 = vmul.u32 43690, %v5280_v57  ;;  %v3104_v10 = vpop.f32.mrf.mxu2 }
 0x3e8   : > { %v5286_v29 = vshll.u32 %v5283_v62, 16  ;;  %v5287_v45 = vshrl.u32 %v5283_v62, 16  ;;  %v5288_v61 = vshll.u32 %v5284_v55, 16  ;;  %v5289_v38 = vshrl.u32 %v5284_v55, 16  ;;  %v2672_v8 = vpop.f32.mrf.mxu1 }
 0x3e9   : > { %v5244_v37 = vsub.s32 %v9894_v12, %v5243_v2  ;;  %v5270_v7 = vadd.s32 %v5269_v33, %v5260_v28  ;;  %v3163_v32 = vadd.f32 %v3101_v3, %v2729_v1  ;;  %v2730_v50 = vadd.f32 %v2670_v56, %v10222_v0 }
 0x3ea   : > { %vm5290_vm6 = vc.u32 %v5282_v63, %v5286_v29  ;;  %v5292_v24 = vadd.s32 %v5286_v29, %v5282_v63  ;;  %v9935_v14 = vadd.s32 320, %v8565_v25  ;;  %v5308_v60 = vand.u32 65535, %v9931_v39 }
 0x3eb   : > { %vm5602_vm7 = vcmp.ne.s32.totalorder %v5244_v37, 0  ;;  %vm5650_vm8 = vcmp.lt.s32.totalorder %v5244_v37, 0  ;;  %v5746_v30 = vadd.s32 24, %v5244_v37  ;;  %v5271_v23 = vshrl.u32 %v5270_v7, 4 }
 0x3ec   : > { %vm5698_vm1 = vmand %vm5650_vm8, %vm5602_vm7  ;;  %v5291_v12 = vsel %vm5290_vm6, 1, %v10128_v22  ;;  %vm5294_vm9 = vc.u32 %v5292_v24, %v5288_v61  ;;  %v3797_v19 = vadd.f32 %v3735_v58, %v3163_v32  ;;  %v5309_v5 = vshrl.u32 %v9931_v39, 16  ;;  %v3738_v1 = vpop.f32.mrf.mxu3 }
 0x3ed   : > { %v5794_v21 = vsel %vm5698_vm1, %v5746_v30, %v5244_v37  ;;  %v5272_v26 = vmul.u32 24, %v5271_v23  ;;  %v5293_v53 = vadd.s32 %v5291_v12, %v5285_v6  ;;  %v5295_v27 = vsel %vm5294_vm9, 1, %v10128_v22  ;;  %v4057_v57 = vpop.f32.mrf.mxu0  ;;  %v10223_v23 = vld [vmem:[#allocation32_spill] sm:$0xff] }
 0x3ee   : > { %vm5842_vm0 = vcmp.lt.s32.totalorder %v5794_v21, 16  ;;  %v9940_v44 = vadd.f32 %v4054_v20, %v3797_v19  ;;  %v5311_v28 = vmul.u32 43691, %v5308_v60  ;;  %v5312_v16 = vmul.u32 43690, %v5308_v60 }
 0x3ef   : > { %v5986_v35 = vsel %vm5842_vm0, %v9898_v18, 0.0  ;;  %v5273_v42 = vsub.s32 %v9901_v13, %v5272_v26  ;;  %v5297_v52 = vadd.s32 %v5295_v27, %v5293_v53  ;;  %v5313_v51 = vmul.u32 43691, %v5309_v5 }
 0x3f0   : > { %v6033_v46 = vadd.f32 %v6032_v15, %v5986_v35  ;;  %v6087_v41 = vmul.f32 %v5986_v35, %v5986_v35  ;;  %v5314_v4 = vmul.u32 43690, %v5309_v5  ;;  %v5315_v31 = vshll.u32 %v5312_v16, 16 }
 0x3f1   : > { %vm5603_vm10 = vcmp.ne.s32.totalorder %v5273_v42, 0  ;;  %vm5651_vm11 = vcmp.lt.s32.totalorder %v5273_v42, 0  ;;  %v5747_v54 = vadd.s32 24, %v5273_v42  ;;  %v5298_v17 = vadd.s32 %v5297_v52, %v5287_v45  ;;  %v3106_v45 = vpop.f32.mrf.mxu2 }
 0x3f2   : > { %v6134_v59 = vadd.f32 %v6133_v11, %v6087_v41  ;;  %vm5699_vm12 = vmand %vm5651_vm11, %vm5603_vm10  ;;  %v5316_v3 = vshrl.u32 %v5312_v16, 16  ;;  %v5317_v48 = vshll.u32 %v5313_v51, 16  ;;  %v5318_v13 = vshrl.u32 %v5313_v51, 16  ;;  %v2675_v16 = vpop.f32.mrf.mxu1 }
 0x3f3   : > { %v5795_v18 = vsel %vm5699_vm12, %v5747_v54, %v5273_v42  ;;  %v5299_v36 = vadd.s32 %v5298_v17, %v5289_v38  ;;  %v7571_v43 = vpack.c.bf16 %v9940_v44, %v9927_v49  ;;  %vm5319_vm14 = vc.u32 %v5311_v28, %v5315_v31 }
 0x3f4   : > { %vm5843_vm13 = vcmp.lt.s32.totalorder %v5795_v18, 16  ;;  %v5321_v15 = vadd.s32 %v5315_v31, %v5311_v28  ;;  %v3164_v34 = vadd.f32 %v3104_v10, %v2730_v50  ;;  %v5320_v62 = vsel %vm5319_vm14, 1, %v10128_v22  ;;  %v3740_v21 = vpop.f32.mrf.mxu3 }
 0x3f5   : > { %v5987_v9 = vsel %vm5843_vm13, %v9910_v47, 0.0  ;;  %v5300_v63 = vshrl.u32 %v5299_v36, 4  ;;  %7618 = vst [vmem:[%s8941_s8 + $0x98] sm:$0xff] %v7571_v43   ;;  %v5337_v55 = vand.u32 65535, %v9935_v14  ;;  %v5322_v33 = vadd.s32 %v5320_v62, %v5314_v4  ;;  %v4059_v5 = vpop.f32.mrf.mxu0 }
 0x3f6   : > { %v6034_v11 = vadd.f32 %v6033_v46, %v5987_v9  ;;  %v6088_v2 = vmul.f32 %v5987_v9, %v5987_v9  ;;  %vm5323_vm15 = vc.u32 %v5321_v15, %v5317_v48  ;;  %v3798_v56 = vadd.f32 %v3738_v1, %v3164_v34 }
 0x3f7   : > { %v5301_v6 = vmul.u32 24, %v5300_v63  ;;  %v5324_v58 = vsel %vm5323_vm15, 1, %v10128_v22  ;;  %v5338_v29 = vshrl.u32 %v9935_v14, 16  ;;  %v5340_v47 = vmul.u32 43691, %v5337_v55 }
 0x3f8   : > { %v6135_v61 = vadd.f32 %v6134_v59, %v6088_v2  ;;  %v5326_v38 = vadd.s32 %v5324_v58, %v5322_v33  ;;  %v5341_v37 = vmul.u32 43690, %v5337_v55  ;;  %v9954_v20 = vadd.f32 %v4057_v57, %v3798_v56  ;;  %v10224_v57 = vld [vmem:[#allocation35_spill] sm:$0xff] }
 0x3f9   : > { %v5302_v7 = vsub.s32 %v9920_v40, %v5301_v6  ;;  %v5342_v32 = vmul.u32 43691, %v5338_v29  ;;  %v5343_v24 = vmul.u32 43690, %v5338_v29  ;;  %v2731_v12 = vadd.f32 %v2672_v8, %v10223_v23  ;;  %v3109_v36 = vpop.f32.mrf.mxu2 }
 0x3fa   : > { %v5327_v0 = vadd.s32 %v5326_v38, %v5316_v3  ;;  %v5344_v50 = vshll.u32 %v5341_v37, 16  ;;  %v5345_v30 = vshrl.u32 %v5341_v37, 16  ;;  %v9959_v35 = vadd.s32 328, %v8565_v25 }
 0x3fb   : > { %vm5604_vm2 = vcmp.ne.s32.totalorder %v5302_v7, 0  ;;  %vm5652_vm3 = vcmp.lt.s32.totalorder %v5302_v7, 0  ;;  %v5748_v19 = vadd.s32 24, %v5302_v7  ;;  %v5346_v60 = vshll.u32 %v5342_v32, 16 }
 0x3fc   : > { %vm5700_vm4 = vmand %vm5652_vm3, %vm5604_vm2  ;;  %v5328_v26 = vadd.s32 %v5327_v0, %v5318_v13  ;;  %v5347_v53 = vshrl.u32 %v5342_v32, 16  ;;  %vm5348_vm5 = vc.u32 %v5340_v47, %v5344_v50  ;;  %v5350_v27 = vadd.s32 %v5344_v50, %v5340_v47  ;;  %v3743_v6 = vpop.f32.mrf.mxu3 }
 0x3fd   : > { %v5796_v40 = vsel %vm5700_vm4, %v5748_v19, %v5302_v7  ;;  %v5349_v10 = vsel %vm5348_vm5, 1, %v10128_v22  ;;  %v3165_v28 = vadd.f32 %v3106_v45, %v2731_v12  ;;  %v5366_v4 = vand.u32 65535, %v9959_v35 }
 0x3fe   : > { %vm5844_vm6 = vcmp.lt.s32.totalorder %v5796_v40, 16  ;;  %v5329_v42 = vshrl.u32 %v5328_v26, 4  ;;  %v5351_v52 = vadd.s32 %v5349_v10, %v5343_v24  ;;  %vm5352_vm7 = vc.u32 %v5350_v27, %v5346_v60  ;;  %v2677_v24 = vpop.f32.mrf.mxu1  ;;  %v10225_v26 = vld [vmem:[#allocation36_spill] sm:$0xff] }
 0x3ff   : > { %v5988_v46 = vsel %vm5844_vm6, %v9927_v49, 0.0  ;;  %v5353_v41 = vsel %vm5352_vm7, 1, %v10128_v22  ;;  %v3799_v51 = vadd.f32 %v3740_v21, %v3165_v28  ;;  %v5367_v3 = vshrl.u32 %v9959_v35, 16 }
 0x400   : > { %v6035_v54 = vadd.f32 %v6034_v11, %v5988_v46  ;;  %v6089_v17 = vmul.f32 %v5988_v46, %v5988_v46  ;;  %v5330_v1 = vmul.u32 24, %v5329_v42  ;;  %v5355_v59 = vadd.s32 %v5353_v41, %v5351_v52 }
 0x401   : > { %v9964_v31 = vadd.f32 %v4059_v5, %v3799_v51  ;;  %v5369_v48 = vmul.u32 43691, %v5366_v4  ;;  %v5370_v18 = vmul.u32 43690, %v5366_v4  ;;  %v2732_v15 = vadd.f32 %v2675_v16, %v10224_v57  ;;  %v3111_v27 = vpop.f32.mrf.mxu2 }
 0x402   : > { %v6136_v13 = vadd.f32 %v6135_v61, %v6089_v17  ;;  %v5331_v43 = vsub.s32 %v9931_v39, %v5330_v1  ;;  %v5356_v49 = vadd.s32 %v5355_v59, %v5345_v30  ;;  %v5371_v34 = vmul.u32 43691, %v5367_v3  ;;  %v4062_v61 = vpop.f32.mrf.mxu0 }
 0x403   : > { %v5372_v8 = vmul.u32 43690, %v5367_v3  ;;  %v5373_v9 = vshll.u32 %v5370_v18, 16  ;;  %v5374_v63 = vshrl.u32 %v5370_v18, 16  ;;  %v7576_v29 = vpack.c.bf16 %v9964_v31, %v9954_v20 }
 0x404   : > { %vm5605_vm8 = vcmp.ne.s32.totalorder %v5331_v43, 0  ;;  %vm5653_vm1 = vcmp.lt.s32.totalorder %v5331_v43, 0  ;;  %v5749_v62 = vadd.s32 24, %v5331_v43  ;;  %v5357_v55 = vadd.s32 %v5356_v49, %v5347_v53  ;;  %v3745_v17 = vpop.f32.mrf.mxu3 }
 0x405   : > { %vm5701_vm9 = vmand %vm5653_vm1, %vm5605_vm8  ;;  %v5375_v11 = vshll.u32 %v5371_v34, 16  ;;  %v5376_v2 = vshrl.u32 %v5371_v34, 16  ;;  %vm5377_vm0 = vc.u32 %v5369_v48, %v5373_v9  ;;  %v5379_v33 = vadd.s32 %v5373_v9, %v5369_v48  ;;  %7619 = vst [vmem:[%s8941_s8 + $0xa0] sm:$0xff] %v7576_v29  }
 0x406   : > { %v5797_v58 = vsel %vm5701_vm9, %v5749_v62, %v5331_v43  ;;  %v5358_v39 = vshrl.u32 %v5357_v55, 4  ;;  %v5378_v56 = vsel %vm5377_vm0, 1, %v10128_v22  ;;  %v3166_v38 = vadd.f32 %v3109_v36, %v2732_v15 }
 0x407   : > { %vm5845_vm10 = vcmp.lt.s32.totalorder %v5797_v58, 16  ;;  %v5380_v45 = vadd.s32 %v5378_v56, %v5372_v8  ;;  %vm5381_vm11 = vc.u32 %v5379_v33, %v5375_v11  ;;  %v9976_v32 = vadd.s32 336, %v8565_v25 }
 0x408   : > { %v5989_v47 = vsel %vm5845_vm10, %v9940_v44, 0.0  ;;  %v5359_v37 = vmul.u32 24, %v5358_v39  ;;  %v5382_v7 = vsel %vm5381_vm11, 1, %v10128_v22  ;;  %v3800_v23 = vadd.f32 %v3743_v6, %v3166_v38 }
 0x409   : > { %v6036_v0 = vadd.f32 %v6035_v54, %v5989_v47  ;;  %v6090_v50 = vmul.f32 %v5989_v47, %v5989_v47  ;;  %v5384_v30 = vadd.s32 %v5382_v7, %v5380_v45  ;;  %v5395_v19 = vand.u32 65535, %v9976_v32  ;;  %v3114_v39 = vpop.f32.mrf.mxu2  ;;  %v10226_v47 = vld [vmem:[#allocation10_spill] sm:$0xff] }
 0x40a   : > { %v5360_v12 = vsub.s32 %v9935_v14, %v5359_v37  ;;  %v5396_v60 = vshrl.u32 %v9976_v32, 16  ;;  %v2733_v53 = vadd.f32 %v2677_v24, %v10225_v26  ;;  %v9983_v40 = vadd.s32 344, %v8565_v25  ;;  %v4064_v49 = vpop.f32.mrf.mxu0  ;;  %v10227_v37 = vld [vmem:[#allocation8_spill] sm:$0xff] }
 0x40b   : > { %v6137_v21 = vadd.f32 %v6136_v13, %v6090_v50  ;;  %v5385_v44 = vadd.s32 %v5384_v30, %v5374_v63  ;;  %v9985_v5 = vadd.f32 %v4062_v61, %v3800_v23  ;;  %v5398_v14 = vmul.u32 43691, %v5395_v19 }
 0x40c   : > { %vm5606_vm12 = vcmp.ne.s32.totalorder %v5360_v12, 0  ;;  %vm5654_vm13 = vcmp.lt.s32.totalorder %v5360_v12, 0  ;;  %v5750_v10 = vadd.s32 24, %v5360_v12  ;;  %v5399_v42 = vmul.u32 43690, %v5395_v19 }
 0x40d   : > { %vm5702_vm14 = vmand %vm5654_vm13, %vm5606_vm12  ;;  %v5386_v28 = vadd.s32 %v5385_v44, %v5376_v2  ;;  %v5400_v52 = vmul.u32 43691, %v5396_v60  ;;  %v5401_v46 = vmul.u32 43690, %v5396_v60  ;;  %v3167_v41 = vadd.f32 %v3111_v27, %v2733_v53  ;;  %v3748_v53 = vpop.f32.mrf.mxu3 }
 0x40e   : > { %v5798_v16 = vsel %vm5702_vm14, %v5750_v10, %v5360_v12  ;;  %v5424_v51 = vand.u32 65535, %v9983_v40  ;;  %v5402_v54 = vshll.u32 %v5399_v42, 16  ;;  %v5425_v1 = vshrl.u32 %v9983_v40, 16 }
 0x40f   : > { %vm5846_vm15 = vcmp.lt.s32.totalorder %v5798_v16, 16  ;;  %v5387_v4 = vshrl.u32 %v5386_v28, 4  ;;  %v5403_v3 = vshrl.u32 %v5399_v42, 16  ;;  %v5404_v48 = vshll.u32 %v5400_v52, 16 }
 0x410   : > { %v5990_v59 = vsel %vm5846_vm15, %v9954_v20, 0.0  ;;  %v3801_v18 = vadd.f32 %v3745_v17, %v3167_v41  ;;  %vm5406_vm2 = vc.u32 %v5398_v14, %v5402_v54  ;;  %v5405_v57 = vshrl.u32 %v5400_v52, 16  ;;  %v2680_v20 = vpop.f32.mrf.mxu1 }
 0x411   : > { %v6037_v36 = vadd.f32 %v6036_v0, %v5990_v59  ;;  %v6091_v13 = vmul.f32 %v5990_v59, %v5990_v59  ;;  %v5388_v43 = vmul.u32 24, %v5387_v4  ;;  %v5407_v15 = vsel %vm5406_vm2, 1, %v10128_v22 }
 0x412   : > { %v5408_v34 = vadd.s32 %v5402_v54, %v5398_v14  ;;  %v9991_v8 = vadd.f32 %v4064_v49, %v3801_v18  ;;  %v5409_v62 = vadd.s32 %v5407_v15, %v5401_v46  ;;  %v5428_v55 = vmul.u32 43690, %v5424_v51  ;;  %v4067_v41 = vpop.f32.mrf.mxu0  ;;  %v10228_v18 = vld [vmem:[#allocation11_spill] sm:$0xff] }
 0x413   : > { %v6138_v9 = vadd.f32 %v6137_v21, %v6091_v13  ;;  %v5389_v63 = vsub.s32 %v9959_v35, %v5388_v43  ;;  %v5427_v11 = vmul.u32 43691, %v5424_v51  ;;  %v5429_v2 = vmul.u32 43691, %v5425_v1  ;;  %v3116_v43 = vpop.f32.mrf.mxu2 }
 0x414   : > { %vm5410_vm3 = vc.u32 %v5408_v34, %v5404_v48  ;;  %v7581_v33 = vpack.c.bf16 %v9991_v8, %v9985_v5  ;;  %v5430_v29 = vmul.u32 43690, %v5425_v1  ;;  %v5431_v35 = vshll.u32 %v5428_v55, 16 }
 0x415   : > { %vm5607_vm4 = vcmp.ne.s32.totalorder %v5389_v63, 0  ;;  %vm5655_vm5 = vcmp.lt.s32.totalorder %v5389_v63, 0  ;;  %v5751_v6 = vadd.s32 24, %v5389_v63  ;;  %v5411_v58 = vsel %vm5410_vm3, 1, %v10128_v22 }
 0x416   : > { %vm5703_vm6 = vmand %vm5655_vm5, %vm5607_vm4  ;;  %v5413_v56 = vadd.s32 %v5411_v58, %v5409_v62  ;;  %v5432_v45 = vshrl.u32 %v5428_v55, 16  ;;  %7620 = vst [vmem:[%s8941_s8 + $0xa8] sm:$0xff] %v7581_v33   ;;  %v5433_v38 = vshll.u32 %v5429_v2, 16  ;;  %v2415_v7 = vadd.f32 %v10227_v37, %v10226_v47 }
 0x417   : > { %v5799_v61 = vsel %vm5703_vm6, %v5751_v6, %v5389_v63  ;;  %v10001_v24 = vadd.s32 352, %v8565_v25  ;;  %vm5435_vm8 = vc.u32 %v5427_v11, %v5431_v35  ;;  %v5437_v50 = vadd.s32 %v5431_v35, %v5427_v11 }
 0x418   : > { %vm5847_vm7 = vcmp.lt.s32.totalorder %v5799_v61, 16  ;;  %v5414_v0 = vadd.s32 %v5413_v56, %v5403_v3  ;;  %v5436_v23 = vsel %vm5435_vm8, 1, %v10128_v22  ;;  %v2734_v12 = vadd.f32 %v2680_v20, %v2415_v7  ;;  %v2682_v4 = vpop.f32.mrf.mxu1 }
 0x419   : > { %v5991_v30 = vsel %vm5847_vm7, %v9964_v31, 0.0  ;;  %v5453_v19 = vand.u32 65535, %v10001_v24  ;;  %v5438_v26 = vadd.s32 %v5436_v23, %v5430_v29  ;;  %vm5439_vm1 = vc.u32 %v5437_v50, %v5433_v38 }
 0x41a   : > { %v6038_v60 = vadd.f32 %v6037_v36, %v5991_v30  ;;  %v6092_v21 = vmul.f32 %v5991_v30, %v5991_v30  ;;  %v5415_v44 = vadd.s32 %v5414_v0, %v5405_v57  ;;  %v3168_v27 = vadd.f32 %v3114_v39, %v2734_v12  ;;  %v10229_v36 = vld [vmem:[#allocation31_spill] sm:$0xff]  ;;  %v3750_v39 = vpop.f32.mrf.mxu3  ;;  %v4069_v23 = vpop.f32.mrf.mxu0 }
 0x41b   : > { %v5454_v10 = vshrl.u32 %v10001_v24, 16  ;;  %v5456_v28 = vmul.u32 43691, %v5453_v19  ;;  %v5440_v52 = vsel %vm5439_vm1, 1, %v10128_v22  ;;  %v5457_v31 = vmul.u32 43690, %v5453_v19 }
 0x41c   : > { %v6139_v14 = vadd.f32 %v6138_v9, %v6092_v21  ;;  %v5416_v42 = vshrl.u32 %v5415_v44, 4  ;;  %v5434_v16 = vshrl.u32 %v5429_v2, 16  ;;  %v5442_v46 = vadd.s32 %v5440_v52, %v5438_v26 }
 0x41d   : > { %v5458_v51 = vmul.u32 43691, %v5454_v10  ;;  %v5459_v17 = vmul.u32 43690, %v5454_v10  ;;  %v5460_v1 = vshll.u32 %v5457_v31, 16  ;;  %v3802_v3 = vadd.f32 %v3748_v53, %v3168_v27  ;;  %v3119_v27 = vpop.f32.mrf.mxu2 }
 0x41e   : > { %v5417_v54 = vmul.u32 24, %v5416_v42  ;;  %v5443_v59 = vadd.s32 %v5442_v46, %v5432_v45  ;;  %v2416_v13 = vadd.f32 %v10229_v36, %v10228_v18  ;;  %v5461_v57 = vshrl.u32 %v5457_v31, 16  ;;  %v10231_v46 = vld [vmem:[#allocation33_spill] sm:$0xff] }
 0x41f   : > { %v5462_v48 = vshll.u32 %v5458_v51, 16  ;;  %vm5464_vm9 = vc.u32 %v5456_v28, %v5460_v1  ;;  %v5466_v15 = vadd.s32 %v5460_v1, %v5456_v28  ;;  %v10013_v62 = vadd.s32 360, %v8565_v25 }
 0x420   : > { %v5418_v49 = vsub.s32 %v9976_v32, %v5417_v54  ;;  %v5444_v34 = vadd.s32 %v5443_v59, %v5434_v16  ;;  %v5465_v9 = vsel %vm5464_vm9, 1, %v10128_v22  ;;  %v2735_v63 = vadd.f32 %v2682_v4, %v2416_v13  ;;  %v2685_v12 = vpop.f32.mrf.mxu1 }
 0x421   : > { %v5467_v20 = vadd.s32 %v5465_v9, %v5459_v17  ;;  %vm5468_vm12 = vc.u32 %v5466_v15, %v5462_v48  ;;  %v5482_v32 = vand.u32 65535, %v10013_v62  ;;  %v5463_v6 = vshrl.u32 %v5458_v51, 16  ;;  %v10232_v15 = vld [vmem:[#allocation14_spill] sm:$0xff] }
 0x422   : > { %vm5608_vm0 = vcmp.ne.s32.totalorder %v5418_v49, 0  ;;  %vm5656_vm10 = vcmp.lt.s32.totalorder %v5418_v49, 0  ;;  %v5752_v55 = vadd.s32 24, %v5418_v49  ;;  %v5445_v11 = vshrl.u32 %v5444_v34, 4  ;;  %v10233_v34 = vld [vmem:[#allocation34_spill] sm:$0xff] }
 0x423   : > { %vm5704_vm11 = vmand %vm5656_vm10, %vm5608_vm0  ;;  %v3169_v2 = vadd.f32 %v3116_v43, %v2735_v63  ;;  %v5469_v58 = vsel %vm5468_vm12, 1, %v10128_v22  ;;  %v5483_v56 = vshrl.u32 %v10013_v62, 16  ;;  %v5485_v38 = vmul.u32 43691, %v5482_v32  ;;  %v3753_v36 = vpop.f32.mrf.mxu3 }
 0x424   : > { %v5800_v33 = vsel %vm5704_vm11, %v5752_v55, %v5418_v49  ;;  %v5446_v29 = vmul.u32 24, %v5445_v11  ;;  %v5471_v35 = vadd.s32 %v5469_v58, %v5467_v20  ;;  %v5486_v47 = vmul.u32 43690, %v5482_v32  ;;  %v4072_v58 = vpop.f32.mrf.mxu0 }
 0x425   : > { %vm5848_vm13 = vcmp.lt.s32.totalorder %v5800_v33, 16  ;;  %v3803_v45 = vadd.f32 %v3750_v39, %v3169_v2  ;;  %v5487_v37 = vmul.u32 43691, %v5483_v56  ;;  %v10020_v19 = vadd.f32 %v4067_v41, %v3802_v3 }
 0x426   : > { %v5992_v61 = vsel %vm5848_vm13, %v9985_v5, 0.0  ;;  %v5447_v50 = vsub.s32 %v9983_v40, %v5446_v29  ;;  %v5472_v30 = vadd.s32 %v5471_v35, %v5461_v57  ;;  %v5488_v44 = vmul.u32 43690, %v5483_v56  ;;  %v3121_v29 = vpop.f32.mrf.mxu2 }
 0x427   : > { %v6039_v7 = vadd.f32 %v6038_v60, %v5992_v61  ;;  %v6093_v0 = vmul.f32 %v5992_v61, %v5992_v61  ;;  %v10022_v21 = vadd.f32 %v4069_v23, %v3803_v45  ;;  %v5489_v26 = vshll.u32 %v5486_v47, 16 }
 0x428   : > { %vm5609_vm14 = vcmp.ne.s32.totalorder %v5447_v50, 0  ;;  %vm5657_vm15 = vcmp.lt.s32.totalorder %v5447_v50, 0  ;;  %v5753_v5 = vadd.s32 24, %v5447_v50  ;;  %v5473_v60 = vadd.s32 %v5472_v30, %v5463_v6  ;;  %v2687_v11 = vpop.f32.mrf.mxu1 }
 0x429   : > { %v6140_v53 = vadd.f32 %v6139_v14, %v6093_v0  ;;  %vm5705_vm2 = vmand %vm5657_vm15, %vm5609_vm14  ;;  %v5491_v10 = vshll.u32 %v5487_v37, 16  ;;  %vm5493_vm3 = vc.u32 %v5485_v38, %v5489_v26  ;;  %v5495_v42 = vadd.s32 %v5489_v26, %v5485_v38  ;;  %v10230_v14 = vld [vmem:[#allocation12_spill] sm:$0xff] }
 0x42a   : > { %v5801_v40 = vsel %vm5705_vm2, %v5753_v5, %v5447_v50  ;;  %v5494_v28 = vsel %vm5493_vm3, 1, %v10128_v22  ;;  %v7586_v52 = vpack.c.bf16 %v10022_v21, %v10020_v19  ;;  %v5474_v31 = vshrl.u32 %v5473_v60, 4 }
 0x42b   : > { %vm5849_vm4 = vcmp.lt.s32.totalorder %v5801_v40, 16  ;;  %v5496_v16 = vadd.s32 %v5494_v28, %v5488_v44  ;;  %v2417_v41 = vadd.f32 %v10231_v46, %v10230_v14  ;;  %v5490_v4 = vshrl.u32 %v5486_v47, 16 }
 0x42c   : > { %v5993_v51 = vsel %vm5849_vm4, %v9991_v8, 0.0  ;;  %vm5497_vm5 = vc.u32 %v5495_v42, %v5491_v10  ;;  %7621 = vst [vmem:[%s8941_s8 + $0xb0] sm:$0xff] %v7586_v52   ;;  %v10032_v54 = vadd.s32 368, %v8565_v25  ;;  %v5475_v59 = vmul.u32 24, %v5474_v31 }
 0x42d   : > { %v6040_v17 = vadd.f32 %v6039_v7, %v5993_v51  ;;  %v6094_v1 = vmul.f32 %v5993_v51, %v5993_v51  ;;  %v5498_v3 = vsel %vm5497_vm5, 1, %v10128_v22  ;;  %v5492_v48 = vshrl.u32 %v5487_v37, 16 }
 0x42e   : > { %v5500_v18 = vadd.s32 %v5498_v3, %v5496_v16  ;;  %v5511_v13 = vand.u32 65535, %v10032_v54  ;;  %v5512_v43 = vshrl.u32 %v10032_v54, 16  ;;  %v5476_v8 = vsub.s32 %v10001_v24, %v5475_v59 }
 0x42f   : > { %v6141_v49 = vadd.f32 %v6140_v53, %v6094_v1  ;;  %v2736_v57 = vadd.f32 %v2685_v12, %v2417_v41  ;;  %v2418_v9 = vadd.f32 %v10233_v34, %v10232_v15  ;;  %v10041_v2 = vadd.s32 376, %v8565_v25 }
 0x430   : > { %v5501_v63 = vadd.s32 %v5500_v18, %v5490_v4  ;;  %v5514_v55 = vmul.u32 43691, %v5511_v13  ;;  %v5515_v20 = vmul.u32 43690, %v5511_v13  ;;  %vm5610_vm6 = vcmp.ne.s32.totalorder %v5476_v8, 0 }
 0x431   : > { %vm5658_vm7 = vcmp.lt.s32.totalorder %v5476_v8, 0  ;;  %v5754_v32 = vadd.s32 24, %v5476_v8  ;;  %v5516_v33 = vmul.u32 43691, %v5512_v43  ;;  %v3170_v39 = vadd.f32 %v3119_v27, %v2736_v57 }
 0x432   : > { %vm5706_vm8 = vmand %vm5658_vm7, %vm5610_vm6  ;;  %v5502_v6 = vadd.s32 %v5501_v63, %v5492_v48  ;;  %v5517_v24 = vmul.u32 43690, %v5512_v43  ;;  %v5518_v56 = vshll.u32 %v5515_v20, 16  ;;  %v5519_v45 = vshrl.u32 %v5515_v20, 16 }
 0x433   : > { %v5802_v35 = vsel %vm5706_vm8, %v5754_v32, %v5476_v8  ;;  %v5520_v61 = vshll.u32 %v5516_v33, 16  ;;  %v2737_v38 = vadd.f32 %v2687_v11, %v2418_v9  ;;  %v5540_v50 = vand.u32 65535, %v10041_v2 }
 0x434   : > { %vm5850_vm1 = vcmp.lt.s32.totalorder %v5802_v35, 16  ;;  %v5503_v47 = vshrl.u32 %v5502_v6, 4  ;;  %vm5522_vm9 = vc.u32 %v5514_v55, %v5518_v56  ;;  %v5524_v25 = vadd.s32 %v5518_v56, %v5514_v55 }
 0x435   : > { %v5994_v37 = vsel %vm5850_vm1, %v10020_v19, 0.0  ;;  %v5523_v7 = vsel %vm5522_vm9, 1, %v10128_v22  ;;  %v3171_v0 = vadd.f32 %v3121_v29, %v2737_v38  ;;  %v5521_v26 = vshrl.u32 %v5516_v33, 16  ;;  %v3755_v19 = vpop.f32.mrf.mxu3 }
 0x436   : > { %v6041_v30 = vadd.f32 %v6040_v17, %v5994_v37  ;;  %v6095_v23 = vmul.f32 %v5994_v37, %v5994_v37  ;;  %v5504_v12 = vmul.u32 24, %v5503_v47  ;;  %v5525_v44 = vadd.s32 %v5523_v7, %v5517_v24  ;;  %v4074_v17 = vpop.f32.mrf.mxu0 }
 0x437   : > { %vm5526_vm0 = vc.u32 %v5524_v25, %v5520_v61  ;;  %v5541_v53 = vshrl.u32 %v10041_v2, 16  ;;  %v5543_v5 = vmul.u32 43691, %v5540_v50  ;;  %v5544_v40 = vmul.u32 43690, %v5540_v50 }
 0x438   : > { %v6142_v27 = vadd.f32 %v6141_v49, %v6095_v23  ;;  %v5505_v60 = vsub.s32 %v10013_v62, %v5504_v12  ;;  %v5527_v10 = vsel %vm5526_vm0, 1, %v10128_v22  ;;  %v3805_v42 = vadd.f32 %v3755_v19, %v3171_v0 }
 0x439   : > { %v5529_v28 = vadd.s32 %v5527_v10, %v5525_v44  ;;  %v5545_v52 = vmul.u32 43691, %v5541_v53  ;;  %v5546_v31 = vmul.u32 43690, %v5541_v53  ;;  %v5547_v14 = vshll.u32 %v5544_v40, 16 }
 0x43a   : > { %vm5611_vm10 = vcmp.ne.s32.totalorder %v5505_v60, 0  ;;  %vm5659_vm11 = vcmp.lt.s32.totalorder %v5505_v60, 0  ;;  %v5755_v16 = vadd.s32 24, %v5505_v60  ;;  %v3804_v4 = vadd.f32 %v3753_v36, %v3170_v39 }
 0x43b   : > { %vm5707_vm12 = vmand %vm5659_vm11, %vm5611_vm10  ;;  %v5530_v46 = vadd.s32 %v5529_v28, %v5519_v45  ;;  %v5549_v41 = vshll.u32 %v5545_v52, 16  ;;  %vm5551_vm13 = vc.u32 %v5543_v5, %v5547_v14  ;;  %v5553_v62 = vadd.s32 %v5547_v14, %v5543_v5 }
 0x43c   : > { %v5803_v51 = vsel %vm5707_vm12, %v5755_v16, %v5505_v60  ;;  %v4124_v59 = vadd.f32 %v4074_v17, %v3805_v42  ;;  %v5552_v3 = vsel %vm5551_vm13, 1, %v10128_v22  ;;  %v5548_v18 = vshrl.u32 %v5544_v40, 16 }
 0x43d   : > { %vm5851_vm14 = vcmp.lt.s32.totalorder %v5803_v51, 16  ;;  %v5531_v1 = vadd.s32 %v5530_v46, %v5521_v26  ;;  %v5554_v13 = vadd.s32 %v5552_v3, %v5546_v31  ;;  %vm5555_vm15 = vc.u32 %v5553_v62, %v5549_v41 }
 0x43e   : > { %v5995_v48 = vsel %vm5851_vm14, %v10022_v21, 0.0  ;;  %v5556_v57 = vsel %vm5555_vm15, 1, %v10128_v22  ;;  %v4123_v36 = vadd.f32 %v4072_v58, %v3804_v4  ;;  %v5550_v15 = vshrl.u32 %v5545_v52, 16 }
 0x43f   : > { %v6042_v43 = vadd.f32 %v6041_v30, %v5995_v48  ;;  %v6096_v49 = vmul.f32 %v5995_v48, %v5995_v48  ;;  %v5532_v8 = vshrl.u32 %v5531_v1, 4  ;;  %v5558_v34 = vadd.s32 %v5556_v57, %v5554_v13 }
 0x440   : > { %v7591_v20 = vpack.c.bf16 %v4124_v59, %v4123_v36  ;;  %vm6152_vm9 = vcmask 1040384  }
 0x441   : > { %v6143_v9 = vadd.f32 %v6142_v27, %v6096_v49  ;;  %v5533_v63 = vmul.u32 24, %v5532_v8  ;;  %v5559_v55 = vadd.s32 %v5558_v34, %v5548_v18 }
 0x442   : > { %7622 = vst [vmem:[%s8941_s8 + $0xb8] sm:$0xff] %v7591_v20  }
 0x443   : > { %v5534_v11 = vsub.s32 %v10032_v54, %v5533_v63  ;;  %v5560_v32 = vadd.s32 %v5559_v55, %v5550_v15 }
 0x445   : > { %vm5612_vm2 = vcmp.ne.s32.totalorder %v5534_v11, 0  ;;  %vm5660_vm3 = vcmp.lt.s32.totalorder %v5534_v11, 0  ;;  %v5756_v21 = vadd.s32 24, %v5534_v11  ;;  %v5561_v33 = vshrl.u32 %v5560_v32, 4 }
 0x446   : > { %vm5708_vm4 = vmand %vm5660_vm3, %vm5612_vm2 }
 0x447   : > { %v5804_v6 = vsel %vm5708_vm4, %v5756_v21, %v5534_v11  ;;  %v5562_v39 = vmul.u32 24, %v5561_v33 }
 0x448   : > { %vm5852_vm5 = vcmp.lt.s32.totalorder %v5804_v6, 16 }
 0x449   : > { %v5996_v22 = vsel %vm5852_vm5, %v4123_v36, 0.0  ;;  %v5563_v56 = vsub.s32 %v10041_v2, %v5562_v39 }
 0x44a   : > { %v6043_v58 = vadd.f32 %v6042_v43, %v5996_v22  ;;  %v6097_v24 = vmul.f32 %v5996_v22, %v5996_v22 }
 0x44b   : > { %vm5613_vm6 = vcmp.ne.s32.totalorder %v5563_v56, 0  ;;  %vm5661_vm7 = vcmp.lt.s32.totalorder %v5563_v56, 0  ;;  %v5757_v35 = vadd.s32 24, %v5563_v56 }
 0x44c   : > { %v6144_v29 = vadd.f32 %v6143_v9, %v6097_v24  ;;  %vm5709_vm8 = vmand %vm5661_vm7, %vm5613_vm6 }
 0x44d   : > { %v5805_v54 = vsel %vm5709_vm8, %v5757_v35, %v5563_v56 }
 0x44e   : > { %vm5853_vm1 = vcmp.lt.s32.totalorder %v5805_v54, 16 }
 0x44f   : > { %v5997_v45 = vsel %vm5853_vm1, %v4124_v59, 0.0 }
 0x450   : > { %v6044_v61 = vadd.f32 %v6043_v58, %v5997_v45  ;;  %v6098_v38 = vmul.f32 %v5997_v45, %v5997_v45 }
 0x452   : > { %v6045_v47 = vrot.slane %v6044_v61, 4  ;;  %v6145_v25 = vadd.f32 %v6144_v29, %v6098_v38 }
 0x454   : > { %v6046_v37 = vadd.f32 %v6045_v47, %v6044_v61  ;;  %v6146_v7 = vrot.slane %v6145_v25, 4 }
 0x456   : > { %v6047_v0 = vrot.slane %v6046_v37, 2  ;;  %v6147_v50 = vadd.f32 %v6146_v7, %v6145_v25 }
 0x458   : > { %v6048_v30 = vadd.f32 %v6047_v0, %v6046_v37  ;;  %v6148_v23 = vrot.slane %v6147_v50, 2 }
 0x45a   : > { %v6049_v2 = vrot.slane %v6048_v30, 1  ;;  %v6149_v12 = vadd.f32 %v6148_v23, %v6147_v50 }
 0x45c   : > { %v6150_v44 = vrot.slane %v6149_v12, 1  ;;  %v6050_v26 = vadd.f32 %v6049_v2, %v6048_v30 }
 0x45e   : > { %v6151_v53 = vadd.f32 %v6150_v44, %v6149_v12 }
 0x460   : > { %v6153_v5 = vsel %vm6152_vm9, %v6050_v26, %v6151_v53 }
 0x461   : > { %6154 = vst [vmem:[%s226_s11] sm:$0x3] %v6153_v5 }
 0x462 PF: > { %s14_s14 = sadd.s32 1, %s7734_s14   ;;  %s10234_s12 = smov %s7730_s13 }
 0x463   : > { %p11_p5 = scmp.ge.s32.totalorder %s14_s14, 4   ;;  %s10235_s13 = smov %s10237_s15 }
 0x465   :  { %13 = sbr.rel (!%p11_p5) target bundleno = 2 (0x2), region = 78 }

</bundles_post_ra>
